<compile_context>
chip_gen: v7x
topology: tpu7x:2x2x1
jax: 0.10.0
libtpu: 0.0.40
codegen_flags: <defaults>
</compile_context>

<pallas_src>
import functools

import numpy as np

import jax
import jax.numpy as jnp
from jax import lax
from jax.experimental import pallas as pl
from jax.experimental.pallas import tpu as pltpu


# ---------------------------------------------------------------------------
# Pallas kernels
# ---------------------------------------------------------------------------
def _conv_pool_kernel(x_ref, wb_ref, bias_ref, o_ref, *, q):
    """Fused conv + bias + ReLU + 2x2 max-pool for a block of pooled rows.

    x_ref:    (tm, 6*W*Cin)   bf16  gathered rows (row r = the 6 input rows
                                    feeding pooled output row r, lane-concat)
    wb_ref:   (6*W*Cin, 4*Q)  bf16  banded conv weight; the 4 lane quadrants
                                    of the product are the 4 pool phases
    bias_ref: (1, Q)          f32   conv bias tiled over the pooled width
    o_ref:    (tm, Q)               pooled, ReLU'd NHWC activation (Q=OW/2*C)
    """
    acc = jnp.dot(x_ref[...], wb_ref[...], preferred_element_type=jnp.float32)
    m = jnp.maximum(jnp.maximum(acc[:, 0:q], acc[:, q:2 * q]),
                    jnp.maximum(acc[:, 2 * q:3 * q], acc[:, 3 * q:4 * q]))
    o_ref[...] = jnp.maximum(m + bias_ref[...], 0.0).astype(o_ref.dtype)


def _fc_fused_kernel(x_ref, w1_ref, b1_ref, w2_ref, b2_ref, w3_ref, b3_ref,
                     o_ref):
    """Fused fc1(relu) -> fc2(relu) -> fc3; bf16 weights, f32 accumulation."""
    h = jnp.dot(x_ref[...], w1_ref[...],
                preferred_element_type=jnp.float32) + b1_ref[...]
    h = jnp.maximum(h, 0.0).astype(w2_ref.dtype)
    h = jnp.dot(h, w2_ref[...],
                preferred_element_type=jnp.float32) + b2_ref[...]
    h = jnp.maximum(h, 0.0).astype(w3_ref.dtype)
    o_ref[...] = (jnp.dot(h, w3_ref[...], preferred_element_type=jnp.float32)
                  + b3_ref[...])


# ---------------------------------------------------------------------------
# Tiling / VMEM helpers
# ---------------------------------------------------------------------------
def _row_tile(m, target=512):
    """Sublane-aligned (x16) row tile; prefers a divisor of m and >=2 blocks
    so the parallel grid axis can shard across v7x's two TensorCores."""
    if m <= 32:
        return m                      # tiny: one full-extent block
    t = min(target, m // 2)
    t -= t % 16
    if t < 16:
        return m
    for cand in range(t, 15, -16):
        if m % cand == 0:
            return cand               # evenly dividing, >=2 blocks
    return t                          # aligned, ragged last block (masked)


def _vmem_limit(*block_bytes):
    """Explicit VMEM cap derived from the actual (double-buffered) block
    shapes, clamped well under v7x's 64 MiB/TC."""
    need = 2 * sum(int(b) for b in block_bytes) + (8 << 20)
    return int(min(max(need, 16 << 20), 48 << 20))


# ---------------------------------------------------------------------------
# Wrappers around pallas_call
# ---------------------------------------------------------------------------
def conv_pool_stage(g, wb, bias_q, *, out_dtype=jnp.bfloat16, row_target=512):
    """relu(maxpool2x2(conv+bias)) for one stage: g:(M,K) @ banded wb:(K,4Q)
    with a lane-local 4-way max epilogue; tiled over pooled rows (parallel)."""
    M, K = g.shape
    N = wb.shape[1]
    Q = N // 4
    tm = _row_tile(M, row_target)
    grid_m = pl.cdiv(M, tm)
    cost = pl.CostEstimate(
        flops=2 * M * K * N + 4 * M * Q,
        transcendentals=0,
        bytes_accessed=(g.size * g.dtype.itemsize + wb.size * wb.dtype.itemsize
                        + bias_q.size * bias_q.dtype.itemsize
                        + M * Q * jnp.dtype(out_dtype).itemsize))
    vmem = _vmem_limit(tm * K * 2, K * N * 2, Q * 4,
                       tm * N * 4, tm * Q * jnp.dtype(out_dtype).itemsize)
    return pl.pallas_call(
        functools.partial(_conv_pool_kernel, q=Q),
        grid=(grid_m,),
        in_specs=[
            pl.BlockSpec((tm, K), lambda i: (i, 0)),
            pl.BlockSpec((K, N), lambda i: (0, 0)),   # resident across grid
            pl.BlockSpec((1, Q), lambda i: (0, 0)),
        ],
        out_specs=pl.BlockSpec((tm, Q), lambda i: (i, 0)),
        out_shape=jax.ShapeDtypeStruct((M, Q), out_dtype),
        compiler_params=pltpu.CompilerParams(
            dimension_semantics=("parallel",),
            vmem_limit_bytes=vmem),
        cost_estimate=cost,
    )(g, wb, bias_q)


def fc_fused(x, w1, b1, w2, b2, w3, b3, *, row_target=256):
    """Single pallas_call for fc1(relu)+fc2(relu)+fc3, batch-tiled (parallel);
    bf16 weights stay VMEM-resident across the grid."""
    B, D0 = x.shape
    D1, D2, D3 = w1.shape[1], w2.shape[1], w3.shape[1]
    tb = _row_tile(B, row_target)
    grid_b = pl.cdiv(B, tb)

    def full(shape):
        return pl.BlockSpec(shape, lambda i: (0,) * len(shape))

    cost = pl.CostEstimate(
        flops=2 * B * (D0 * D1 + D1 * D2 + D2 * D3),
        transcendentals=0,
        bytes_accessed=(x.size * x.dtype.itemsize
                        + (w1.size + w2.size + w3.size) * 2
                        + (D1 + D2 + D3) * 4 + B * D3 * 4))
    vmem = _vmem_limit(tb * D0 * 2, D0 * D1 * 2, D1 * D2 * 2, D2 * D3 * 2,
                       tb * D1 * 4, tb * D3 * 4)
    return pl.pallas_call(
        _fc_fused_kernel,
        grid=(grid_b,),
        in_specs=[
            pl.BlockSpec((tb, D0), lambda i: (i, 0)),
            full((D0, D1)), full((1, D1)),
            full((D1, D2)), full((1, D2)),
            full((D2, D3)), full((1, D3)),
        ],
        out_specs=pl.BlockSpec((tb, D3), lambda i: (i, 0)),
        out_shape=jax.ShapeDtypeStruct((B, D3), jnp.float32),
        compiler_params=pltpu.CompilerParams(
            dimension_semantics=("parallel",),
            vmem_limit_bytes=vmem),
        cost_estimate=cost,
    )(x, w1, b1, w2, b2, w3, b3)


# ---------------------------------------------------------------------------
# XLA-side glue: row gather (tiny, replaces full im2col)
# ---------------------------------------------------------------------------
def _gather_pool_rows(x, kh):
    """x: (B, H, W*Cin) -> (B*OH2, (kh+1)*W*Cin), OH2 = (H - kh + 1) // 2.

    Row (b, r) holds input rows 2r .. 2r+kh of image b -- exactly the rows
    feeding pooled output row r. The conv itself happens inside the Pallas
    kernel against a banded weight, so no k*k im2col matrix is materialized.
    """
    # TODO(synk): this ~2.6x row duplication could move in-kernel via strided
    # ref reads (pl.ds(..., stride=2)) to read the raw activation directly.
    B, H, WC = x.shape
    OH2 = (H - kh + 1) // 2
    rows = [x[:, j:j + 2 * OH2 - 1:2, :] for j in range(kh + 1)]
    g = jnp.stack(rows, axis=2)                  # (B, OH2, kh+1, WC)
    return g.reshape(B * OH2, (kh + 1) * WC)


# ---------------------------------------------------------------------------
# Parameters (one-time re-layout) and forward pass
# ---------------------------------------------------------------------------
def _banded_pool_weight(w, w_in):
    """Conv weight (Cout, Cin, KH, KW) -> banded matrix ((KH+1)*W*Cin, 4*Q).

    Multiplying a gathered row block (_gather_pool_rows) by this matrix yields
    in four contiguous lane quadrants of width Q = OW/2*Cout the conv outputs
    of the four positions of each 2x2 pooling window, so the max-pool becomes
    a lane-local max inside the kernel.
    """
    w = np.asarray(w, np.float32)
    cout, cin, kh, kw = w.shape
    ow = w_in - kw + 1
    ow2 = ow // 2
    wc = w_in * cin
    q = ow2 * cout
    wt = np.transpose(w, (2, 3, 1, 0))           # (KH, KW, Cin, Cout)
    wb = np.zeros(((kh + 1) * wc, 4 * q), np.float32)
    for p in range(2):                           # pool row phase
        for s in range(2):                       # pool column phase
            quad = 2 * p + s
            for ikh in range(kh):
                for ikw in range(kw):
                    for o2 in range(ow2):
                        row = (p + ikh) * wc + (2 * o2 + s + ikw) * cin
                        col = quad * q + o2 * cout
                        wb[row:row + cin, col:col + cout] = wt[ikh, ikw]
    return wb


def init_params():
    key = jax.random.PRNGKey(42)
    ks = jax.random.split(key, 10)
    s = 0.05
    return {
        "conv1_w": jax.random.normal(ks[0], (16, 3, 5, 5), jnp.float32) * s,
        "conv1_b": jax.random.normal(ks[1], (16,), jnp.float32) * s,
        "conv2_w": jax.random.normal(ks[2], (32, 16, 5, 5), jnp.float32) * s,
        "conv2_b": jax.random.normal(ks[3], (32,), jnp.float32) * s,
        "fc1_w": jax.random.normal(ks[4], (120, 32 * 5 * 5), jnp.float32) * s,
        "fc1_b": jax.random.normal(ks[5], (120,), jnp.float32) * s,
        "fc2_w": jax.random.normal(ks[6], (84, 120), jnp.float32) * s,
        "fc2_b": jax.random.normal(ks[7], (84,), jnp.float32) * s,
        "fc3_w": jax.random.normal(ks[8], (10, 84), jnp.float32) * s,
        "fc3_b": jax.random.normal(ks[9], (10,), jnp.float32) * s,
    }


def prepare_params(p):
    """One-time weight re-layouts / casts, kept out of the per-step forward."""
    # fc1 expects PyTorch's (c, h, w) flatten; re-permute rows to accept our
    # NHWC (h, w, c) flatten so no runtime transpose is needed.
    fc1 = (np.asarray(p["fc1_w"], np.float32)
           .reshape(120, 32, 5, 5).transpose(2, 3, 1, 0).reshape(800, 120))
    return {
        "conv1_wb": jnp.asarray(_banded_pool_weight(p["conv1_w"], 32),
                                jnp.bfloat16),
        "conv1_bq": jnp.tile(p["conv1_b"], 14)[None, :].astype(jnp.float32),
        "conv2_wb": jnp.asarray(_banded_pool_weight(p["conv2_w"], 14),
                                jnp.bfloat16),
        "conv2_bq": jnp.tile(p["conv2_b"], 5)[None, :].astype(jnp.float32),
        "fc1_w": jnp.asarray(fc1, jnp.bfloat16),
        "fc1_b": p["fc1_b"][None, :],
        "fc2_w": p["fc2_w"].T.astype(jnp.bfloat16),
        "fc2_b": p["fc2_b"][None, :],
        "fc3_w": p["fc3_w"].T.astype(jnp.bfloat16),
        "fc3_b": p["fc3_b"][None, :],
    }


@jax.jit
def net_forward(x_nchw, params):
    B = x_nchw.shape[0]
    # NCHW -> (B, H, W*C) bf16 activations (accumulation stays f32 in-kernel)
    x = jnp.transpose(x_nchw, (0, 2, 3, 1)).reshape(B, 32, 32 * 3)
    x = x.astype(jnp.bfloat16)

    # conv1 (3->16, k=5) + bias + ReLU + 2x2 max-pool, one kernel
    g = _gather_pool_rows(x, 5)                                   # (B*14, 576)
    y = conv_pool_stage(g, params["conv1_wb"], params["conv1_bq"])  # (B*14,224)
    y = y.reshape(B, 14, 14 * 16)                                 # (B, H, W*C)

    # conv2 (16->32, k=5) + bias + ReLU + 2x2 max-pool, one kernel
    g = _gather_pool_rows(y, 5)                                   # (B*5, 1344)
    y = conv_pool_stage(g, params["conv2_wb"], params["conv2_bq"])  # (B*5, 160)

    # (B,5,5,32) NHWC flattened (h, w, c); fc1_w is pre-permuted for it
    y = y.reshape(B, 32 * 5 * 5)
    return fc_fused(y, params["fc1_w"], params["fc1_b"],
                    params["fc2_w"], params["fc2_b"],
                    params["fc3_w"], params["fc3_b"])             # (B, 10) f32


# ---------------------------------------------------------------------------
# Plain-XLA f32 reference (PyTorch semantics) for self-check
# ---------------------------------------------------------------------------
def _reference_forward(x, p):
    dn = ("NCHW", "OIHW", "NCHW")
    y = lax.conv_general_dilated(x, p["conv1_w"], (1, 1), "VALID",
                                 dimension_numbers=dn)
    y = jax.nn.relu(y + p["conv1_b"][None, :, None, None])
    y = lax.reduce_window(y, -jnp.inf, lax.max, (1, 1, 2, 2), (1, 1, 2, 2),
                          "VALID")
    y = lax.conv_general_dilated(y, p["conv2_w"], (1, 1), "VALID",
                                 dimension_numbers=dn)
    y = jax.nn.relu(y + p["conv2_b"][None, :, None, None])
    y = lax.reduce_window(y, -jnp.inf, lax.max, (1, 1, 2, 2), (1, 1, 2, 2),
                          "VALID")
    y = y.reshape(y.shape[0], -1)                 # PyTorch (c, h, w) flatten
    y = jax.nn.relu(y @ p["fc1_w"].T + p["fc1_b"])
    y = jax.nn.relu(y @ p["fc2_w"].T + p["fc2_b"])
    return y @ p["fc3_w"].T + p["fc3_b"]


if __name__ == "__main__":
    raw_params = init_params()
    params = prepare_params(raw_params)
    # Input spatial size must be 32x32 (CIFAR-10) to match fc1 = 32*5*5.
    x = jax.random.normal(jax.random.PRNGKey(0), (2, 3, 32, 32), jnp.float32)
    out = jax.block_until_ready(net_forward(x, params))
    assert out.shape == (2, 10) and out.dtype == jnp.float32
    # Self-check vs the f32 XLA reference (bf16 activations -> loose tol).
    ref = jax.block_until_ready(_reference_forward(x, raw_params))
    err = float(jnp.max(jnp.abs(out - ref)))
    tol = 1e-1 * max(1.0, float(jnp.max(jnp.abs(ref))))
    assert err < tol, f"kernel/reference mismatch: max abs err = {err}"
    print("KERNEL_OK")
</pallas_src>

<mosaic_0001>
module attributes {stable_mosaic.version = 11 : i64} {
  func.func @_conv_pool_kernel(%arg0: i32, %arg1: memref<28x576xbf16, #tpu.memory_space<vmem>>, %arg2: memref<576x896xbf16, #tpu.memory_space<vmem>>, %arg3: memref<1x224xf32, #tpu.memory_space<vmem>>, %arg4: memref<28x224xbf16, #tpu.memory_space<vmem>>) attributes {dimension_semantics = [#tpu.dimension_semantics<parallel>], iteration_bounds = array<i64: 1>, scalar_prefetch = 0 : i64, scratch_operands = 0 : i64, tpu.core_type = #tpu.core_type<tc>, window_params = [{transform_indices = @transform_0, window_bounds = array<i64: 28, 576>}, {pipeline_mode = #tpu.pipeline_mode<synchronous>, transform_indices = @transform_1, window_bounds = array<i64: 576, 896>}, {pipeline_mode = #tpu.pipeline_mode<synchronous>, transform_indices = @transform_2, window_bounds = array<i64: 1, 224>}, {transform_indices = @transform_3, window_bounds = array<i64: 28, 224>}]} {
    %c0 = arith.constant 0 : index
    %c0_0 = arith.constant 0 : index
    %0 = vector.load %arg1[%c0, %c0_0] : memref<28x576xbf16, #tpu.memory_space<vmem>>, vector<28x576xbf16>
    %c0_1 = arith.constant 0 : index
    %c0_2 = arith.constant 0 : index
    %1 = vector.load %arg2[%c0_1, %c0_2] : memref<576x896xbf16, #tpu.memory_space<vmem>>, vector<576x896xbf16>
    %cst = arith.constant dense<0.000000e+00> : vector<28x896xf32>
    %2 = tpu.matmul %0, %1, %cst {dimension_numbers = #tpu.dot_dimension_numbers<[1], [0], [0], [1], [0, 0, 1, 1], [], []>} : vector<28x576xbf16>, vector<576x896xbf16>, vector<28x896xf32> -> vector<28x896xf32>
    %3 = vector.extract_strided_slice %2 {offsets = [0, 0], sizes = [28, 224], strides = [1, 1]} : vector<28x896xf32> to vector<28x224xf32>
    %4 = vector.extract_strided_slice %2 {offsets = [0, 224], sizes = [28, 224], strides = [1, 1]} : vector<28x896xf32> to vector<28x224xf32>
    %5 = arith.maximumf %3, %4 : vector<28x224xf32>
    %6 = vector.extract_strided_slice %2 {offsets = [0, 448], sizes = [28, 224], strides = [1, 1]} : vector<28x896xf32> to vector<28x224xf32>
    %7 = vector.extract_strided_slice %2 {offsets = [0, 672], sizes = [28, 224], strides = [1, 1]} : vector<28x896xf32> to vector<28x224xf32>
    %8 = arith.maximumf %6, %7 : vector<28x224xf32>
    %9 = arith.maximumf %5, %8 : vector<28x224xf32>
    %c0_3 = arith.constant 0 : index
    %c0_4 = arith.constant 0 : index
    %10 = vector.load %arg3[%c0_3, %c0_4] : memref<1x224xf32, #tpu.memory_space<vmem>>, vector<1x224xf32>
    %11 = vector.broadcast %10 : vector<1x224xf32> to vector<28x224xf32>
    %12 = arith.addf %9, %11 : vector<28x224xf32>
    %cst_5 = arith.constant 0.000000e+00 : f32
    %13 = vector.broadcast %cst_5 : f32 to vector<28x224xf32>
    %14 = arith.maximumf %12, %13 : vector<28x224xf32>
    %15 = arith.truncf %14 : vector<28x224xf32> to vector<28x224xbf16>
    %c0_6 = arith.constant 0 : index
    %c0_7 = arith.constant 0 : index
    %16 = vector.load %arg4[%c0_6, %c0_7] : memref<28x224xbf16, #tpu.memory_space<vmem>>, vector<28x224xbf16>
    tpu.vector_store %arg4[%c0_6, %c0_7], %15 {strides = array<i32>} : memref<28x224xbf16, #tpu.memory_space<vmem>>, vector<28x224xbf16>,
    return
  }
  func.func @transform_0(%arg0: i32) -> (i32, i32) {
    %c0_i32 = arith.constant 0 : i32
    %c0_i32_0 = arith.constant 0 : i32
    return %arg0, %c0_i32 : i32, i32
  }
  func.func @transform_1(%arg0: i32) -> (i32, i32) {
    %c0_i32 = arith.constant 0 : i32
    %c0_i32_0 = arith.constant 0 : i32
    %c0_i32_1 = arith.constant 0 : i32
    return %c0_i32, %c0_i32_0 : i32, i32
  }
  func.func @transform_2(%arg0: i32) -> (i32, i32) {
    %c0_i32 = arith.constant 0 : i32
    %c0_i32_0 = arith.constant 0 : i32
    %c0_i32_1 = arith.constant 0 : i32
    return %c0_i32, %c0_i32_0 : i32, i32
  }
  func.func @transform_3(%arg0: i32) -> (i32, i32) {
    %c0_i32 = arith.constant 0 : i32
    %c0_i32_0 = arith.constant 0 : i32
    return %arg0, %c0_i32 : i32, i32
  }
}

module attributes {stable_mosaic.version = 11 : i64} {
  func.func @_conv_pool_kernel(%arg0: i32, %arg1: memref<10x1344xbf16, #tpu.memory_space<vmem>>, %arg2: memref<1344x640xbf16, #tpu.memory_space<vmem>>, %arg3: memref<1x160xf32, #tpu.memory_space<vmem>>, %arg4: memref<10x160xbf16, #tpu.memory_space<vmem>>) attributes {dimension_semantics = [#tpu.dimension_semantics<parallel>], iteration_bounds = array<i64: 1>, scalar_prefetch = 0 : i64, scratch_operands = 0 : i64, tpu.core_type = #tpu.core_type<tc>, window_params = [{transform_indices = @transform_0, window_bounds = array<i64: 10, 1344>}, {pipeline_mode = #tpu.pipeline_mode<synchronous>, transform_indices = @transform_1, window_bounds = array<i64: 1344, 640>}, {pipeline_mode = #tpu.pipeline_mode<synchronous>, transform_indices = @transform_2, window_bounds = array<i64: 1, 160>}, {transform_indices = @transform_3, window_bounds = array<i64: 10, 160>}]} {
    %c0 = arith.constant 0 : index
    %c0_0 = arith.constant 0 : index
    %0 = vector.load %arg1[%c0, %c0_0] : memref<10x1344xbf16, #tpu.memory_space<vmem>>, vector<10x1344xbf16>
    %c0_1 = arith.constant 0 : index
    %c0_2 = arith.constant 0 : index
    %1 = vector.load %arg2[%c0_1, %c0_2] : memref<1344x640xbf16, #tpu.memory_space<vmem>>, vector<1344x640xbf16>
    %cst = arith.constant dense<0.000000e+00> : vector<10x640xf32>
    %2 = tpu.matmul %0, %1, %cst {dimension_numbers = #tpu.dot_dimension_numbers<[1], [0], [0], [1], [0, 0, 1, 1], [], []>} : vector<10x1344xbf16>, vector<1344x640xbf16>, vector<10x640xf32> -> vector<10x640xf32>
    %3 = vector.extract_strided_slice %2 {offsets = [0, 0], sizes = [10, 160], strides = [1, 1]} : vector<10x640xf32> to vector<10x160xf32>
    %4 = vector.extract_strided_slice %2 {offsets = [0, 160], sizes = [10, 160], strides = [1, 1]} : vector<10x640xf32> to vector<10x160xf32>
    %5 = arith.maximumf %3, %4 : vector<10x160xf32>
    %6 = vector.extract_strided_slice %2 {offsets = [0, 320], sizes = [10, 160], strides = [1, 1]} : vector<10x640xf32> to vector<10x160xf32>
    %7 = vector.extract_strided_slice %2 {offsets = [0, 480], sizes = [10, 160], strides = [1, 1]} : vector<10x640xf32> to vector<10x160xf32>
    %8 = arith.maximumf %6, %7 : vector<10x160xf32>
    %9 = arith.maximumf %5, %8 : vector<10x160xf32>
    %c0_3 = arith.constant 0 : index
    %c0_4 = arith.constant 0 : index
    %10 = vector.load %arg3[%c0_3, %c0_4] : memref<1x160xf32, #tpu.memory_space<vmem>>, vector<1x160xf32>
    %11 = vector.broadcast %10 : vector<1x160xf32> to vector<10x160xf32>
    %12 = arith.addf %9, %11 : vector<10x160xf32>
    %cst_5 = arith.constant 0.000000e+00 : f32
    %13 = vector.broadcast %cst_5 : f32 to vector<10x160xf32>
    %14 = arith.maximumf %12, %13 : vector<10x160xf32>
    %15 = arith.truncf %14 : vector<10x160xf32> to vector<10x160xbf16>
    %c0_6 = arith.constant 0 : index
    %c0_7 = arith.constant 0 : index
    %16 = vector.load %arg4[%c0_6, %c0_7] : memref<10x160xbf16, #tpu.memory_space<vmem>>, vector<10x160xbf16>
    tpu.vector_store %arg4[%c0_6, %c0_7], %15 {strides = array<i32>} : memref<10x160xbf16, #tpu.memory_space<vmem>>, vector<10x160xbf16>,
    return
  }
  func.func @transform_0(%arg0: i32) -> (i32, i32) {
    %c0_i32 = arith.constant 0 : i32
    %c0_i32_0 = arith.constant 0 : i32
    return %arg0, %c0_i32 : i32, i32
  }
  func.func @transform_1(%arg0: i32) -> (i32, i32) {
    %c0_i32 = arith.constant 0 : i32
    %c0_i32_0 = arith.constant 0 : i32
    %c0_i32_1 = arith.constant 0 : i32
    return %c0_i32, %c0_i32_0 : i32, i32
  }
  func.func @transform_2(%arg0: i32) -> (i32, i32) {
    %c0_i32 = arith.constant 0 : i32
    %c0_i32_0 = arith.constant 0 : i32
    %c0_i32_1 = arith.constant 0 : i32
    return %c0_i32, %c0_i32_0 : i32, i32
  }
  func.func @transform_3(%arg0: i32) -> (i32, i32) {
    %c0_i32 = arith.constant 0 : i32
    %c0_i32_0 = arith.constant 0 : i32
    return %arg0, %c0_i32 : i32, i32
  }
}

module attributes {stable_mosaic.version = 11 : i64} {
  func.func @_fc_fused_kernel(%arg0: i32, %arg1: memref<2x800xbf16, #tpu.memory_space<vmem>>, %arg2: memref<800x120xbf16, #tpu.memory_space<vmem>>, %arg3: memref<1x120xf32, #tpu.memory_space<vmem>>, %arg4: memref<120x84xbf16, #tpu.memory_space<vmem>>, %arg5: memref<1x84xf32, #tpu.memory_space<vmem>>, %arg6: memref<84x10xbf16, #tpu.memory_space<vmem>>, %arg7: memref<1x10xf32, #tpu.memory_space<vmem>>, %arg8: memref<2x10xf32, #tpu.memory_space<vmem>>) attributes {dimension_semantics = [#tpu.dimension_semantics<parallel>], iteration_bounds = array<i64: 1>, scalar_prefetch = 0 : i64, scratch_operands = 0 : i64, tpu.core_type = #tpu.core_type<tc>, window_params = [{transform_indices = @transform_0, window_bounds = array<i64: 2, 800>}, {pipeline_mode = #tpu.pipeline_mode<synchronous>, transform_indices = @transform_1, window_bounds = array<i64: 800, 120>}, {pipeline_mode = #tpu.pipeline_mode<synchronous>, transform_indices = @transform_2, window_bounds = array<i64: 1, 120>}, {pipeline_mode = #tpu.pipeline_mode<synchronous>, transform_indices = @transform_3, window_bounds = array<i64: 120, 84>}, {pipeline_mode = #tpu.pipeline_mode<synchronous>, transform_indices = @transform_4, window_bounds = array<i64: 1, 84>}, {pipeline_mode = #tpu.pipeline_mode<synchronous>, transform_indices = @transform_5, window_bounds = array<i64: 84, 10>}, {pipeline_mode = #tpu.pipeline_mode<synchronous>, transform_indices = @transform_6, window_bounds = array<i64: 1, 10>}, {transform_indices = @transform_7, window_bounds = array<i64: 2, 10>}]} {
    %c0 = arith.constant 0 : index
    %c0_0 = arith.constant 0 : index
    %0 = vector.load %arg1[%c0, %c0_0] : memref<2x800xbf16, #tpu.memory_space<vmem>>, vector<2x800xbf16>
    %c0_1 = arith.constant 0 : index
    %c0_2 = arith.constant 0 : index
    %1 = vector.load %arg2[%c0_1, %c0_2] : memref<800x120xbf16, #tpu.memory_space<vmem>>, vector<800x120xbf16>
    %cst = arith.constant dense<0.000000e+00> : vector<2x120xf32>
    %2 = tpu.matmul %0, %1, %cst {dimension_numbers = #tpu.dot_dimension_numbers<[1], [0], [0], [1], [0, 0, 1, 1], [], []>} : vector<2x800xbf16>, vector<800x120xbf16>, vector<2x120xf32> -> vector<2x120xf32>
    %c0_3 = arith.constant 0 : index
    %c0_4 = arith.constant 0 : index
    %3 = vector.load %arg3[%c0_3, %c0_4] : memref<1x120xf32, #tpu.memory_space<vmem>>, vector<1x120xf32>
    %4 = vector.broadcast %3 : vector<1x120xf32> to vector<2x120xf32>
    %5 = arith.addf %2, %4 : vector<2x120xf32>
    %cst_5 = arith.constant 0.000000e+00 : f32
    %6 = vector.broadcast %cst_5 : f32 to vector<2x120xf32>
    %7 = arith.maximumf %5, %6 : vector<2x120xf32>
    %8 = arith.truncf %7 : vector<2x120xf32> to vector<2x120xbf16>
    %c0_6 = arith.constant 0 : index
    %c0_7 = arith.constant 0 : index
    %9 = vector.load %arg4[%c0_6, %c0_7] : memref<120x84xbf16, #tpu.memory_space<vmem>>, vector<120x84xbf16>
    %cst_8 = arith.constant dense<0.000000e+00> : vector<2x84xf32>
    %10 = tpu.matmul %8, %9, %cst_8 {dimension_numbers = #tpu.dot_dimension_numbers<[1], [0], [0], [1], [0, 0, 1, 1], [], []>} : vector<2x120xbf16>, vector<120x84xbf16>, vector<2x84xf32> -> vector<2x84xf32>
    %c0_9 = arith.constant 0 : index
    %c0_10 = arith.constant 0 : index
    %11 = vector.load %arg5[%c0_9, %c0_10] : memref<1x84xf32, #tpu.memory_space<vmem>>, vector<1x84xf32>
    %12 = vector.broadcast %11 : vector<1x84xf32> to vector<2x84xf32>
    %13 = arith.addf %10, %12 : vector<2x84xf32>
    %cst_11 = arith.constant 0.000000e+00 : f32
    %14 = vector.broadcast %cst_11 : f32 to vector<2x84xf32>
    %15 = arith.maximumf %13, %14 : vector<2x84xf32>
    %16 = arith.truncf %15 : vector<2x84xf32> to vector<2x84xbf16>
    %c0_12 = arith.constant 0 : index
    %c0_13 = arith.constant 0 : index
    %17 = vector.load %arg6[%c0_12, %c0_13] : memref<84x10xbf16, #tpu.memory_space<vmem>>, vector<84x10xbf16>
    %cst_14 = arith.constant dense<0.000000e+00> : vector<2x10xf32>
    %18 = tpu.matmul %16, %17, %cst_14 {dimension_numbers = #tpu.dot_dimension_numbers<[1], [0], [0], [1], [0, 0, 1, 1], [], []>} : vector<2x84xbf16>, vector<84x10xbf16>, vector<2x10xf32> -> vector<2x10xf32>
    %c0_15 = arith.constant 0 : index
    %c0_16 = arith.constant 0 : index
    %19 = vector.load %arg7[%c0_15, %c0_16] : memref<1x10xf32, #tpu.memory_space<vmem>>, vector<1x10xf32>
    %20 = vector.broadcast %19 : vector<1x10xf32> to vector<2x10xf32>
    %21 = arith.addf %18, %20 : vector<2x10xf32>
    %c0_17 = arith.constant 0 : index
    %c0_18 = arith.constant 0 : index
    %22 = vector.load %arg8[%c0_17, %c0_18] : memref<2x10xf32, #tpu.memory_space<vmem>>, vector<2x10xf32>
    tpu.vector_store %arg8[%c0_17, %c0_18], %21 {strides = array<i32>} : memref<2x10xf32, #tpu.memory_space<vmem>>, vector<2x10xf32>,
    return
  }
  func.func @transform_0(%arg0: i32) -> (i32, i32) {
    %c0_i32 = arith.constant 0 : i32
    %c0_i32_0 = arith.constant 0 : i32
    return %arg0, %c0_i32 : i32, i32
  }
  func.func @transform_1(%arg0: i32) -> (i32, i32) {
    %c0_i32 = arith.constant 0 : i32
    %c0_i32_0 = arith.constant 0 : i32
    %c0_i32_1 = arith.constant 0 : i32
    return %c0_i32, %c0_i32_0 : i32, i32
  }
  func.func @transform_2(%arg0: i32) -> (i32, i32) {
    %c0_i32 = arith.constant 0 : i32
    %c0_i32_0 = arith.constant 0 : i32
    %c0_i32_1 = arith.constant 0 : i32
    return %c0_i32, %c0_i32_0 : i32, i32
  }
  func.func @transform_3(%arg0: i32) -> (i32, i32) {
    %c0_i32 = arith.constant 0 : i32
    %c0_i32_0 = arith.constant 0 : i32
    %c0_i32_1 = arith.constant 0 : i32
    return %c0_i32, %c0_i32_0 : i32, i32
  }
  func.func @transform_4(%arg0: i32) -> (i32, i32) {
    %c0_i32 = arith.constant 0 : i32
    %c0_i32_0 = arith.constant 0 : i32
    %c0_i32_1 = arith.constant 0 : i32
    return %c0_i32, %c0_i32_0 : i32, i32
  }
  func.func @transform_5(%arg0: i32) -> (i32, i32) {
    %c0_i32 = arith.constant 0 : i32
    %c0_i32_0 = arith.constant 0 : i32
    %c0_i32_1 = arith.constant 0 : i32
    return %c0_i32, %c0_i32_0 : i32, i32
  }
  func.func @transform_6(%arg0: i32) -> (i32, i32) {
    %c0_i32 = arith.constant 0 : i32
    %c0_i32_0 = arith.constant 0 : i32
    %c0_i32_1 = arith.constant 0 : i32
    return %c0_i32, %c0_i32_0 : i32, i32
  }
  func.func @transform_7(%arg0: i32) -> (i32, i32) {
    %c0_i32 = arith.constant 0 : i32
    %c0_i32_0 = arith.constant 0 : i32
    return %arg0, %c0_i32 : i32, i32
  }
}

</mosaic_0001>

<bundles_post_ra>
// kernel: net_forward.5
= control target key start
LH: loop header
LB: loop body
LE: loop exit
PB: predicated region body
PF: predicated region fallthrough
CT: control target
= control target key end

     0   :  { %v141_v29 = vlaneseq  ;;  %v1181_v33 = vmov 1966171168   ;;  %v1182_v40 = vmov 0.0   ;;  %vm1183_vm0 = vmmov 0   ;;  %s1463_s0 = inlined_call_operand.vmem [shape: bf16[2,800], index: 0, kind: input, shape index: {}]   ;;  %s1464_s1 = inlined_call_operand.vmem [shape: bf16[800,120], index: 1, kind: input, shape index: {}]   ;;  %s1465_s2 = inlined_call_operand.vmem [shape: f32[1,120], index: 2, kind: input, shape index: {}]   ;;  %s1466_s3 = inlined_call_operand.vmem [shape: bf16[120,84], index: 3, kind: input, shape index: {}]   ;;  %s1467_s4 = inlined_call_operand.vmem [shape: f32[1,84], index: 4, kind: input, shape index: {}]   ;;  %s1468_s5 = inlined_call_operand.vmem [shape: bf16[84,10], index: 5, kind: input, shape index: {}]   ;;  %s1469_s6 = inlined_call_operand.vmem [shape: f32[1,10], index: 6, kind: input, shape index: {}]   ;;  %s1470_s7 = inlined_call_operand.hbm [shape: f32[2,10], index: 7, kind: output, shape index: {}]  }
   0x1   :  { %v1092_v0 = vld [vmem:[%s1464_s1 + $0x40] sm:$0xff]   ;;  %v1096_v4 = vld [vmem:[%s1464_s1 + $0x48] sm:$0xff]   ;;  %v1100_v8 = vld [vmem:[%s1464_s1 + $0x50] sm:$0xff]   ;;  %v139_v34 = vunpack.c.l.s4 %v1181_v33  ;;  %vm491_vm1 = vcmask 261120  }
   0x2   :  { %v1093_v1 = vld [vmem:[%s1464_s1] sm:$0xff]   ;;  %959 = vmatprep.subr.bf16.mxu0 %v1092_v0  ;;  %v1097_v5 = vld [vmem:[%s1464_s1 + $0x8] sm:$0xff]   ;;  %v1101_v9 = vld [vmem:[%s1464_s1 + $0x10] sm:$0xff]   ;;  %v142_v35 = vshrl.u32 %v141_v29, 7 }
   0x3   :  { %v1094_v2 = vld [vmem:[%s1464_s1 + $0xc0] sm:$0xff]   ;;  %960 = vmatpush3.bf16.msra.mxu0 %v1093_v1  ;;  %v1098_v6 = vld [vmem:[%s1464_s1 + $0xc8] sm:$0xff]   ;;  %v1102_v10 = vld [vmem:[%s1464_s1 + $0xd0] sm:$0xff]   ;;  %v140_v39 = vunpack.c.0.s8 %v139_v34 }
   0x4   :  { %v1095_v3 = vld [vmem:[%s1464_s1 + $0x80] sm:$0xff]   ;;  %981 = vmatprep.subr.bf16.mxu1 %v1094_v2  ;;  %961 = vmatprep.subr.bf16.mxu0 %v1096_v4  ;;  %v1099_v7 = vld [vmem:[%s1464_s1 + $0x88] sm:$0xff]   ;;  %v1103_v11 = vld [vmem:[%s1464_s1 + $0x90] sm:$0xff]  }
   0x5   :  { %982 = vmatpush3.bf16.msra.mxu1 %v1095_v3  ;;  %v1104_v12 = vld [vmem:[%s1464_s1 + $0x58] sm:$0xff]   ;;  %v1108_v16 = vld [vmem:[%s1464_s1 + $0x60] sm:$0xff]   ;;  %v1112_v20 = vld [vmem:[%s1464_s1 + $0x68] sm:$0xff]   ;;  %v143_v41 = vsub.s32 %v140_v39, %v142_v35 }
   0x6   :  { %983 = vmatprep.subr.bf16.mxu1 %v1098_v6  ;;  %v1105_v13 = vld [vmem:[%s1464_s1 + $0x18] sm:$0xff]   ;;  %v1109_v17 = vld [vmem:[%s1464_s1 + $0x20] sm:$0xff]   ;;  %v1113_v21 = vld [vmem:[%s1464_s1 + $0x28] sm:$0xff]  }
   0x7   :  { %962 = vmatpush3.bf16.msra.mxu0 %v1097_v5  ;;  %v1106_v14 = vld [vmem:[%s1464_s1 + $0xd8] sm:$0xff]   ;;  %v1110_v18 = vld [vmem:[%s1464_s1 + $0xe0] sm:$0xff]   ;;  %v1114_v22 = vld [vmem:[%s1464_s1 + $0xe8] sm:$0xff]  }
   0x8   :  { %963 = vmatprep.subr.bf16.mxu0 %v1100_v8  ;;  %v1107_v15 = vld [vmem:[%s1464_s1 + $0x98] sm:$0xff]   ;;  %v1111_v19 = vld [vmem:[%s1464_s1 + $0xa0] sm:$0xff]   ;;  %v1115_v23 = vld [vmem:[%s1464_s1 + $0xa8] sm:$0xff]  }
   0x9   :  { %984 = vmatpush3.bf16.msra.mxu1 %v1099_v7  ;;  %v1116_v24 = vld [vmem:[%s1464_s1 + $0x70] sm:$0xff]   ;;  %v1120_v28 = vld [vmem:[%s1464_s1 + $0x78] sm:$0xff]   ;;  %v28_v32 = vld [vmem:[%s1463_s0] sm:$0x7f] }
   0xa   :  { %985 = vmatprep.subr.bf16.mxu1 %v1102_v10  ;;  %v1117_v25 = vld [vmem:[%s1464_s1 + $0x30] sm:$0xff]   ;;  %v1121_v30 = vld [vmem:[%s1464_s1 + $0x38] sm:$0xff]   ;;  %v1125_v37 = vld [vmem:[%s1464_s1 + $0x140] sm:$0xff]   ;;  %v137_v38 = vcombine.high %v28_v32, %v28_v32  ;;  %v144_v42 = vrot.slane %v28_v32, %v143_v41 }
   0xb   :  { %964 = vmatpush3.bf16.msra.mxu0 %v1101_v9  ;;  %v1118_v26 = vld [vmem:[%s1464_s1 + $0xf0] sm:$0xff]   ;;  %v1122_v31 = vld [vmem:[%s1464_s1 + $0xf8] sm:$0xff]   ;;  %v1126_v48 = vld [vmem:[%s1464_s1 + $0x100] sm:$0xff]  }
   0xc   :  { %965 = vmatprep.subr.bf16.mxu0 %v1104_v12  ;;  %v1119_v27 = vld [vmem:[%s1464_s1 + $0xb0] sm:$0xff]   ;;  %v1124_v36 = vld [vmem:[%s1464_s1 + $0xb8] sm:$0xff]   ;;  %v151_v43 = vrot.slane %v137_v38, %v143_v41  ;;  %v152_v44 = vcombine.high %v144_v42, %v144_v42  ;;  %v160_v45 = vrot.slane %v144_v42, %v143_v41  ;;  %v1127_v50 = vld [vmem:[%s1464_s1 + $0x148] sm:$0xff]  }
   0xd   :  { %986 = vmatpush3.bf16.msra.mxu1 %v1103_v11  ;;  %v1128_v53 = vld [vmem:[%s1464_s1 + $0x108] sm:$0xff]   ;;  %v1129_v54 = vld [vmem:[%s1464_s1 + $0x150] sm:$0xff]   ;;  %v1139_v55 = vld [vmem:[%s1464_s1 + $0x180] sm:$0xff]  }
   0xe   :  { %987 = vmatprep.subr.bf16.mxu1 %v1106_v14  ;;  %v153_v46 = vcombine.high %v151_v43, %v151_v43  ;;  %v174_v47 = vrot.slane %v152_v44, %v143_v41  ;;  %v182_v49 = vcombine.high %v160_v45, %v160_v45  ;;  %v1130_v56 = vld [vmem:[%s1464_s1 + $0x110] sm:$0xff]   ;;  %v167_v57 = vrot.slane %v151_v43, %v143_v41  ;;  %v1131_v58 = vld [vmem:[%s1464_s1 + $0x158] sm:$0xff]   ;;  %v1142_v59 = vld [vmem:[%s1464_s1 + $0x188] sm:$0xff]  }
   0xf   :  { %966 = vmatpush3.bf16.msra.mxu0 %v1105_v13  ;;  %v1132_v60 = vld [vmem:[%s1464_s1 + $0x118] sm:$0xff]   ;;  %v1133_v62 = vld [vmem:[%s1464_s1 + $0x160] sm:$0xff]   ;;  %v1135_v0 = vld [vmem:[%s1464_s1 + $0x168] sm:$0xff]  }
  0x10   :  { %967 = vmatprep.subr.bf16.mxu0 %v1108_v16  ;;  %527 = vmatprep.mubr.bf16.mxu0 %v174_v47  ;;  %v184_v51 = vcombine.high %v174_v47, %v174_v47  ;;  %v181_v52 = vrot.slane %v153_v46, %v143_v41  ;;  %v183_v61 = vcombine.high %v167_v57, %v167_v57  ;;  %v1134_v63 = vld [vmem:[%s1464_s1 + $0x120] sm:$0xff]  }
  0x11   :  { %988 = vmatpush3.bf16.msra.mxu1 %v1107_v15 }
  0x12   :  { %989 = vmatprep.subr.bf16.mxu1 %v1110_v18  ;;  %567 = vmatprep.mubr.bf16.mxu1 %v184_v51 }
  0x13   :  { %968 = vmatpush3.bf16.msra.mxu0 %v1109_v17 }
  0x14   :  { %969 = vmatprep.subr.bf16.mxu0 %v1112_v20 }
  0x15   :  { %990 = vmatpush3.bf16.msra.mxu1 %v1111_v19 }
  0x16   :  { %991 = vmatprep.subr.bf16.mxu1 %v1114_v22 }
  0x17   :  { %970 = vmatpush3.bf16.msra.mxu0 %v1113_v21 }
  0x18   :  { %971 = vmatprep.subr.bf16.mxu0 %v1116_v24 }
  0x19   :  { %992 = vmatpush3.bf16.msra.mxu1 %v1115_v23 }
  0x1a   :  { %993 = vmatprep.subr.bf16.mxu1 %v1118_v26 }
  0x1b   :  { %972 = vmatpush3.bf16.msra.mxu0 %v1117_v25 }
  0x1c   :  { %973 = vmatprep.subr.bf16.mxu0 %v1120_v28 }
  0x1d   :  { %994 = vmatpush3.bf16.msra.mxu1 %v1119_v27 }
  0x1e   :  { %995 = vmatprep.subr.bf16.mxu1 %v1122_v31 }
  0x1f   :  { %974 = vmatpush3.bf16.msra.mxu0 %v1121_v30 }
  0x20   :  { %1003 = vmatprep.subr.bf16.mxu0 %v1125_v37 }
  0x21   :  { %996 = vmatpush3.bf16.msra.mxu1 %v1124_v36 }
  0x22   :  { %1044 = vmatprep.subr.bf16.mxu1 %v1182_v40  ;;  %528 = vmatmul.mubr.bf16.vlgmr.msra.gmra.mrb[0].mxu0 %v160_v45 }
  0x23   :  { %1004 = vmatpush3.bf16.msra.mxu0 %v1126_v48  ;;  %607 = vmatprep.mubr.bf16.mxu0 %v181_v52 }
  0x24   :  { %568 = vmatmul.mubr.bf16.vlgmr.msra.gmra.mrb[0].mxu1 %v182_v49  ;;  %1005 = vmatprep.subr.bf16.mxu0 %v1127_v50 }
  0x25   :  { %1048 = vmatprep.mubr.msk.bf16.mxu1 %vm1183_vm0, %v1182_v40  ;;  %1045 = vmatpush3.bf16.msra.mxu1 %v1139_v55 }
  0x26   :  { %1046 = vmatprep.subr.bf16.mxu1 %v1182_v40 }
  0x27   :  { %1006 = vmatpush3.bf16.msra.mxu0 %v1128_v53 }
  0x28   :  { %1007 = vmatprep.subr.bf16.mxu0 %v1129_v54 }
  0x29   :  { %1047 = vmatpush3.bf16.msra.mxu1 %v1142_v59 }
  0x2a   :  { %1052 = vmatprep.subr.bf16.mxu1 %v1182_v40 }
  0x2b   :  { %1008 = vmatpush3.bf16.msra.mxu0 %v1130_v56 }
  0x2c   :  { %1009 = vmatprep.subr.bf16.mxu0 %v1131_v58  ;;  %1049 = vmatmul.mubr.msk.bf16.vlgmr.msra.gmra.mrb[4].mxu1 %vm491_vm1, %v183_v61 }
  0x2d   :  { %1068 = vmatprep.mubr.msk.bf16.mxu1 %vm1183_vm0, %v1182_v40 }
  0x2f   :  { %1010 = vmatpush3.bf16.msra.mxu0 %v1132_v60 }
  0x30   :  { %1011 = vmatprep.subr.bf16.mxu0 %v1133_v62 }
  0x31   :  { %12 = vsyncpa [#allocation3], 0  ;;  %v1136_v1 = vld [vmem:[%s1464_s1 + $0x128] sm:$0xff]   ;;  %v1137_v2 = vld [vmem:[%s1464_s1 + $0x170] sm:$0xff]   ;;  %vm728_vm2 = vcmask 1043456   ;;  %vm724_vm3 = vcmask 982016  }
  0x32   :  { %v1138_v3 = vld [vmem:[%s1464_s1 + $0x130] sm:$0xff]   ;;  %v1140_v4 = vld [vmem:[%s1464_s1 + $0x178] sm:$0xff]   ;;  %v1143_v6 = vld [vmem:[%s1466_s3] sm:$0xff]   ;;  %vm829_vm4 = vcmask 1041408   ;;  %vm825_vm5 = vcmask 687104   ;;  %vm873_vm6 = vcmask 74752  }
  0x33   :  { %1012 = vmatpush3.bf16.msra.mxu0 %v1134_v63  ;;  %v1141_v5 = vld [vmem:[%s1464_s1 + $0x138] sm:$0xff]   ;;  %1053 = vmatpush3.bf16.msra.mxu1 %v1143_v6  ;;  %v1144_v7 = vld [vmem:[%s1466_s3 + $0x8] sm:$0xff]   ;;  %v1145_v8 = vld [vmem:[%s1466_s3 + $0x10] sm:$0xff]  }
  0x34   :  { %1013 = vmatprep.subr.bf16.mxu0 %v1135_v0  ;;  %1054 = vmatprep.subr.bf16.mxu1 %v1182_v40  ;;  %v1146_v9 = vld [vmem:[%s1466_s3 + $0x18] sm:$0xff]   ;;  %v1147_v10 = vld [vmem:[%s1466_s3 + $0x20] sm:$0xff]   ;;  %v1148_v11 = vld [vmem:[%s1466_s3 + $0x28] sm:$0xff]  }
  0x35   :  { %v1149_v12 = vld [vmem:[%s1466_s3 + $0x30] sm:$0xff]   ;;  %v1150_v13 = vld [vmem:[%s1466_s3 + $0x38] ss:$0 sps:$4 sm:$0xff]   ;;  %v1151_v15 = vld [vmem:[%s1468_s5] sm:$0xff]  }
  0x36   :  { %v730_v14 = vsel %vm728_vm2, %v1150_v13, 0  ;;  %v1152_v16 = vld [vmem:[%s1468_s5 + $0x8] sm:$0xff]   ;;  %v1153_v17 = vld [vmem:[%s1468_s5 + $0x10] sm:$0xff]   ;;  %v1154_v18 = vld [vmem:[%s1468_s5 + $0x18] sm:$0xff]  }
  0x37   :  { %1014 = vmatpush3.bf16.msra.mxu0 %v1136_v1  ;;  %1055 = vmatpush3.bf16.msra.mxu1 %v1144_v7  ;;  %v889_v20 = vld [vmem:[%s1465_s2] ss:$0 sm:$0xff]  ;;  %v1156_v47 = vld [vmem:[%s1468_s5 + $0x28] ss:$0 sps:$4 sm:$0x33]  }
  0x38   :  { %1015 = vmatprep.subr.bf16.mxu0 %v1137_v2  ;;  %1056 = vmatprep.subr.bf16.mxu1 %v1182_v40  ;;  %v1155_v46 = vld [vmem:[%s1468_s5 + $0x20] sm:$0xff]   ;;  %v831_v48 = vsel %vm829_vm4, %v1156_v47, 0  ;;  %s1184_s5 = smov [#allocation2]  }
  0x39   :  { %v941_v49 = vld [vmem:[%s1467_s4] ss:$0 sm:$0xff]  ;;  %s881_s15 = sshll.u32 %s1184_s5, 4  ;;  %s882_s15 = int_to_ptr.vmem [resolvable:$true] %s881_s15 }
  0x3a   :  { %s1157_s4 = scalar_lea.vmem %s882_s15, 32  ;;  %p1162_p1 = scmp.lt.s32.totalorder %s882_s15, %s882_s15 }
  0x3b   :  { %1016 = vmatpush3.bf16.msra.mxu0 %v1138_v3  ;;  %1057 = vmatpush3.bf16.msra.mxu1 %v1145_v8  ;;  %p1158_p0 = scmp.ne.s32.totalorder %s882_s15, %s1157_s4  ;;  %p1163_p2 = scmp.lt.s32.totalorder %s1157_s4, %s1157_s4 }
  0x3c   :  { %1017 = vmatprep.subr.bf16.mxu0 %v1140_v4  ;;  %1058 = vmatprep.subr.bf16.mxu1 %v1182_v40 }
  0x3d   :  { %p1164_p3 = por %p1163_p2, %p1162_p1 }
  0x3f   :  { %1018 = vmatpush3.bf16.msra.mxu0 %v1141_v5  ;;  %1059 = vmatpush3.bf16.msra.mxu1 %v1146_v9  ;;  %p1165_p4 = pnand %p1164_p3, %p1158_p0 }
  0x40   :  { %1072 = vmatprep.subr.bf16.mxu0 %v1182_v40  ;;  %1060 = vmatprep.subr.bf16.mxu1 %v1182_v40 }
  0x42   :  { %608 = vmatmul.mubr.bf16.vlgmr.msra.gmra.mrb[4].mxu0 %v167_v57 }
  0x43   :  { %1084 = vmatprep.mubr.msk.bf16.mxu0 %vm1183_vm0, %v1182_v40  ;;  %1061 = vmatpush3.bf16.msra.mxu1 %v1147_v10 }
  0x44   :  { %1062 = vmatprep.subr.bf16.mxu1 %v1182_v40  ;;  %1073 = vmatpush3.bf16.msra.mxu0 %v1151_v15 }
  0x45   :  { %1074 = vmatprep.subr.bf16.mxu0 %v1182_v40 }
  0x47   :  { %1063 = vmatpush3.bf16.msra.mxu1 %v1148_v11 }
  0x48   :  { %1064 = vmatprep.subr.bf16.mxu1 %v1182_v40  ;;  %1075 = vmatpush3.bf16.msra.mxu0 %v1152_v16 }
  0x49   :  { %1076 = vmatprep.subr.bf16.mxu0 %v1182_v40 }
  0x4b   :  { %1065 = vmatpush3.bf16.msra.mxu1 %v1149_v12 }
  0x4c   :  { %1066 = vmatprep.subr.bf16.mxu1 %v1182_v40  ;;  %1077 = vmatpush3.bf16.msra.mxu0 %v1153_v17 }
  0x4d   :  { %1078 = vmatprep.subr.bf16.mxu0 %v1182_v40 }
  0x4f   :  { %1067 = vmatpush3.bf16.msra.mxu1 %v730_v14 }
  0x50   :  { %1079 = vmatpush3.bf16.msra.mxu0 %v1154_v18 }
  0x51   :  { %1080 = vmatprep.subr.bf16.mxu0 %v1182_v40 }
  0x54   :  { %1081 = vmatpush3.bf16.msra.mxu0 %v1155_v46 }
  0x55   :  { %1082 = vmatprep.subr.bf16.mxu0 %v1182_v40  ;;  %v951_v40 = vld [vmem:[%s1469_s6] ss:$0 sm:$0xff] }
  0x58   :  { %1083 = vmatpush3.bf16.msra.mxu0 %v831_v48 }
  0xf5   :  { %v975_v19 = vpop.f32.mrb[0].mxu0 }
  0xf6   :  { %v976_v21 = vpop.f32.mrb[1].mxu0 }
  0xf7   :  { %v977_v22 = vadd.f32 %v976_v21, %v975_v19  ;;  %v978_v23 = vpop.f32.mrb[2].mxu0  ;;  %v997_v24 = vpop.f32.mrb[0].mxu1 }
  0xf8   :  { %v979_v25 = vpop.f32.mrb[3].mxu0  ;;  %v998_v26 = vpop.f32.mrb[1].mxu1 }
  0xf9   :  { %v530_v27 = vadd.f32 %v977_v22, %v889_v20  ;;  %v999_v28 = vadd.f32 %v998_v26, %v997_v24  ;;  %v1000_v29 = vpop.f32.mrb[2].mxu1 }
  0xfa   :  { %v1001_v30 = vpop.f32.mrb[3].mxu1 }
  0xfb   :  { %v570_v31 = vadd.f32 %v999_v28, %v530_v27 }
  0xff   :  { %v649_v32 = vpop.f32.mrb[4].mxu1 }
 0x100   :  { %v1050_v33 = vpop.f32.mrb[5].mxu1 }
 0x101   :  { %v652_v34 = vpop.f32.mrb[6].mxu1 }
 0x102   :  { %v1051_v35 = vpop.f32.mrb[7].mxu1 }
 0x115   :  { %v1019_v36 = vpop.f32.mrb[4].mxu0 }
 0x116   :  { %v1020_v37 = vpop.f32.mrb[5].mxu0 }
 0x117   :  { %v1021_v38 = vadd.f32 %v1020_v37, %v1019_v36  ;;  %v1022_v39 = vpop.f32.mrb[6].mxu0 }
 0x118   :  { %v1023_v41 = vpop.f32.mrb[7].mxu0 }
 0x119   :  { %v610_v42 = vadd.f32 %v1021_v38, %v570_v31 }
 0x11b   :  { %v650_v43 = vadd.f32 %v649_v32, %v610_v42 }
 0x11d   :  { %v655_v44 = vmax.f32 %v650_v43, 0.0 }
 0x11f   :  { %v656_v45 = vpack.c.bf16 %v655_v44, %v655_v44 }
 0x121   :  { %1069 = vmatmul.mubr.msk.bf16.vlgmr.msra.gmra.mrb[8].mxu1 %vm724_vm3, %v656_v45 }
 0x1f4   :  { %v766_v50 = vpop.f32.mrb[8].mxu1 }
 0x1f5   :  { %v767_v51 = vadd.f32 %v941_v49, %v766_v50  ;;  %v1070_v52 = vpop.f32.mrb[9].mxu1 }
 0x1f6   :  { %v769_v53 = vpop.f32.mrb[10].mxu1 }
 0x1f7   :  { %v772_v54 = vmax.f32 %v767_v51, 0.0  ;;  %v1071_v55 = vpop.f32.mrb[11].mxu1 }
 0x1f9   :  { %v773_v56 = vpack.c.bf16 %v772_v54, %v772_v54 }
 0x1fb   :  { %1085 = vmatmul.mubr.msk.bf16.vlgmr.msra.gmra.mrb[8].mxu0 %vm825_vm5, %v773_v56 }
 0x2ce   :  { %v867_v57 = vpop.f32.mrb[8].mxu0 }
 0x2cf   :  { %v868_v58 = vadd.f32 %v951_v40, %v867_v57  ;;  %v1086_v59 = vpop.f32.mrb[9].mxu0 }
 0x2d0   :  { %v870_v60 = vpop.f32.mrb[10].mxu0 }
 0x2d1   :  { %v1087_v61 = vpop.f32.mrb[11].mxu0  ;;  %874 = vst.msk [vmem:[#allocation2] sm:$0x3] %vm873_vm6, %v868_v58 }
 0x2d2   :  { %1168 = shalt.err (!%p1165_p4)
}
 0x2d3   :  { %s1169_s6 = scalar_lea.hbm %s1470_s7, 32 }
 0x2d4   :  { %p1170_p5 = scmp.ne.s32.totalorder %s1470_s7, %s1169_s6  ;;  %p1173_p6 = scmp.lt.u32.totalorder %s1169_s6, %s1470_s7 }
 0x2d6   :  { %p1175_p7 = pnand %p1173_p6, %p1170_p5 }
 0x2d8   :  { %1178 = shalt.err (!%p1175_p7)
}
 0x2d9   :  { %884 = dma.vmem_to_hbm [thread:$0]  %s882_s15, 32, %s1470_s7, [#allocation3]  }
 0x2da   :  { %1179 = dma.done.wait [#allocation3], 32  }
 0x2db   :  { %1180 = vsyncadd [#allocation3], 4294967264 }
 0x2dc   :  { %888 = vsyncpa [#allocation3], 1 }

// kernel: net_forward.3
= control target key start
LH: loop header
LB: loop body
LE: loop exit
PB: predicated region body
PF: predicated region fallthrough
CT: control target
= control target key end

     0   :  { %v3312_v1 = vmov 0   ;;  %vm1661_vm0 = vcmask 523264   ;;  %s3314_s28 = smov 64   ;;  %vm2328_vm1 = vcmask 261120   ;;  %vm2517_vm2 = vcmask 1043456   ;;  %s4346_s1 = inlined_call_operand.vmem [shape: bf16[576,896], index: 1, kind: input, shape index: {}]   ;;  %s4347_s0 = inlined_call_operand.vmem [shape: bf16[28,576], index: 0, kind: input, shape index: {}]   ;;  %s4348_s2 = inlined_call_operand.vmem [shape: f32[1,224], index: 2, kind: input, shape index: {}]   ;;  %s4349_s3 = inlined_call_operand.vmem [shape: bf16[28,224], index: 3, kind: output, shape index: {}]  }
   0x1   :  { %v2934_v0 = vld [vmem:[%s4346_s1 + $0x4] ss:$28 sps:$4 sm:$0xff]   ;;  %1806 = vmatprep.mubr.bf16.mxu1 %v3312_v1  ;;  %v2940_v5 = vld [vmem:[%s4346_s1 + $0x3c] ss:$28 sps:$4 sm:$0xff]   ;;  %v2946_v9 = vld [vmem:[%s4346_s1 + $0x74] ss:$28 sps:$4 sm:$0xff]  }
   0x2   :  { %v2936_v2 = vld [vmem:[%s4346_s1 + $0x704] ss:$28 sps:$4 sm:$0xff]   ;;  %1668 = vmatprep.subr.bf16.mxu0 %v2934_v0  ;;  %v2942_v6 = vld [vmem:[%s4346_s1 + $0x73c] ss:$28 sps:$4 sm:$0xff]   ;;  %v2948_v10 = vld [vmem:[%s4346_s1 + $0x774] ss:$28 sps:$4 sm:$0xff]  }
   0x3   :  { %v2938_v3 = vld [vmem:[%s4346_s1] ss:$28 sps:$4 sm:$0xff]   ;;  %1774 = vmatprep.subr.bf16.mxu1 %v2936_v2  ;;  %v2944_v7 = vld [vmem:[%s4346_s1 + $0x38] ss:$28 sps:$4 sm:$0xff]   ;;  %v2950_v11 = vld [vmem:[%s4346_s1 + $0x70] ss:$28 sps:$4 sm:$0xff]  }
   0x4   :  { %v2939_v4 = vld [vmem:[%s4346_s1 + $0x700] ss:$28 sps:$4 sm:$0xff]   ;;  %1669 = vmatpush1.bf16.msra.mxu0 %v2938_v3  ;;  %v2945_v8 = vld [vmem:[%s4346_s1 + $0x738] ss:$28 sps:$4 sm:$0xff]   ;;  %v2951_v12 = vld [vmem:[%s4346_s1 + $0x770] ss:$28 sps:$4 sm:$0xff]  }
   0x5   :  { %1775 = vmatpush1.bf16.msra.mxu1 %v2939_v4  ;;  %1670 = vmatprep.subr.bf16.mxu0 %v2940_v5  ;;  %v2952_v13 = vld [vmem:[%s4346_s1 + $0xac] ss:$28 sps:$4 sm:$0xff]   ;;  %v2958_v17 = vld [vmem:[%s4346_s1 + $0xe4] ss:$28 sps:$4 sm:$0xff]   ;;  %v2965_v22 = vld [vmem:[%s4346_s1 + $0x11c] ss:$28 sps:$4 sm:$0xff]  }
   0x6   :  { %1776 = vmatprep.subr.bf16.mxu1 %v2942_v6  ;;  %v2954_v14 = vld [vmem:[%s4346_s1 + $0x7ac] ss:$28 sps:$4 sm:$0xff]   ;;  %v2964_v19 = vld [vmem:[%s4347_s0 + $0x10] ss:$20 sps:$4 sm:$0xff]   ;;  %v2963_v21 = vld [vmem:[%s4346_s1 + $0xe0] ss:$28 sps:$4 sm:$0xff]  }
   0x7   :  { %v2956_v15 = vld [vmem:[%s4346_s1 + $0xa8] ss:$28 sps:$4 sm:$0xff]   ;;  %v2967_v24 = vld [vmem:[%s4346_s1 + $0x40] ss:$28 sps:$4 sm:$0xff]   ;;  %v2970_v25 = vld [vmem:[%s4346_s1 + $0x118] ss:$28 sps:$4 sm:$0xff]  }
   0x8   :  { %1671 = vmatpush1.bf16.msra.mxu0 %v2944_v7  ;;  %v2957_v16 = vld [vmem:[%s4346_s1 + $0x7a8] ss:$28 sps:$4 sm:$0xff]   ;;  %v2971_v26 = vld [vmem:[%s4346_s1 + $0x154] ss:$28 sps:$4 sm:$0xff]   ;;  %v2975_v27 = vld [vmem:[%s4346_s1 + $0x7c] ss:$28 sps:$4 sm:$0xff]  }
   0x9   :  { %1777 = vmatpush1.bf16.msra.mxu1 %v2945_v8  ;;  %1672 = vmatprep.subr.bf16.mxu0 %v2946_v9  ;;  %v2962_v18 = vld [vmem:[%s4346_s1 + $0xc] ss:$28 sps:$4 sm:$0xff]   ;;  %v2969_v23 = vld [vmem:[%s4346_s1 + $0x44] ss:$28 sps:$4 sm:$0xff]   ;;  %v2973_v28 = vld [vmem:[%s4346_s1 + $0x78] ss:$28 sps:$4 sm:$0xff]  }
   0xa   :  { %1778 = vmatprep.subr.bf16.mxu1 %v2948_v10  ;;  %v2960_v20 = vld [vmem:[%s4346_s1 + $0x8] ss:$28 sps:$4 sm:$0xff]   ;;  %v2976_v29 = vld [vmem:[%s4346_s1 + $0x150] ss:$28 sps:$4 sm:$0xff]   ;;  %v2988_v37 = vld [vmem:[%s4346_s1 + $0x1c0] ss:$28 sps:$4 sm:$0xff]  }
   0xb   :  { %v2977_v30 = vld [vmem:[%s4346_s1 + $0x18c] ss:$28 sps:$4 sm:$0xff]   ;;  %v2981_v31 = vld [vmem:[%s4346_s1 + $0xb4] ss:$28 sps:$4 sm:$0xff]   ;;  %v2983_v34 = vld [vmem:[%s4346_s1 + $0x1c4] ss:$28 sps:$4 sm:$0xff]  }
   0xc   :  { %1673 = vmatpush1.bf16.msra.mxu0 %v2950_v11  ;;  %v2979_v32 = vld [vmem:[%s4346_s1 + $0xb0] ss:$28 sps:$4 sm:$0xff]   ;;  %v2982_v33 = vld [vmem:[%s4346_s1 + $0x188] ss:$28 sps:$4 sm:$0xff]   ;;  %v2989_v38 = vld [vmem:[%s4346_s1 + $0x1fc] ss:$28 sps:$4 sm:$0xff]  }
   0xd   :  { %1779 = vmatpush1.bf16.msra.mxu1 %v2951_v12  ;;  %1674 = vmatprep.subr.bf16.mxu0 %v2952_v13  ;;  %v2987_v35 = vld [vmem:[%s4346_s1 + $0xec] ss:$28 sps:$4 sm:$0xff]   ;;  %v2993_v39 = vld [vmem:[%s4346_s1 + $0x124] ss:$28 sps:$4 sm:$0xff]   ;;  %v2994_v41 = vld [vmem:[%s4346_s1 + $0x1f8] ss:$28 sps:$4 sm:$0xff]  }
   0xe   :  { %1780 = vmatprep.subr.bf16.mxu1 %v2954_v14  ;;  %v2985_v36 = vld [vmem:[%s4346_s1 + $0xe8] ss:$28 sps:$4 sm:$0xff]   ;;  %v2991_v40 = vld [vmem:[%s4346_s1 + $0x120] ss:$28 sps:$4 sm:$0xff]   ;;  %v2995_v42 = vld [vmem:[%s4346_s1 + $0x234] ss:$28 sps:$4 sm:$0xff]  }
   0xf   :  { %v2999_v43 = vld [vmem:[%s4346_s1 + $0x15c] ss:$28 sps:$4 sm:$0xff]   ;;  %v3000_v45 = vld [vmem:[%s4346_s1 + $0x230] ss:$28 sps:$4 sm:$0xff]   ;;  %v3006_v49 = vld [vmem:[%s4346_s1 + $0x268] ss:$28 sps:$4 sm:$0xff]  }
  0x10   :  { %1675 = vmatpush1.bf16.msra.mxu0 %v2956_v15  ;;  %v2997_v44 = vld [vmem:[%s4346_s1 + $0x158] ss:$28 sps:$4 sm:$0xff]   ;;  %v3001_v46 = vld [vmem:[%s4346_s1 + $0x26c] ss:$28 sps:$4 sm:$0xff]   ;;  %v3007_v51 = vld [vmem:[%s4346_s1 + $0x2a4] ss:$28 sps:$4 sm:$0xff]  }
  0x11   :  { %1781 = vmatpush1.bf16.msra.mxu1 %v2957_v16  ;;  %1676 = vmatprep.subr.bf16.mxu0 %v2958_v17  ;;  %v3005_v47 = vld [vmem:[%s4346_s1 + $0x194] ss:$28 sps:$4 sm:$0xff]   ;;  %v3488_v50 = vld [vmem:[%s4347_s0 + $0x4] ss:$20 sps:$4 sm:$0xff]   ;;  %v3011_v52 = vld [vmem:[%s4346_s1 + $0x1cc] ss:$28 sps:$4 sm:$0xff]  }
  0x12   :  { %1827 = vmatprep.subr.bf16.mxu1 %v2962_v18  ;;  %v3003_v48 = vld [vmem:[%s4346_s1 + $0x190] ss:$28 sps:$4 sm:$0xff]   ;;  %1700 = vmatprep.mubr.bf16.mxu0 %v3488_v50  ;;  %v3009_v53 = vld [vmem:[%s4346_s1 + $0x1c8] ss:$28 sps:$4 sm:$0xff]   ;;  %v3012_v54 = vld [vmem:[%s4346_s1 + $0x2a0] ss:$28 sps:$4 sm:$0xff]  }
  0x13   :  { %v3013_v55 = vld [vmem:[%s4346_s1 + $0x2dc] ss:$28 sps:$4 sm:$0xff]   ;;  %v3017_v56 = vld [vmem:[%s4346_s1 + $0x204] ss:$28 sps:$4 sm:$0xff]   ;;  %v3019_v59 = vld [vmem:[%s4346_s1 + $0x314] ss:$28 sps:$4 sm:$0xff]  }
  0x14   :  { %2793 = vmatmul.mubr.msk.bf16.vlgmr.msra.gmra.mrb[0].mxu1 %vm1661_vm0, %v2964_v19  ;;  %1677 = vmatpush1.bf16.msra.mxu0 %v2963_v21  ;;  %v3015_v57 = vld [vmem:[%s4346_s1 + $0x200] ss:$28 sps:$4 sm:$0xff]   ;;  %v3018_v58 = vld [vmem:[%s4346_s1 + $0x2d8] ss:$28 sps:$4 sm:$0xff]   ;;  %v3024_v63 = vld [vmem:[%s4346_s1 + $0x310] ss:$28 sps:$4 sm:$0xff]  }
  0x15   :  { %1828 = vmatpush1.bf16.msra.mxu1 %v2960_v20  ;;  %1678 = vmatprep.subr.bf16.mxu0 %v2965_v22  ;;  %v3023_v60 = vld [vmem:[%s4346_s1 + $0x23c] ss:$28 sps:$4 sm:$0xff]   ;;  %v3025_v0 = vld [vmem:[%s4346_s1 + $0x34c] ss:$28 sps:$4 sm:$0xff]   ;;  %v3029_v2 = vld [vmem:[%s4346_s1 + $0x274] ss:$28 sps:$4 sm:$0xff]  }
  0x16   :  { %1829 = vmatprep.subr.bf16.mxu1 %v2969_v23  ;;  %1816 = vmatprep.mubr.bf16.mxu1 %v3312_v1  ;;  %v3524_v61 = vld [vmem:[%s4347_s0 + $0x38] ss:$20 sps:$4 sm:$0x3f]   ;;  %v3030_v4 = vld [vmem:[%s4346_s1 + $0x348] ss:$28 sps:$4 sm:$0xff]   ;;  %vm2518_vm3 = vcmask 785412  }
  0x17   :  { %v3021_v62 = vld [vmem:[%s4346_s1 + $0x238] ss:$28 sps:$4 sm:$0xff]   ;;  %v3027_v3 = vld [vmem:[%s4346_s1 + $0x270] ss:$28 sps:$4 sm:$0xff]   ;;  %v3035_v5 = vld [vmem:[%s4346_s1 + $0x384] ss:$28 sps:$4 sm:$0xff]  }
  0x18   :  { %1679 = vmatpush1.bf16.msra.mxu0 %v2970_v25  ;;  %v3038_v6 = vld [vmem:[%s4346_s1 + $0x2ac] ss:$28 sps:$4 sm:$0xff]   ;;  %v3556_v7 = vld [vmem:[%s4347_s0] ss:$20 sps:$4 sm:$0xff]   ;;  %v3042_v10 = vld [vmem:[%s4346_s1 + $0x3bc] ss:$28 sps:$4 sm:$0xff]  }
  0x19   :  { %1830 = vmatpush1.bf16.msra.mxu1 %v2967_v24  ;;  %1680 = vmatprep.subr.bf16.mxu0 %v2971_v26  ;;  %v3033_v8 = vld [vmem:[%s4346_s1 + $0x380] ss:$28 sps:$4 sm:$0xff]   ;;  %v3036_v9 = vld [vmem:[%s4346_s1 + $0x2a8] ss:$28 sps:$4 sm:$0xff]   ;;  %v3040_v12 = vld [vmem:[%s4346_s1 + $0x3b8] ss:$28 sps:$4 sm:$0xff]  }
  0x1a   :  { %1831 = vmatprep.subr.bf16.mxu1 %v2975_v27  ;;  %v3045_v11 = vld [vmem:[%s4346_s1 + $0x2e4] ss:$28 sps:$4 sm:$0xff]   ;;  %v3048_v14 = vld [vmem:[%s4346_s1 + $0x3f4] ss:$28 sps:$4 sm:$0xff]   ;;  %v3051_v15 = vld [vmem:[%s4346_s1 + $0x31c] ss:$28 sps:$4 sm:$0xff]  }
  0x1b   :  { %v3043_v13 = vld [vmem:[%s4346_s1 + $0x2e0] ss:$28 sps:$4 sm:$0xff]   ;;  %v3046_v16 = vld [vmem:[%s4346_s1 + $0x3f0] ss:$28 sps:$4 sm:$0xff]   ;;  %v3049_v17 = vld [vmem:[%s4346_s1 + $0x318] ss:$28 sps:$4 sm:$0xff]  }
  0x1c   :  { %1681 = vmatpush1.bf16.msra.mxu0 %v2976_v29  ;;  %2794 = vmatmul.mubr.msk.bf16.gmra.mrb[4].mxu1 %vm1661_vm0, %v3524_v61  ;;  %v3055_v18 = vld [vmem:[%s4346_s1 + $0x42c] ss:$28 sps:$4 sm:$0xff]   ;;  %v3058_v19 = vld [vmem:[%s4346_s1 + $0x354] ss:$28 sps:$4 sm:$0xff]   ;;  %v3061_v22 = vld [vmem:[%s4346_s1 + $0x464] ss:$28 sps:$4 sm:$0xff]  }
  0x1d   :  { %1832 = vmatpush1.bf16.msra.mxu1 %v2973_v28  ;;  %1682 = vmatprep.subr.bf16.mxu0 %v2977_v30  ;;  %v3053_v20 = vld [vmem:[%s4346_s1 + $0x428] ss:$28 sps:$4 sm:$0xff]   ;;  %v3056_v21 = vld [vmem:[%s4346_s1 + $0x350] ss:$28 sps:$4 sm:$0xff]   ;;  %v3059_v24 = vld [vmem:[%s4346_s1 + $0x460] ss:$28 sps:$4 sm:$0xff]  }
  0x1e   :  { %1833 = vmatprep.subr.bf16.mxu1 %v2981_v31  ;;  %1859 = vmatprep.mubr.bf16.mxu1 %v3488_v50  ;;  %v3064_v23 = vld [vmem:[%s4346_s1 + $0x38c] ss:$28 sps:$4 sm:$0xff]   ;;  %v3067_v26 = vld [vmem:[%s4346_s1 + $0x49c] ss:$28 sps:$4 sm:$0xff]   ;;  %v3070_v27 = vld [vmem:[%s4346_s1 + $0x3c4] ss:$28 sps:$4 sm:$0xff]  }
  0x1f   :  { %v3062_v25 = vld [vmem:[%s4346_s1 + $0x388] ss:$28 sps:$4 sm:$0xff]   ;;  %v3065_v28 = vld [vmem:[%s4346_s1 + $0x498] ss:$28 sps:$4 sm:$0xff]   ;;  %v3068_v29 = vld [vmem:[%s4346_s1 + $0x3c0] ss:$28 sps:$4 sm:$0xff]  }
  0x20   :  { %1683 = vmatpush1.bf16.msra.mxu0 %v2982_v33  ;;  %v3073_v30 = vld [vmem:[%s4346_s1 + $0x4d4] ss:$28 sps:$4 sm:$0xff]   ;;  %v3632_v31 = vld [vmem:[%s4347_s0 + $0x2c] ss:$20 sps:$4 sm:$0x3f]   ;;  %vm4316_vm4 = vmor %vm2518_vm3, %vm2517_vm2  ;;  %vm2523_vm5 = vcmask 1041408  }
  0x21   :  { %1834 = vmatpush1.bf16.msra.mxu1 %v2979_v32  ;;  %1684 = vmatprep.subr.bf16.mxu0 %v2983_v34  ;;  %v3637_v32 = vld [vmem:[%s4347_s0 + $0x28] ss:$20 sps:$4 sm:$0x3f]   ;;  %v3071_v34 = vld [vmem:[%s4346_s1 + $0x4d0] ss:$28 sps:$4 sm:$0xff]   ;;  %vm2524_vm6 = vcmask 783364  }
  0x22   :  { %1835 = vmatprep.subr.bf16.mxu1 %v2987_v35  ;;  %v3076_v33 = vld [vmem:[%s4346_s1 + $0x3fc] ss:$28 sps:$4 sm:$0xff]   ;;  %vm2525_vm7 = vmor %vm2524_vm6, %vm2523_vm5 }
  0x23   :  { %v3074_v35 = vld [vmem:[%s4346_s1 + $0x3f8] ss:$28 sps:$4 sm:$0xff]  }
  0x24   :  { %1685 = vmatpush1.bf16.msra.mxu0 %v2988_v37  ;;  %v3082_v37 = vld [vmem:[%s4346_s1 + $0x434] ss:$28 sps:$4 sm:$0xff]  }
  0x25   :  { %1836 = vmatpush1.bf16.msra.mxu1 %v2985_v36  ;;  %1686 = vmatprep.subr.bf16.mxu0 %v2989_v38  ;;  %v3079_v36 = vld [vmem:[%s4346_s1 + $0x50c] ss:$28 sps:$4 sm:$0xff]  }
  0x26   :  { %1837 = vmatprep.subr.bf16.mxu1 %v2993_v39  ;;  %v3077_v38 = vld [vmem:[%s4346_s1 + $0x508] ss:$28 sps:$4 sm:$0xff]   ;;  %v3663_v39 = vld [vmem:[%s4347_s0 + $0xc] ss:$20 sps:$4 sm:$0xff]  }
  0x28   :  { %1687 = vmatpush1.bf16.msra.mxu0 %v2994_v41  ;;  %v3085_v41 = vld [vmem:[%s4346_s1 + $0x544] ss:$28 sps:$4 sm:$0xff]  }
  0x29   :  { %1838 = vmatpush1.bf16.msra.mxu1 %v2991_v40  ;;  %1688 = vmatprep.subr.bf16.mxu0 %v2995_v42  ;;  %v3080_v40 = vld [vmem:[%s4346_s1 + $0x430] ss:$28 sps:$4 sm:$0xff]  }
  0x2a   :  { %1839 = vmatprep.subr.bf16.mxu1 %v2999_v43  ;;  %v3088_v42 = vld [vmem:[%s4346_s1 + $0x46c] ss:$28 sps:$4 sm:$0xff]   ;;  %v3083_v43 = vld [vmem:[%s4346_s1 + $0x540] ss:$28 sps:$4 sm:$0xff]  }
  0x2c   :  { %1689 = vmatpush1.bf16.msra.mxu0 %v3000_v45  ;;  %v3091_v45 = vld [vmem:[%s4346_s1 + $0x57c] ss:$28 sps:$4 sm:$0xff]  }
  0x2d   :  { %1840 = vmatpush1.bf16.msra.mxu1 %v2997_v44  ;;  %1690 = vmatprep.subr.bf16.mxu0 %v3001_v46  ;;  %v3086_v44 = vld [vmem:[%s4346_s1 + $0x468] ss:$28 sps:$4 sm:$0xff]  }
  0x2e   :  { %1841 = vmatprep.subr.bf16.mxu1 %v3005_v47  ;;  %v3094_v46 = vld [vmem:[%s4346_s1 + $0x4a4] ss:$28 sps:$4 sm:$0xff]   ;;  %v3089_v47 = vld [vmem:[%s4346_s1 + $0x578] ss:$28 sps:$4 sm:$0xff]  }
  0x30   :  { %1691 = vmatpush1.bf16.msra.mxu0 %v3006_v49  ;;  %v3097_v49 = vld [vmem:[%s4346_s1 + $0x5b4] ss:$28 sps:$4 sm:$0xff]  }
  0x31   :  { %1842 = vmatpush1.bf16.msra.mxu1 %v3003_v48  ;;  %1692 = vmatprep.subr.bf16.mxu0 %v3007_v51  ;;  %v3092_v48 = vld [vmem:[%s4346_s1 + $0x4a0] ss:$28 sps:$4 sm:$0xff]  }
  0x32   :  { %1843 = vmatprep.subr.bf16.mxu1 %v3011_v52  ;;  %v3100_v51 = vld [vmem:[%s4346_s1 + $0x4dc] ss:$28 sps:$4 sm:$0xff]   ;;  %v3095_v52 = vld [vmem:[%s4346_s1 + $0x5b0] ss:$28 sps:$4 sm:$0xff]  }
  0x34   :  { %1693 = vmatpush1.bf16.msra.mxu0 %v3012_v54  ;;  %v3103_v54 = vld [vmem:[%s4346_s1 + $0x5ec] ss:$28 sps:$4 sm:$0xff]  }
  0x35   :  { %1844 = vmatpush1.bf16.msra.mxu1 %v3009_v53  ;;  %1694 = vmatprep.subr.bf16.mxu0 %v3013_v55  ;;  %v3098_v53 = vld [vmem:[%s4346_s1 + $0x4d8] ss:$28 sps:$4 sm:$0xff]  }
  0x36   :  { %1845 = vmatprep.subr.bf16.mxu1 %v3017_v56  ;;  %v3106_v55 = vld [vmem:[%s4346_s1 + $0x514] ss:$28 sps:$4 sm:$0xff]   ;;  %v3101_v56 = vld [vmem:[%s4346_s1 + $0x5e8] ss:$28 sps:$4 sm:$0xff]  }
  0x38   :  { %1695 = vmatpush1.bf16.msra.mxu0 %v3018_v58  ;;  %v3109_v58 = vld [vmem:[%s4346_s1 + $0x624] ss:$28 sps:$4 sm:$0xff]  }
  0x39   :  { %1846 = vmatpush1.bf16.msra.mxu1 %v3015_v57  ;;  %1696 = vmatprep.subr.bf16.mxu0 %v3019_v59  ;;  %v3104_v57 = vld [vmem:[%s4346_s1 + $0x510] ss:$28 sps:$4 sm:$0xff]  }
  0x3a   :  { %1847 = vmatprep.subr.bf16.mxu1 %v3023_v60  ;;  %v3112_v59 = vld [vmem:[%s4346_s1 + $0x54c] ss:$28 sps:$4 sm:$0xff]   ;;  %v3107_v60 = vld [vmem:[%s4346_s1 + $0x620] ss:$28 sps:$4 sm:$0xff]  }
  0x3c   :  { %1697 = vmatpush1.bf16.msra.mxu0 %v3024_v63  ;;  %v3115_v63 = vld [vmem:[%s4346_s1 + $0x65c] ss:$28 sps:$4 sm:$0xff]  }
  0x3d   :  { %1848 = vmatpush1.bf16.msra.mxu1 %v3021_v62  ;;  %1698 = vmatprep.subr.bf16.mxu0 %v3025_v0  ;;  %v3110_v62 = vld [vmem:[%s4346_s1 + $0x548] ss:$28 sps:$4 sm:$0xff]  }
  0x3e   :  { %1849 = vmatprep.subr.bf16.mxu1 %v3029_v2  ;;  %v3118_v0 = vld [vmem:[%s4346_s1 + $0x584] ss:$28 sps:$4 sm:$0xff]   ;;  %v3113_v2 = vld [vmem:[%s4346_s1 + $0x658] ss:$28 sps:$4 sm:$0xff]  }
  0x40   :  { %1699 = vmatpush1.bf16.msra.mxu0 %v3030_v4  ;;  %v3124_v4 = vld [vmem:[%s4346_s1 + $0x694] ss:$28 sps:$4 sm:$0xff]  }
  0x41   :  { %1850 = vmatpush1.bf16.msra.mxu1 %v3027_v3  ;;  %1721 = vmatprep.subr.bf16.mxu0 %v3035_v5  ;;  %v3116_v3 = vld [vmem:[%s4346_s1 + $0x580] ss:$28 sps:$4 sm:$0xff]  }
  0x42   :  { %1851 = vmatprep.subr.bf16.mxu1 %v3038_v6  ;;  %v3127_v5 = vld [vmem:[%s4346_s1 + $0x5bc] ss:$28 sps:$4 sm:$0xff]   ;;  %v3122_v6 = vld [vmem:[%s4346_s1 + $0x690] ss:$28 sps:$4 sm:$0xff]  }
  0x43   :  { %1701 = vmatmul.mubr.bf16.vlgmr.msra.gmra.mrb[0].mxu0 %v3556_v7 }
  0x44   :  { %1722 = vmatpush1.bf16.msra.mxu0 %v3033_v8  ;;  %1710 = vmatprep.mubr.bf16.mxu0 %v3632_v31  ;;  %v3125_v8 = vld [vmem:[%s4346_s1 + $0x5b8] ss:$28 sps:$4 sm:$0xff]  }
  0x45   :  { %1852 = vmatpush1.bf16.msra.mxu1 %v3036_v9  ;;  %1723 = vmatprep.subr.bf16.mxu0 %v3042_v10  ;;  %v3130_v9 = vld [vmem:[%s4346_s1 + $0x6cc] ss:$28 sps:$4 sm:$0xff]   ;;  %v3133_v10 = vld [vmem:[%s4346_s1 + $0x5f4] ss:$28 sps:$4 sm:$0xff]  }
  0x46   :  { %1853 = vmatprep.subr.bf16.mxu1 %v3045_v11  ;;  %v3128_v11 = vld [vmem:[%s4346_s1 + $0x6c8] ss:$28 sps:$4 sm:$0xff]  }
  0x48   :  { %1724 = vmatpush1.bf16.msra.mxu0 %v3040_v12  ;;  %v3131_v12 = vld [vmem:[%s4346_s1 + $0x5f0] ss:$28 sps:$4 sm:$0xff]  }
  0x49   :  { %1854 = vmatpush1.bf16.msra.mxu1 %v3043_v13  ;;  %1725 = vmatprep.subr.bf16.mxu0 %v3048_v14  ;;  %v3139_v13 = vld [vmem:[%s4346_s1 + $0x62c] ss:$28 sps:$4 sm:$0xff]  }
  0x4a   :  { %1855 = vmatprep.subr.bf16.mxu1 %v3051_v15  ;;  %v3773_v14 = vld [vmem:[%s4347_s0 + $0x8] ss:$20 sps:$4 sm:$0xff]   ;;  %v3142_v15 = vld [vmem:[%s4346_s1 + $0x14] ss:$28 sps:$4 sm:$0xff]  }
  0x4b   :  { %1711 = vmatmul.mubr.bf16.gmra.mrb[4].mxu0 %v3637_v32 }
  0x4c   :  { %1726 = vmatpush1.bf16.msra.mxu0 %v3046_v16  ;;  %1753 = vmatprep.mubr.bf16.mxu0 %v3663_v39  ;;  %v3137_v16 = vld [vmem:[%s4346_s1 + $0x628] ss:$28 sps:$4 sm:$0xff]  }
  0x4d   :  { %1856 = vmatpush1.bf16.msra.mxu1 %v3049_v17  ;;  %1727 = vmatprep.subr.bf16.mxu0 %v3055_v18  ;;  %v3140_v17 = vld [vmem:[%s4346_s1 + $0x10] ss:$28 sps:$4 sm:$0xff]   ;;  %v3145_v18 = vld [vmem:[%s4346_s1 + $0x664] ss:$28 sps:$4 sm:$0xff]  }
  0x4e   :  { %1857 = vmatprep.subr.bf16.mxu1 %v3058_v19  ;;  %v3148_v19 = vld [vmem:[%s4346_s1 + $0x4c] ss:$28 sps:$4 sm:$0xff]  }
  0x50   :  { %1728 = vmatpush1.bf16.msra.mxu0 %v3053_v20  ;;  %v3793_v20 = vld [vmem:[%s4347_s0 + $0x34] ss:$20 sps:$4 sm:$0x3f]  }
  0x51   :  { %1858 = vmatpush1.bf16.msra.mxu1 %v3056_v21  ;;  %1729 = vmatprep.subr.bf16.mxu0 %v3061_v22  ;;  %v3143_v21 = vld [vmem:[%s4346_s1 + $0x660] ss:$28 sps:$4 sm:$0xff]   ;;  %v3146_v22 = vld [vmem:[%s4346_s1 + $0x48] ss:$28 sps:$4 sm:$0xff]  }
  0x52   :  { %1880 = vmatprep.subr.bf16.mxu1 %v3064_v23  ;;  %v3154_v23 = vld [vmem:[%s4346_s1 + $0x69c] ss:$28 sps:$4 sm:$0xff]  }
  0x54   :  { %1860 = vmatmul.mubr.bf16.vlgmr.msra.gmra.mrb[8].mxu1 %v3556_v7  ;;  %1730 = vmatpush1.bf16.msra.mxu0 %v3059_v24  ;;  %v3808_v24 = vld [vmem:[%s4347_s0 + $0x30] ss:$20 sps:$4 sm:$0x3f]  }
  0x55   :  { %1881 = vmatpush1.bf16.msra.mxu1 %v3062_v25  ;;  %1731 = vmatprep.subr.bf16.mxu0 %v3067_v26  ;;  %v3157_v25 = vld [vmem:[%s4346_s1 + $0x84] ss:$28 sps:$4 sm:$0xff]   ;;  %v3152_v26 = vld [vmem:[%s4346_s1 + $0x698] ss:$28 sps:$4 sm:$0xff]  }
  0x56   :  { %1882 = vmatprep.subr.bf16.mxu1 %v3070_v27  ;;  %1869 = vmatprep.mubr.bf16.mxu1 %v3632_v31  ;;  %v3155_v27 = vld [vmem:[%s4346_s1 + $0x80] ss:$28 sps:$4 sm:$0xff]  }
  0x58   :  { %1732 = vmatpush1.bf16.msra.mxu0 %v3065_v28  ;;  %v3160_v28 = vld [vmem:[%s4346_s1 + $0x6d4] ss:$28 sps:$4 sm:$0xff]  }
  0x59   :  { %1883 = vmatpush1.bf16.msra.mxu1 %v3068_v29  ;;  %1733 = vmatprep.subr.bf16.mxu0 %v3073_v30  ;;  %v3163_v29 = vld [vmem:[%s4346_s1 + $0xbc] ss:$28 sps:$4 sm:$0xff]   ;;  %v3158_v30 = vld [vmem:[%s4346_s1 + $0x6d0] ss:$28 sps:$4 sm:$0xff]  }
  0x5a   :  { %1884 = vmatprep.subr.bf16.mxu1 %v3076_v33  ;;  %v3161_v33 = vld [vmem:[%s4346_s1 + $0xb8] ss:$28 sps:$4 sm:$0xff]  }
  0x5c   :  { %1870 = vmatmul.mubr.bf16.gmra.mrb[12].mxu1 %v3637_v32  ;;  %1734 = vmatpush1.bf16.msra.mxu0 %v3071_v34  ;;  %v3166_v34 = vld [vmem:[%s4346_s1 + $0x70c] ss:$28 sps:$4 sm:$0xff]  }
  0x5d   :  { %1885 = vmatpush1.bf16.msra.mxu1 %v3074_v35  ;;  %1735 = vmatprep.subr.bf16.mxu0 %v3079_v36  ;;  %v3169_v35 = vld [vmem:[%s4346_s1 + $0xf4] ss:$28 sps:$4 sm:$0xff]   ;;  %v3164_v36 = vld [vmem:[%s4346_s1 + $0x708] ss:$28 sps:$4 sm:$0xff]  }
  0x5e   :  { %1886 = vmatprep.subr.bf16.mxu1 %v3082_v37  ;;  %1912 = vmatprep.mubr.bf16.mxu1 %v3663_v39  ;;  %v3167_v37 = vld [vmem:[%s4346_s1 + $0xf0] ss:$28 sps:$4 sm:$0xff]  }
  0x60   :  { %1736 = vmatpush1.bf16.msra.mxu0 %v3077_v38  ;;  %v3172_v38 = vld [vmem:[%s4346_s1 + $0x744] ss:$28 sps:$4 sm:$0xff]  }
  0x61   :  { %1887 = vmatpush1.bf16.msra.mxu1 %v3080_v40  ;;  %1737 = vmatprep.subr.bf16.mxu0 %v3085_v41  ;;  %v3175_v40 = vld [vmem:[%s4346_s1 + $0x12c] ss:$28 sps:$4 sm:$0xff]  }
  0x62   :  { %1888 = vmatprep.subr.bf16.mxu1 %v3088_v42  ;;  %v3173_v41 = vld [vmem:[%s4346_s1 + $0x128] ss:$28 sps:$4 sm:$0xff]   ;;  %v3178_v42 = vld [vmem:[%s4346_s1 + $0x77c] ss:$28 sps:$4 sm:$0xff]  }
  0x64   :  { %1738 = vmatpush1.bf16.msra.mxu0 %v3083_v43  ;;  %v3181_v43 = vld [vmem:[%s4346_s1 + $0x164] ss:$28 sps:$4 sm:$0xff]  }
  0x65   :  { %1889 = vmatpush1.bf16.msra.mxu1 %v3086_v44  ;;  %1739 = vmatprep.subr.bf16.mxu0 %v3091_v45  ;;  %v3176_v44 = vld [vmem:[%s4346_s1 + $0x778] ss:$28 sps:$4 sm:$0xff]   ;;  %v3179_v45 = vld [vmem:[%s4346_s1 + $0x160] ss:$28 sps:$4 sm:$0xff]  }
  0x66   :  { %1890 = vmatprep.subr.bf16.mxu1 %v3094_v46  ;;  %v3184_v46 = vld [vmem:[%s4346_s1 + $0x7b4] ss:$28 sps:$4 sm:$0xff]  }
  0x68   :  { %1740 = vmatpush1.bf16.msra.mxu0 %v3089_v47  ;;  %v3187_v47 = vld [vmem:[%s4346_s1 + $0x19c] ss:$28 sps:$4 sm:$0xff]  }
  0x69   :  { %1891 = vmatpush1.bf16.msra.mxu1 %v3092_v48  ;;  %1741 = vmatprep.subr.bf16.mxu0 %v3097_v49  ;;  %v3182_v48 = vld [vmem:[%s4346_s1 + $0x7b0] ss:$28 sps:$4 sm:$0xff]   ;;  %v3185_v49 = vld [vmem:[%s4346_s1 + $0x198] ss:$28 sps:$4 sm:$0xff]  }
  0x6a   :  { %1892 = vmatprep.subr.bf16.mxu1 %v3100_v51  ;;  %v3190_v51 = vld [vmem:[%s4346_s1 + $0x1d4] ss:$28 sps:$4 sm:$0xff]  }
  0x6c   :  { %1742 = vmatpush1.bf16.msra.mxu0 %v3095_v52  ;;  %v3193_v52 = vld [vmem:[%s4346_s1 + $0x714] ss:$28 sps:$4 sm:$0xff]  }
  0x6d   :  { %1893 = vmatpush1.bf16.msra.mxu1 %v3098_v53  ;;  %1743 = vmatprep.subr.bf16.mxu0 %v3103_v54  ;;  %v3188_v53 = vld [vmem:[%s4346_s1 + $0x1d0] ss:$28 sps:$4 sm:$0xff]  }
  0x6e   :  { %1894 = vmatprep.subr.bf16.mxu1 %v3106_v55  ;;  %v3191_v54 = vld [vmem:[%s4346_s1 + $0x710] ss:$28 sps:$4 sm:$0xff]  }
  0x6f   :  { %v3196_v55 = vld [vmem:[%s4346_s1 + $0x20c] ss:$28 sps:$4 sm:$0xff]  }
  0x70   :  { %1744 = vmatpush1.bf16.msra.mxu0 %v3101_v56  ;;  %v3199_v56 = vld [vmem:[%s4346_s1 + $0x74c] ss:$28 sps:$4 sm:$0xff]  }
  0x71   :  { %1895 = vmatpush1.bf16.msra.mxu1 %v3104_v57  ;;  %1745 = vmatprep.subr.bf16.mxu0 %v3109_v58  ;;  %v3194_v57 = vld [vmem:[%s4346_s1 + $0x208] ss:$28 sps:$4 sm:$0xff]  }
  0x72   :  { %1896 = vmatprep.subr.bf16.mxu1 %v3112_v59  ;;  %v3910_v58 = vld [vmem:[%s4347_s0 + $0x10] ss:$20 sps:$4 sm:$0xff]  }
  0x73   :  { %v3197_v59 = vld [vmem:[%s4346_s1 + $0x748] ss:$28 sps:$4 sm:$0xff]  }
  0x74   :  { %1746 = vmatpush1.bf16.msra.mxu0 %v3107_v60  ;;  %v3202_v60 = vld [vmem:[%s4346_s1 + $0x244] ss:$28 sps:$4 sm:$0xff]  }
  0x75   :  { %1897 = vmatpush1.bf16.msra.mxu1 %v3110_v62  ;;  %1747 = vmatprep.subr.bf16.mxu0 %v3115_v63  ;;  %v3205_v62 = vld [vmem:[%s4346_s1 + $0x784] ss:$28 sps:$4 sm:$0xff]  }
  0x76   :  { %1898 = vmatprep.subr.bf16.mxu1 %v3118_v0  ;;  %v3200_v63 = vld [vmem:[%s4346_s1 + $0x240] ss:$28 sps:$4 sm:$0xff]  }
  0x77   :  { %v3203_v0 = vld [vmem:[%s4346_s1 + $0x780] ss:$28 sps:$4 sm:$0xff]  }
  0x78   :  { %1748 = vmatpush1.bf16.msra.mxu0 %v3113_v2  ;;  %v3208_v2 = vld [vmem:[%s4346_s1 + $0x27c] ss:$28 sps:$4 sm:$0xff]  }
  0x79   :  { %1899 = vmatpush1.bf16.msra.mxu1 %v3116_v3  ;;  %1749 = vmatprep.subr.bf16.mxu0 %v3124_v4  ;;  %v3211_v3 = vld [vmem:[%s4346_s1 + $0x7bc] ss:$28 sps:$4 sm:$0xff]  }
  0x7a   :  { %1900 = vmatprep.subr.bf16.mxu1 %v3127_v5  ;;  %v3206_v4 = vld [vmem:[%s4346_s1 + $0x278] ss:$28 sps:$4 sm:$0xff]  }
  0x7b   :  { %v3209_v5 = vld [vmem:[%s4346_s1 + $0x7b8] ss:$28 sps:$4 sm:$0xff]  }
  0x7c   :  { %1750 = vmatpush1.bf16.msra.mxu0 %v3122_v6  ;;  %v3214_v6 = vld [vmem:[%s4346_s1 + $0x2b4] ss:$28 sps:$4 sm:$0xff]  }
  0x7d   :  { %1901 = vmatpush1.bf16.msra.mxu1 %v3125_v8  ;;  %1751 = vmatprep.subr.bf16.mxu0 %v3130_v9  ;;  %v3212_v8 = vld [vmem:[%s4346_s1 + $0x2b0] ss:$28 sps:$4 sm:$0xff]   ;;  %v3216_v9 = vld [vmem:[%s4346_s1 + $0x18] ss:$28 sps:$4 sm:$0xff]  }
  0x7e   :  { %1902 = vmatprep.subr.bf16.mxu1 %v3133_v10  ;;  %v3219_v10 = vld [vmem:[%s4346_s1 + $0x2ec] ss:$28 sps:$4 sm:$0xff]  }
  0x80   :  { %1752 = vmatpush1.bf16.msra.mxu0 %v3128_v11  ;;  %v3220_v11 = vld [vmem:[%s4346_s1 + $0x210] ss:$28 sps:$4 sm:$0xff]  }
  0x81   :  { %1903 = vmatpush1.bf16.msra.mxu1 %v3131_v12  ;;  %1986 = vmatprep.subr.bf16.mxu0 %v3142_v15  ;;  %v3217_v12 = vld [vmem:[%s4346_s1 + $0x2e8] ss:$28 sps:$4 sm:$0xff]  }
  0x82   :  { %1904 = vmatprep.subr.bf16.mxu1 %v3139_v13  ;;  %v3221_v13 = vld [vmem:[%s4346_s1 + $0x50] ss:$28 sps:$4 sm:$0xff]   ;;  %v3224_v15 = vld [vmem:[%s4346_s1 + $0x324] ss:$28 sps:$4 sm:$0xff]  }
  0x83   :  { %1754 = vmatmul.mubr.bf16.vlgmr.msra.gmra.mrb[0].mxu0 %v3773_v14 }
  0x84   :  { %1987 = vmatpush1.bf16.msra.mxu0 %v3140_v17  ;;  %1763 = vmatprep.mubr.bf16.mxu0 %v3793_v20  ;;  %v3222_v17 = vld [vmem:[%s4346_s1 + $0x320] ss:$28 sps:$4 sm:$0xff]  }
  0x85   :  { %1905 = vmatpush1.bf16.msra.mxu1 %v3137_v16  ;;  %1988 = vmatprep.subr.bf16.mxu0 %v3148_v19  ;;  %v3225_v16 = vld [vmem:[%s4346_s1 + $0x248] ss:$28 sps:$4 sm:$0xff]   ;;  %v3229_v19 = vld [vmem:[%s4346_s1 + $0x35c] ss:$28 sps:$4 sm:$0xff]  }
  0x86   :  { %1906 = vmatprep.subr.bf16.mxu1 %v3145_v18  ;;  %v3226_v18 = vld [vmem:[%s4346_s1 + $0x88] ss:$28 sps:$4 sm:$0xff]  }
  0x88   :  { %1989 = vmatpush1.bf16.msra.mxu0 %v3146_v22  ;;  %v3227_v22 = vld [vmem:[%s4346_s1 + $0x358] ss:$28 sps:$4 sm:$0xff]  }
  0x89   :  { %1907 = vmatpush1.bf16.msra.mxu1 %v3143_v21  ;;  %1990 = vmatprep.subr.bf16.mxu0 %v3157_v25  ;;  %v3230_v21 = vld [vmem:[%s4346_s1 + $0x280] ss:$28 sps:$4 sm:$0xff]   ;;  %v3234_v25 = vld [vmem:[%s4346_s1 + $0x394] ss:$28 sps:$4 sm:$0xff]  }
  0x8a   :  { %1908 = vmatprep.subr.bf16.mxu1 %v3154_v23  ;;  %v3231_v23 = vld [vmem:[%s4346_s1 + $0xc0] ss:$28 sps:$4 sm:$0xff]  }
  0x8b   :  { %1764 = vmatmul.mubr.bf16.gmra.mrb[4].mxu0 %v3808_v24 }
  0x8c   :  { %1991 = vmatpush1.bf16.msra.mxu0 %v3155_v27  ;;  %2018 = vmatprep.mubr.bf16.mxu0 %v3488_v50  ;;  %v3170_v50 = vld [vmem:[%s4346_s1 + $0x740] ss:$28 sps:$4 sm:$0xff]   ;;  %v3310_v27 = vld [vmem:[%s4347_s0 + $0x4] ss:$20 sps:$4 sm:$0xff]  }
  0x8d   :  { %1909 = vmatpush1.bf16.msra.mxu1 %v3152_v26  ;;  %1992 = vmatprep.subr.bf16.mxu0 %v3163_v29  ;;  %v3235_v26 = vld [vmem:[%s4346_s1 + $0x2b8] ss:$28 sps:$4 sm:$0xff]  }
  0x8e   :  { %1910 = vmatprep.subr.bf16.mxu1 %v3160_v28  ;;  %v3232_v28 = vld [vmem:[%s4346_s1 + $0x390] ss:$28 sps:$4 sm:$0xff]   ;;  %v3236_v29 = vld [vmem:[%s4346_s1 + $0xf8] ss:$28 sps:$4 sm:$0xff]  }
  0x90   :  { %1993 = vmatpush1.bf16.msra.mxu0 %v3161_v33  ;;  %v3240_v33 = vld [vmem:[%s4346_s1 + $0x2f0] ss:$28 sps:$4 sm:$0xff]  }
  0x91   :  { %1911 = vmatpush1.bf16.msra.mxu1 %v3158_v30  ;;  %1994 = vmatprep.subr.bf16.mxu0 %v3169_v35  ;;  %v3239_v30 = vld [vmem:[%s4346_s1 + $0x3cc] ss:$28 sps:$4 sm:$0xff]  }
  0x92   :  { %1933 = vmatprep.subr.bf16.mxu1 %v3166_v34  ;;  %v3237_v34 = vld [vmem:[%s4346_s1 + $0x3c8] ss:$28 sps:$4 sm:$0xff]   ;;  %v3241_v35 = vld [vmem:[%s4346_s1 + $0x130] ss:$28 sps:$4 sm:$0xff]  }
  0x94   :  { %1913 = vmatmul.mubr.bf16.vlgmr.msra.gmra.mrb[8].mxu1 %v3773_v14  ;;  %1995 = vmatpush1.bf16.msra.mxu0 %v3167_v37  ;;  %v3242_v37 = vld [vmem:[%s4346_s1 + $0x400] ss:$28 sps:$4 sm:$0xff]  }
  0x95   :  { %1934 = vmatpush1.bf16.msra.mxu1 %v3164_v36  ;;  %1996 = vmatprep.subr.bf16.mxu0 %v3175_v40  ;;  %v3244_v36 = vld [vmem:[%s4346_s1 + $0x404] ss:$28 sps:$4 sm:$0xff]   ;;  %v3249_v40 = vld [vmem:[%s4346_s1 + $0x43c] ss:$28 sps:$4 sm:$0xff]  }
  0x96   :  { %1935 = vmatprep.subr.bf16.mxu1 %v3172_v38  ;;  %1922 = vmatprep.mubr.bf16.mxu1 %v3793_v20  ;;  %v3246_v38 = vld [vmem:[%s4346_s1 + $0x168] ss:$28 sps:$4 sm:$0xff]  }
  0x98   :  { %1997 = vmatpush1.bf16.msra.mxu0 %v3173_v41  ;;  %v3247_v41 = vld [vmem:[%s4346_s1 + $0x438] ss:$28 sps:$4 sm:$0xff]  }
  0x99   :  { %1936 = vmatpush1.bf16.msra.mxu1 %v3170_v50  ;;  %1998 = vmatprep.subr.bf16.mxu0 %v3181_v43  ;;  %v3250_v50 = vld [vmem:[%s4346_s1 + $0x360] ss:$28 sps:$4 sm:$0xff]   ;;  %v3254_v43 = vld [vmem:[%s4346_s1 + $0x474] ss:$28 sps:$4 sm:$0xff]  }
  0x9a   :  { %1937 = vmatprep.subr.bf16.mxu1 %v3178_v42  ;;  %v3251_v42 = vld [vmem:[%s4346_s1 + $0x1a0] ss:$28 sps:$4 sm:$0xff]  }
  0x9c   :  { %1923 = vmatmul.mubr.bf16.gmra.mrb[12].mxu1 %v3808_v24  ;;  %1999 = vmatpush1.bf16.msra.mxu0 %v3179_v45  ;;  %v3252_v45 = vld [vmem:[%s4346_s1 + $0x470] ss:$28 sps:$4 sm:$0xff]  }
  0x9d   :  { %1938 = vmatpush1.bf16.msra.mxu1 %v3176_v44  ;;  %2000 = vmatprep.subr.bf16.mxu0 %v3187_v47  ;;  %v3255_v44 = vld [vmem:[%s4346_s1 + $0x558] ss:$28 sps:$4 sm:$0xff]   ;;  %v3259_v47 = vld [vmem:[%s4346_s1 + $0x4ac] ss:$28 sps:$4 sm:$0xff]  }
  0x9e   :  { %1939 = vmatprep.subr.bf16.mxu1 %v3184_v46  ;;  %1965 = vmatprep.mubr.bf16.mxu1 %v3312_v1  ;;  %v3256_v46 = vld [vmem:[%s4346_s1 + $0x398] ss:$28 sps:$4 sm:$0xff]  }
  0xa0   :  { %2001 = vmatpush1.bf16.msra.mxu0 %v3185_v49  ;;  %v3311_v49 = vld [vmem:[%s4347_s0] ss:$20 sps:$4 sm:$0xff]  }
  0xa1   :  { %1940 = vmatpush1.bf16.msra.mxu1 %v3182_v48  ;;  %2002 = vmatprep.subr.bf16.mxu0 %v3190_v51  ;;  %v3260_v48 = vld [vmem:[%s4346_s1 + $0x590] ss:$28 sps:$4 sm:$0xff]   ;;  %v3257_v51 = vld [vmem:[%s4346_s1 + $0x4a8] ss:$28 sps:$4 sm:$0xff]  }
  0xa2   :  { %2092 = vmatprep.subr.bf16.mxu1 %v3193_v52  ;;  %v3261_v52 = vld [vmem:[%s4346_s1 + $0x3d0] ss:$28 sps:$4 sm:$0xff]  }
  0xa4   :  { %2795 = vmatmul.mubr.msk.bf16.vlgmr.msra.gmra.mrb[8].mxu1 %vm1661_vm0, %v3910_v58  ;;  %2003 = vmatpush1.bf16.msra.mxu0 %v3188_v53  ;;  %v3264_v53 = vld [vmem:[%s4346_s1 + $0x4e4] ss:$28 sps:$4 sm:$0xff]  }
  0xa5   :  { %2093 = vmatpush1.bf16.msra.mxu1 %v3191_v54  ;;  %2004 = vmatprep.subr.bf16.mxu0 %v3196_v55  ;;  %v3265_v54 = vld [vmem:[%s4346_s1 + $0x5c8] ss:$28 sps:$4 sm:$0xff]   ;;  %v3262_v55 = vld [vmem:[%s4346_s1 + $0x4e0] ss:$28 sps:$4 sm:$0xff]  }
  0xa6   :  { %2094 = vmatprep.subr.bf16.mxu1 %v3199_v56  ;;  %1975 = vmatprep.mubr.bf16.mxu1 %v3312_v1  ;;  %v3266_v56 = vld [vmem:[%s4346_s1 + $0x408] ss:$28 sps:$4 sm:$0xff]  }
  0xa8   :  { %2005 = vmatpush1.bf16.msra.mxu0 %v3194_v57  ;;  %v3269_v57 = vld [vmem:[%s4346_s1 + $0x51c] ss:$28 sps:$4 sm:$0xff]  }
  0xa9   :  { %2095 = vmatpush1.bf16.msra.mxu1 %v3197_v59  ;;  %2006 = vmatprep.subr.bf16.mxu0 %v3202_v60  ;;  %v3267_v59 = vld [vmem:[%s4346_s1 + $0x518] ss:$28 sps:$4 sm:$0xff]   ;;  %v3271_v60 = vld [vmem:[%s4346_s1 + $0x440] ss:$28 sps:$4 sm:$0xff]  }
  0xaa   :  { %2096 = vmatprep.subr.bf16.mxu1 %v3205_v62  ;;  %v3274_v62 = vld [vmem:[%s4346_s1 + $0x554] ss:$28 sps:$4 sm:$0xff]  }
  0xac   :  { %2796 = vmatmul.mubr.msk.bf16.gmra.mrb[12].mxu1 %vm1661_vm0, %v3524_v61  ;;  %2007 = vmatpush1.bf16.msra.mxu0 %v3200_v63  ;;  %v3215_v61 = vld [vmem:[%s4346_s1 + $0x1d8] ss:$28 sps:$4 sm:$0xff]   ;;  %v3272_v63 = vld [vmem:[%s4346_s1 + $0x550] ss:$28 sps:$4 sm:$0xff]  }
  0xad   :  { %2097 = vmatpush1.bf16.msra.mxu1 %v3203_v0  ;;  %2008 = vmatprep.subr.bf16.mxu0 %v3208_v2  ;;  %v3276_v0 = vld [vmem:[%s4346_s1 + $0x478] ss:$28 sps:$4 sm:$0xff]   ;;  %v3279_v2 = vld [vmem:[%s4346_s1 + $0x58c] ss:$28 sps:$4 sm:$0xff]  }
  0xae   :  { %2098 = vmatprep.subr.bf16.mxu1 %v3211_v3  ;;  %2124 = vmatprep.mubr.bf16.mxu1 %v3312_v1  ;;  %v3277_v3 = vld [vmem:[%s4346_s1 + $0x588] ss:$28 sps:$4 sm:$0xff]  }
  0xb0   :  { %2009 = vmatpush1.bf16.msra.mxu0 %v3206_v4  ;;  %v3281_v4 = vld [vmem:[%s4346_s1 + $0x4b0] ss:$28 sps:$4 sm:$0xff]  }
  0xb1   :  { %2099 = vmatpush1.bf16.msra.mxu1 %v3209_v5  ;;  %2010 = vmatprep.subr.bf16.mxu0 %v3214_v6  ;;  %v3284_v5 = vld [vmem:[%s4346_s1 + $0x5c4] ss:$28 sps:$4 sm:$0xff]  }
  0xb2   :  { %2809 = vmatprep.subr.bf16.mxu1 %v3215_v61  ;;  %v3285_v6 = vld [vmem:[%s4346_s1 + $0x6a8] ss:$28 sps:$4 sm:$0xff]  }
  0xb4   :  { %2797 = vmatmul.mubr.msk.bf16.vlgmr.msra.gmra.mrb[16].mxu1 %vm1661_vm0, %v3910_v58  ;;  %2011 = vmatpush1.bf16.msra.mxu0 %v3212_v8 }
  0xb5   :  { %2810 = vmatpush3.bf16.msra.mxu1 %v3216_v9  ;;  %2012 = vmatprep.subr.bf16.mxu0 %v3219_v10  ;;  %v3282_v10 = vld [vmem:[%s4346_s1 + $0x5c0] ss:$28 sps:$4 sm:$0xff]  }
  0xb6   :  { %2811 = vmatprep.subr.bf16.mxu1 %v3220_v11  ;;  %2134 = vmatprep.mubr.bf16.mxu1 %v3312_v1  ;;  %v3993_v1 = vld [vmem:[%s4347_s0 + $0x38] ss:$20 sps:$4 sm:$0x3f]   ;;  %v3286_v11 = vld [vmem:[%s4346_s1 + $0x4e8] ss:$28 sps:$4 sm:$0xff]  }
  0xb8   :  { %2013 = vmatpush1.bf16.msra.mxu0 %v3217_v12 }
  0xb9   :  { %2812 = vmatpush3.bf16.msra.mxu1 %v3221_v13  ;;  %2014 = vmatprep.subr.bf16.mxu0 %v3224_v15  ;;  %v3289_v13 = vld [vmem:[%s4346_s1 + $0x5fc] ss:$28 sps:$4 sm:$0xff]  }
  0xba   :  { %2813 = vmatprep.subr.bf16.mxu1 %v3225_v16  ;;  %v3290_v15 = vld [vmem:[%s4346_s1 + $0x6e0] ss:$28 sps:$4 sm:$0xff]   ;;  %v3287_v16 = vld [vmem:[%s4346_s1 + $0x5f8] ss:$28 sps:$4 sm:$0xff]  }
  0xbc   :  { %2798 = vmatmul.mubr.msk.bf16.gmra.mrb[20].mxu1 %vm1661_vm0, %v3993_v1  ;;  %2015 = vmatpush1.bf16.msra.mxu0 %v3222_v17  ;;  %v3291_v17 = vld [vmem:[%s4346_s1 + $0x520] ss:$28 sps:$4 sm:$0xff]  }
  0xbd   :  { %2814 = vmatpush3.bf16.msra.mxu1 %v3226_v18  ;;  %2016 = vmatprep.subr.bf16.mxu0 %v3229_v19  ;;  %v3294_v18 = vld [vmem:[%s4346_s1 + $0x634] ss:$28 sps:$4 sm:$0xff]  }
  0xbe   :  { %2815 = vmatprep.subr.bf16.mxu1 %v3230_v21  ;;  %2177 = vmatprep.mubr.bf16.mxu1 %v3310_v27  ;;  %v3295_v19 = vld [vmem:[%s4346_s1 + $0x718] ss:$28 sps:$4 sm:$0xff]   ;;  %v3292_v21 = vld [vmem:[%s4346_s1 + $0x630] ss:$28 sps:$4 sm:$0xff]   ;;  %v3303_v27 = vld [vmem:[%s4346_s1 + $0x788] ss:$28 sps:$4 sm:$0xff]  }
  0xc0   :  { %2017 = vmatpush1.bf16.msra.mxu0 %v3227_v22  ;;  %v3298_v22 = vld [vmem:[%s4346_s1 + $0x66c] ss:$28 sps:$4 sm:$0xff]  }
  0xc1   :  { %2816 = vmatpush3.bf16.msra.mxu1 %v3231_v23  ;;  %2039 = vmatprep.subr.bf16.mxu0 %v3234_v25  ;;  %v3299_v23 = vld [vmem:[%s4346_s1 + $0x750] ss:$28 sps:$4 sm:$0xff]   ;;  %v3296_v25 = vld [vmem:[%s4346_s1 + $0x668] ss:$28 sps:$4 sm:$0xff]  }
  0xc2   :  { %2817 = vmatprep.subr.bf16.mxu1 %v3235_v26  ;;  %v3302_v26 = vld [vmem:[%s4346_s1 + $0x6a4] ss:$28 sps:$4 sm:$0xff]  }
  0xc3   :  { %2019 = vmatmul.mubr.bf16.vlgmr.msra.gmra.mrb[8].mxu0 %v3556_v7  ;;  %v3245_v7 = vld [vmem:[%s4346_s1 + $0x328] ss:$28 sps:$4 sm:$0xff]  }
  0xc4   :  { %2040 = vmatpush1.bf16.msra.mxu0 %v3232_v28  ;;  %2028 = vmatprep.mubr.bf16.mxu0 %v3632_v31  ;;  %v3300_v28 = vld [vmem:[%s4346_s1 + $0x6a0] ss:$28 sps:$4 sm:$0xff]  }
  0xc5   :  { %2818 = vmatpush3.bf16.msra.mxu1 %v3236_v29  ;;  %2041 = vmatprep.subr.bf16.mxu0 %v3239_v30  ;;  %v3306_v29 = vld [vmem:[%s4346_s1 + $0x6dc] ss:$28 sps:$4 sm:$0xff]  }
  0xc6   :  { %2819 = vmatprep.subr.bf16.mxu1 %v3240_v33  ;;  %v3307_v30 = vld [vmem:[%s4346_s1 + $0x7c0] ss:$28 sps:$4 sm:$0xff]   ;;  %v3304_v33 = vld [vmem:[%s4346_s1 + $0x6d8] ss:$28 sps:$4 sm:$0xff]  }
  0xc8   :  { %2042 = vmatpush1.bf16.msra.mxu0 %v3237_v34 }
  0xc9   :  { %2820 = vmatpush3.bf16.msra.mxu1 %v3241_v35  ;;  %2043 = vmatprep.subr.bf16.mxu0 %v3244_v36 }
  0xca   :  { %2821 = vmatprep.subr.bf16.mxu1 %v3245_v7 }
  0xcb   :  { %2029 = vmatmul.mubr.bf16.gmra.mrb[12].mxu0 %v3637_v32 }
  0xcc   :  { %2044 = vmatpush1.bf16.msra.mxu0 %v3242_v37  ;;  %2071 = vmatprep.mubr.bf16.mxu0 %v3663_v39 }
  0xcd   :  { %2822 = vmatpush3.bf16.msra.mxu1 %v3246_v38  ;;  %2045 = vmatprep.subr.bf16.mxu0 %v3249_v40 }
  0xce   :  { %2823 = vmatprep.subr.bf16.mxu1 %v3250_v50 }
  0xd0   :  { %2046 = vmatpush1.bf16.msra.mxu0 %v3247_v41 }
  0xd1   :  { %2824 = vmatpush3.bf16.msra.mxu1 %v3251_v42  ;;  %2047 = vmatprep.subr.bf16.mxu0 %v3254_v43 }
  0xd2   :  { %2837 = vmatprep.subr.bf16.mxu1 %v3255_v44 }
  0xd4   :  { %2178 = vmatmul.mubr.bf16.vlgmr.msra.gmra.mrb[24].mxu1 %v3311_v49  ;;  %2048 = vmatpush1.bf16.msra.mxu0 %v3252_v45 }
  0xd5   :  { %2838 = vmatpush3.bf16.msra.mxu1 %v3256_v46  ;;  %2049 = vmatprep.subr.bf16.mxu0 %v3259_v47 }
  0xd6   :  { %2839 = vmatprep.subr.bf16.mxu1 %v3260_v48  ;;  %2185 = vmatprep.mubr.bf16.mxu1 %v3632_v31  ;;  %v3270_v31 = vld [vmem:[%s4346_s1 + $0x600] ss:$28 sps:$4 sm:$0xff]  }
  0xd8   :  { %2050 = vmatpush1.bf16.msra.mxu0 %v3257_v51 }
  0xd9   :  { %2840 = vmatpush3.bf16.msra.mxu1 %v3261_v52  ;;  %2051 = vmatprep.subr.bf16.mxu0 %v3264_v53 }
  0xda   :  { %2841 = vmatprep.subr.bf16.mxu1 %v3265_v54 }
  0xdc   :  { %2186 = vmatmul.mubr.bf16.gmra.mrb[28].mxu1 %v3637_v32  ;;  %2052 = vmatpush1.bf16.msra.mxu0 %v3262_v55  ;;  %v3275_v32 = vld [vmem:[%s4346_s1 + $0x638] ss:$28 sps:$4 sm:$0xff]  }
  0xdd   :  { %2842 = vmatpush3.bf16.msra.mxu1 %v3266_v56  ;;  %2053 = vmatprep.subr.bf16.mxu0 %v3269_v57 }
  0xde   :  { %2843 = vmatprep.subr.bf16.mxu1 %v3270_v31  ;;  %2226 = vmatprep.mubr.bf16.mxu1 %v3663_v39  ;;  %v3280_v39 = vld [vmem:[%s4346_s1 + $0x670] ss:$28 sps:$4 sm:$0xff]   ;;  %s3313_s1 = smov 32  }
  0xe0   :  { %2054 = vmatpush1.bf16.msra.mxu0 %v3267_v59 }
  0xe1   :  { %2844 = vmatpush3.bf16.msra.mxu1 %v3271_v60  ;;  %2055 = vmatprep.subr.bf16.mxu0 %v3274_v62 }
  0xe2   :  { %2845 = vmatprep.subr.bf16.mxu1 %v3275_v32 }
  0xe4   :  { %2056 = vmatpush1.bf16.msra.mxu0 %v3272_v63 }
  0xe5   :  { %2846 = vmatpush3.bf16.msra.mxu1 %v3276_v0  ;;  %2057 = vmatprep.subr.bf16.mxu0 %v3279_v2 }
  0xe6   :  { %2847 = vmatprep.subr.bf16.mxu1 %v3280_v39 }
  0xe7   :  { %v1808_v61 = vpop.f32.mrb[0].mxu1 }
  0xe8   :  { %v1810_v8 = vpop.f32.mrb[1].mxu1  ;;  %2058 = vmatpush1.bf16.msra.mxu0 %v3277_v3 }
  0xe9   :  { %2848 = vmatpush3.bf16.msra.mxu1 %v3281_v4  ;;  %v1812_v9 = vpop.f32.mrb[2].mxu1  ;;  %2059 = vmatprep.subr.bf16.mxu0 %v3284_v5 }
  0xea   :  { %v1814_v12 = vpop.f32.mrb[3].mxu1  ;;  %2849 = vmatprep.subr.bf16.mxu1 %v3285_v6 }
  0xec   :  { %2060 = vmatpush1.bf16.msra.mxu0 %v3282_v10 }
  0xed   :  { %2850 = vmatpush3.bf16.msra.mxu1 %v3286_v11  ;;  %2061 = vmatprep.subr.bf16.mxu0 %v3289_v13 }
  0xee   :  { %2851 = vmatprep.subr.bf16.mxu1 %v3290_v15 }
  0xef   :  { %v1818_v34 = vpop.f32.mrb[4].mxu1 }
  0xf0   :  { %2062 = vmatpush1.bf16.msra.mxu0 %v3287_v16  ;;  %v1820_v35 = vpop.f32.mrb[5].mxu1 }
  0xf1   :  { %2852 = vmatpush3.bf16.msra.mxu1 %v3291_v17  ;;  %2063 = vmatprep.subr.bf16.mxu0 %v3294_v18  ;;  %v1822_v36 = vpop.f32.mrb[6].mxu1 }
  0xf2   :  { %2871 = vmatprep.subr.bf16.mxu1 %v3295_v19  ;;  %v1824_v7 = vpop.f32.mrb[7].mxu1 }
  0xf4   :  { %2227 = vmatmul.mubr.bf16.vlgmr.msra.gmra.mrb[32].mxu1 %v3773_v14  ;;  %2064 = vmatpush1.bf16.msra.mxu0 %v3292_v21 }
  0xf5   :  { %2872 = vmatpush3.bf16.msra.mxu1 %v3295_v19  ;;  %2065 = vmatprep.subr.bf16.mxu0 %v3298_v22 }
  0xf6   :  { %2873 = vmatprep.subr.bf16.mxu1 %v3299_v23  ;;  %2234 = vmatprep.mubr.bf16.mxu1 %v3793_v20 }
  0xf8   :  { %2066 = vmatpush1.bf16.msra.mxu0 %v3296_v25 }
  0xf9   :  { %2874 = vmatpush3.bf16.msra.mxu1 %v3299_v23  ;;  %2067 = vmatprep.subr.bf16.mxu0 %v3302_v26 }
  0xfa   :  { %2875 = vmatprep.subr.bf16.mxu1 %v3303_v27 }
  0xfc   :  { %2235 = vmatmul.mubr.bf16.gmra.mrb[36].mxu1 %v3808_v24  ;;  %2068 = vmatpush1.bf16.msra.mxu0 %v3300_v28 }
  0xfd   :  { %2876 = vmatpush3.bf16.msra.mxu1 %v3303_v27  ;;  %2069 = vmatprep.subr.bf16.mxu0 %v3306_v29 }
  0xfe   :  { %2877 = vmatprep.subr.bf16.mxu1 %v3307_v30  ;;  %2879 = vmatprep.mubr.msk.bf16.mxu1 %vm1661_vm0, %v3910_v58 }
 0x100   :  { %2070 = vmatpush1.bf16.msra.mxu0 %v3304_v33 }
 0x101   :  { %2878 = vmatpush3.bf16.msra.mxu1 %v3307_v30 }
 0x103   :  { %2072 = vmatmul.mubr.bf16.vlgmr.msra.gmra.mrb[8].mxu0 %v3773_v14 }
 0x104   :  { %2880 = vmatmul.mubr.msk.bf16.vlgmr.msra.gmra.mrb[40].mxu1 %vm1661_vm0, %v3993_v1  ;;  %2081 = vmatprep.mubr.bf16.mxu0 %v3793_v20 }
 0x10b   :  { %2082 = vmatmul.mubr.bf16.gmra.mrb[12].mxu0 %v3808_v24 }
 0x156   :  { %v1755_v37 = vpop.f32.mrb[0].mxu0 }
 0x157   :  { %v4206_v38 = vadd.f32 %v1808_v61, %v1755_v37  ;;  %v1757_v40 = vpop.f32.mrb[1].mxu0 }
 0x158   :  { %v4208_v58 = vadd.f32 %v1810_v8, %v1757_v40  ;;  %v1759_v50 = vpop.f32.mrb[2].mxu0 }
 0x159   :  { %v4210_v41 = vadd.f32 %v1812_v9, %v1759_v50  ;;  %v1761_v14 = vpop.f32.mrb[3].mxu0 }
 0x15a   :  { %v4212_v42 = vadd.f32 %v1814_v12, %v1761_v14 }
 0x15e   :  { %v1765_v1 = vpop.f32.mrb[4].mxu0 }
 0x15f   :  { %v4214_v20 = vadd.f32 %v1818_v34, %v1765_v1  ;;  %v1767_v24 = vpop.f32.mrb[5].mxu0 }
 0x160   :  { %v4216_v43 = vadd.f32 %v1820_v35, %v1767_v24  ;;  %v1769_v44 = vpop.f32.mrb[6].mxu0 }
 0x161   :  { %v4218_v45 = vadd.f32 %v1822_v36, %v1769_v44  ;;  %v1771_v46 = vpop.f32.mrb[7].mxu0 }
 0x162   :  { %v4220_v47 = vadd.f32 %v1824_v7, %v1771_v46 }
 0x177   :  { %v4222_v48 = vpop.f32.mrb[8].mxu1 }
 0x178   :  { %v4224_v49 = vpop.f32.mrb[9].mxu1 }
 0x179   :  { %v4226_v51 = vpop.f32.mrb[10].mxu1 }
 0x17a   :  { %v4228_v52 = vpop.f32.mrb[11].mxu1 }
 0x17f   :  { %v4230_v53 = vpop.f32.mrb[12].mxu1 }
 0x180   :  { %v4232_v54 = vpop.f32.mrb[13].mxu1 }
 0x181   :  { %v4234_v55 = vpop.f32.mrb[14].mxu1 }
 0x182   :  { %v4236_v56 = vpop.f32.mrb[15].mxu1 }
 0x187   :  { %v2126_v57 = vpop.f32.mrb[16].mxu1 }
 0x188   :  { %v2128_v31 = vpop.f32.mrb[17].mxu1 }
 0x189   :  { %v2130_v59 = vpop.f32.mrb[18].mxu1 }
 0x18a   :  { %v2132_v60 = vpop.f32.mrb[19].mxu1 }
 0x18f   :  { %v2136_v62 = vpop.f32.mrb[20].mxu1 }
 0x190   :  { %v2138_v32 = vpop.f32.mrb[21].mxu1 }
 0x191   :  { %v2140_v63 = vpop.f32.mrb[22].mxu1 }
 0x192   :  { %v2142_v0 = vpop.f32.mrb[23].mxu1 }
 0x1a7   :  { %v2825_v2 = vpop.f32.mrb[24].mxu1 }
 0x1a8   :  { %v2826_v39 = vpop.f32.mrb[25].mxu1 }
 0x1a9   :  { %v2827_v3 = vadd.f32 %v2826_v39, %v2825_v2  ;;  %v2828_v4 = vpop.f32.mrb[26].mxu1 }
 0x1aa   :  { %v2829_v5 = vpop.f32.mrb[27].mxu1 }
 0x1ab   :  { %v2830_v6 = vadd.f32 %v2829_v5, %v2828_v4 }
 0x1af   :  { %v2831_v61 = vpop.f32.mrb[28].mxu1 }
 0x1b0   :  { %v2832_v8 = vpop.f32.mrb[29].mxu1 }
 0x1b1   :  { %v2833_v9 = vadd.f32 %v2832_v8, %v2831_v61  ;;  %v2834_v10 = vpop.f32.mrb[30].mxu1 }
 0x1b2   :  { %v2835_v11 = vpop.f32.mrb[31].mxu1 }
 0x1b3   :  { %v2836_v12 = vadd.f32 %v2835_v11, %v2834_v10 }
 0x1c7   :  { %v2853_v13 = vpop.f32.mrb[32].mxu1 }
 0x1c8   :  { %v2854_v15 = vpop.f32.mrb[33].mxu1 }
 0x1c9   :  { %v2855_v16 = vadd.f32 %v2854_v15, %v2853_v13  ;;  %v2856_v17 = vpop.f32.mrb[34].mxu1 }
 0x1ca   :  { %v2857_v18 = vpop.f32.mrb[35].mxu1 }
 0x1cb   :  { %v2858_v19 = vadd.f32 %v2857_v18, %v2856_v17  ;;  %v2229_v21 = vadd.f32 %v2855_v16, %v2827_v3 }
 0x1cd   :  { %v2232_v22 = vadd.f32 %v2858_v19, %v2830_v6 }
 0x1cf   :  { %v2859_v23 = vpop.f32.mrb[36].mxu1 }
 0x1d0   :  { %v2860_v25 = vpop.f32.mrb[37].mxu1 }
 0x1d1   :  { %v2861_v26 = vadd.f32 %v2860_v25, %v2859_v23  ;;  %v2862_v27 = vpop.f32.mrb[38].mxu1 }
 0x1d2   :  { %v2863_v28 = vpop.f32.mrb[39].mxu1 }
 0x1d3   :  { %v2864_v29 = vadd.f32 %v2863_v28, %v2862_v27  ;;  %v2237_v30 = vadd.f32 %v2861_v26, %v2833_v9 }
 0x1d5   :  { %v2240_v33 = vadd.f32 %v2864_v29, %v2836_v12 }
 0x1d6   :  { %v2073_v34 = vpop.f32.mrb[8].mxu0 }
 0x1d7   :  { %v2881_v35 = vpop.f32.mrb[40].mxu1  ;;  %v2891_v36 = vadd.f32 %v2126_v57, %v2073_v34  ;;  %v2075_v37 = vpop.f32.mrb[9].mxu0 }
 0x1d8   :  { %v2286_v7 = vadd.f32 %v2881_v35, %v2237_v30  ;;  %v2277_v40 = vpop.f32.mrb[41].mxu1  ;;  %v2892_v50 = vadd.f32 %v2128_v31, %v2075_v37  ;;  %v2077_v1 = vpop.f32.mrb[10].mxu0 }
 0x1d9   :  { %v2278_v14 = vadd.f32 %v2277_v40, %v2229_v21  ;;  %v2882_v24 = vpop.f32.mrb[42].mxu1  ;;  %v2893_v44 = vadd.f32 %v2130_v59, %v2077_v1  ;;  %v2079_v39 = vpop.f32.mrb[11].mxu0 }
 0x1da   :  { %v2289_v46 = vadd.f32 %v2882_v24, %v2240_v33  ;;  %v2280_v2 = vpop.f32.mrb[43].mxu1  ;;  %2371 = vrot.lane.b32.xlu1 %v2286_v7, %s3313_s1  ;;  %v2894_v4 = vadd.f32 %v2132_v60, %v2079_v39  ;;  %2361 = vrot.lane.b32.xlu0 %v2892_v50, %s3313_s1 }
 0x1db   :  { %v2281_v3 = vadd.f32 %v2280_v2, %v2232_v22 }
 0x1de   :  { %2365 = vrot.lane.b32.xlu1 %v2894_v4, %s3313_s1  ;;  %2363 = vrot.lane.b32.xlu0 %v2278_v14, %s3313_s1  ;;  %v2083_v57 = vpop.f32.mrb[12].mxu0 }
 0x1df   :  { %v2895_v31 = vadd.f32 %v2136_v62, %v2083_v57  ;;  %v2085_v5 = vpop.f32.mrb[13].mxu0 }
 0x1e0   :  { %v2896_v6 = vadd.f32 %v2138_v32, %v2085_v5  ;;  %v2087_v61 = vpop.f32.mrb[14].mxu0 }
 0x1e1   :  { %v2897_v59 = vadd.f32 %v2140_v63, %v2087_v61  ;;  %v2089_v8 = vpop.f32.mrb[15].mxu0 }
 0x1e2   :  { %2367 = vrot.lane.b32.xlu1 %v2281_v3, %s3313_s1  ;;  %v4243_v9 = vadd.f32 %v2142_v0, %v2089_v8  ;;  %2369 = vrot.lane.b32.xlu0 %v2896_v6, %s3313_s1  ;;  %v2465_v3 = vld [vmem:[%s4348_s2] sm:$0x3] }
 0x1e6   :  { %2375 = vrot.lane.b32.xlu1 %v2289_v46, %s3313_s1  ;;  %2373 = vrot.lane.b32.xlu0 %v4243_v9, %s3313_s1 }
 0x1ea   :  { %2306 = vrot.lane.b32.xlu1 %v4222_v48, %s3313_s1  ;;  %2304 = vrot.lane.b32.xlu0 %v4208_v58, %s3313_s1 }
 0x1ee   :  { %2310 = vrot.lane.b32.xlu1 %v4212_v42, %s3313_s1  ;;  %2308 = vrot.lane.b32.xlu0 %v4224_v49, %s3313_s1 }
 0x1f2   :  { %2314 = vrot.lane.b32.xlu1 %v4228_v52, %s3313_s1  ;;  %2312 = vrot.lane.b32.xlu0 %v4226_v51, %s3313_s1 }
 0x1f6   :  { %2318 = vrot.lane.b32.xlu1 %v4230_v53, %s3313_s1  ;;  %2316 = vrot.lane.b32.xlu0 %v4216_v43, %s3313_s1 }
 0x1fa   :  { %2322 = vrot.lane.b32.xlu1 %v4220_v47, %s3313_s1  ;;  %2320 = vrot.lane.b32.xlu0 %v4232_v54, %s3313_s1 }
 0x1fe   :  { %2326 = vrot.lane.b32.xlu1 %v4236_v56, %s3313_s1  ;;  %2324 = vrot.lane.b32.xlu0 %v4234_v55, %s3313_s1 }
 0x24c   :  { %v2372_v48 = vpop.permute.xlu1 %2371  ;;  %v2362_v60 = vpop.permute.xlu0 %2361 }
 0x24d   :  { %v2401_v51 = vmax.f32 %v2896_v6, %v2372_v48  ;;  %v2393_v62 = vmax.f32 %v4224_v49, %v2362_v60 }
 0x24f   :  { %2433 = vrot.lane.b32.xlu0 %v2401_v51, %s3314_s28 }
 0x250   :  { %v2366_v53 = vpop.permute.xlu1 %2365  ;;  %v2364_v32 = vpop.permute.xlu0 %2363 }
 0x251   :  { %v2377_v63 = vsel %vm2328_vm1, %v2362_v60, %v2364_v32  ;;  %v2395_v11 = vmax.f32 %v2892_v50, %v2364_v32  ;;  %v2396_v13 = vmax.f32 %v4228_v52, %v2366_v53 }
 0x252   :  { %v2394_v0 = vmax.f32 %v2891_v36, %v2377_v63 }
 0x253   :  { %2417 = vrot.lane.b32.xlu0 %v2393_v62, %s3314_s28 }
 0x254   :  { %v2368_v10 = vpop.permute.xlu1 %2367  ;;  %v2370_v12 = vpop.permute.xlu0 %2369  ;;  %2419 = vrot.lane.b32.xlu1 %v2394_v0, %s3314_s28 }
 0x255   :  { %v2378_v55 = vsel %vm2328_vm1, %v2366_v53, %v2368_v10  ;;  %v2398_v17 = vmax.f32 %v2894_v4, %v2368_v10  ;;  %v2379_v18 = vsel %vm2328_vm1, %v2370_v12, %v2372_v48  ;;  %v2399_v21 = vmax.f32 %v4232_v54, %v2370_v12 }
 0x256   :  { %v2397_v16 = vmax.f32 %v2893_v44, %v2378_v55  ;;  %v2400_v25 = vmax.f32 %v2895_v31, %v2379_v18  ;;  %v2467_v44 = vlaneseq }
 0x257   :  { %2421 = vrot.lane.b32.xlu0 %v2395_v11, %s3314_s28 }
 0x258   :  { %v2376_v15 = vpop.permute.xlu1 %2375  ;;  %v2374_v49 = vpop.permute.xlu0 %2373  ;;  %2423 = vrot.lane.b32.xlu1 %v2396_v13, %s3314_s28  ;;  %v2468_v46 = vshrl.u32 %v2467_v44, 7 }
 0x259   :  { %v2380_v52 = vsel %vm2328_vm1, %v2374_v49, %v2376_v15  ;;  %v2402_v30 = vmax.f32 %v4236_v56, %v2374_v49  ;;  %v2404_v35 = vmax.f32 %v4243_v9, %v2376_v15 }
 0x25a   :  { %v2403_v28 = vmax.f32 %v2897_v59, %v2380_v52  ;;  %v2469_v39 = vsub.s32 0, %v2468_v46 }
 0x25b   :  { %2425 = vrot.lane.b32.xlu0 %v2397_v16, %s3314_s28 }
 0x25c   :  { %v2307_v19 = vpop.permute.xlu1 %2306  ;;  %v2305_v22 = vpop.permute.xlu0 %2304  ;;  %2427 = vrot.lane.b32.xlu1 %v2398_v17, %s3314_s28  ;;  %v2470_v31 = vrot.slane %v2465_v3, %v2469_v39 }
 0x25d   :  { %v2329_v23 = vsel %vm2328_vm1, %v2305_v22, %v2307_v19 }
 0x25e   :  { %v2345_v26 = vmax.f32 %v4206_v38, %v2329_v23 }
 0x25f   :  { %2429 = vrot.lane.b32.xlu0 %v2399_v21, %s3314_s28 }
 0x260   :  { %v2311_v27 = vpop.permute.xlu1 %2310  ;;  %v2309_v29 = vpop.permute.xlu0 %2308  ;;  %2431 = vrot.lane.b32.xlu1 %v2400_v25, %s3314_s28 }
 0x261   :  { %v2330_v57 = vsel %vm2328_vm1, %v2307_v19, %v2309_v29 }
 0x262   :  { %v2346_v61 = vmax.f32 %v4208_v58, %v2330_v57 }
 0x263   :  { %2437 = vrot.lane.b32.xlu0 %v2403_v28, %s3314_s28 }
 0x264   :  { %v2315_v54 = vpop.permute.xlu1 %2314  ;;  %v2313_v33 = vpop.permute.xlu0 %2312  ;;  %2435 = vrot.lane.b32.xlu1 %v2402_v30, %s3314_s28 }
 0x265   :  { %v2331_v34 = vsel %vm2328_vm1, %v2311_v27, %v2313_v33  ;;  %v2332_v53 = vsel %vm2328_vm1, %v2313_v33, %v2315_v54 }
 0x266   :  { %v2347_v38 = vmax.f32 %v4210_v41, %v2331_v34  ;;  %v2348_v0 = vmax.f32 %v4212_v42, %v2332_v53 }
 0x268   :  { %v2319_v36 = vpop.permute.xlu1 %2318  ;;  %v2317_v7 = vpop.permute.xlu0 %2316  ;;  %2439 = vrot.lane.b32.xlu1 %v2404_v35, %s3314_s28 }
 0x269   :  { %v2333_v37 = vsel %vm2328_vm1, %v2317_v7, %v2319_v36 }
 0x26a   :  { %v2349_v56 = vmax.f32 %v4214_v20, %v2333_v37  ;;  %v2473_v20 = vsub.s32 1, %v2468_v46 }
 0x26c   :  { %v2321_v40 = vpop.permute.xlu0 %2320  ;;  %v2323_v50 = vpop.permute.xlu1 %2322  ;;  %v2474_v59 = vrot.slane %v2465_v3, %v2473_v20 }
 0x26d   :  { %v2334_v55 = vsel %vm2328_vm1, %v2319_v36, %v2321_v40 }
 0x26e   :  { %v2350_v19 = vmax.f32 %v4216_v43, %v2334_v55 }
 0x270   :  { %v2325_v14 = vpop.permute.xlu0 %2324  ;;  %v2327_v2 = vpop.permute.xlu1 %2326 }
 0x271   :  { %v4301_v1 = vsel %vm2328_vm1, %v2323_v50, %v2325_v14  ;;  %v2336_v33 = vsel %vm2328_vm1, %v2325_v14, %v2327_v2 }
 0x272   :  { %v2351_v24 = vmax.f32 %v4218_v45, %v4301_v1  ;;  %v2352_v7 = vmax.f32 %v4220_v47, %v2336_v33 }
 0x2c1   :  { %v2434_v41 = vpop.permute.xlu0 %2433 }
 0x2c5   :  { %v2418_v4 = vpop.permute.xlu0 %2417 }
 0x2c6   :  { %v2420_v5 = vpop.permute.xlu1 %2419 }
 0x2c7   :  { %v2441_v6 = vsel %vm1661_vm0, %v2418_v4, %v2420_v5 }
 0x2c8   :  { %v2457_v45 = vmax.f32 %v2345_v26, %v2441_v6 }
 0x2c9   :  { %v2422_v8 = vpop.permute.xlu0 %2421 }
 0x2ca   :  { %v2442_v9 = vsel %vm1661_vm0, %v2420_v5, %v2422_v8  ;;  %v2477_v48 = vadd.f32 %v2470_v31, %v2457_v45  ;;  %v2424_v60 = vpop.permute.xlu1 %2423 }
 0x2cb   :  { %v2458_v51 = vmax.f32 %v2346_v61, %v2442_v9 }
 0x2cc   :  { %v2485_v10 = vmax.f32 %v2477_v48, 0.0 }
 0x2cd   :  { %v2478_v62 = vadd.f32 %v2474_v59, %v2458_v51  ;;  %v2426_v32 = vpop.permute.xlu0 %2425 }
 0x2ce   :  { %v2443_v63 = vsel %vm1661_vm0, %v2424_v60, %v2426_v32  ;;  %v2428_v12 = vpop.permute.xlu1 %2427 }
 0x2cf   :  { %v2486_v58 = vmax.f32 %v2478_v62, 0.0  ;;  %v2459_v11 = vmax.f32 %v2347_v38, %v2443_v63  ;;  %v2444_v15 = vsel %vm1661_vm0, %v2426_v32, %v2428_v12 }
 0x2d0   :  { %v2460_v17 = vmax.f32 %v2348_v0, %v2444_v15 }
 0x2d1   :  { %v2805_v16 = vpack.c.bf16 %v2486_v58, %v2485_v10  ;;  %v2479_v49 = vadd.f32 %v2470_v31, %v2459_v11  ;;  %v2430_v18 = vpop.permute.xlu0 %2429 }
 0x2d2   :  { %v2480_v42 = vadd.f32 %v2474_v59, %v2460_v17  ;;  %v2432_v21 = vpop.permute.xlu1 %2431 }
 0x2d3   :  { %2520 = vst.msk [vmem:[%s4349_s3] sm:$0xff] %vm4316_vm4, %v2805_v16  ;;  %v2445_v22 = vsel %vm1661_vm0, %v2430_v18, %v2432_v21  ;;  %v2446_v52 = vsel %vm1661_vm0, %v2432_v21, %v2434_v41  ;;  %v2487_v23 = vmax.f32 %v2479_v49, 0.0 }
 0x2d4   :  { %v2488_v25 = vmax.f32 %v2480_v42, 0.0  ;;  %v2461_v26 = vmax.f32 %v2349_v56, %v2445_v22  ;;  %v2462_v27 = vmax.f32 %v2350_v19, %v2446_v52 }
 0x2d5   :  { %v2438_v43 = vpop.permute.xlu0 %2437 }
 0x2d6   :  { %v2806_v28 = vpack.c.bf16 %v2488_v25, %v2487_v23  ;;  %v2481_v29 = vadd.f32 %v2470_v31, %v2461_v26  ;;  %v2482_v30 = vadd.f32 %v2474_v59, %v2462_v27  ;;  %v2436_v54 = vpop.permute.xlu1 %2435 }
 0x2d7   :  { %v2447_v34 = vsel %vm1661_vm0, %v2436_v54, %v2438_v43 }
 0x2d8   :  { %2521 = vst.msk [vmem:[%s4349_s3 + $0x8] sm:$0xff] %vm4316_vm4, %v2806_v28  ;;  %v2489_v35 = vmax.f32 %v2481_v29, 0.0  ;;  %v2490_v38 = vmax.f32 %v2482_v30, 0.0  ;;  %v2463_v36 = vmax.f32 %v2351_v24, %v2447_v34 }
 0x2da   :  { %v2807_v37 = vpack.c.bf16 %v2490_v38, %v2489_v35  ;;  %v2440_v56 = vpop.permute.xlu1 %2439  ;;  %v2483_v50 = vadd.f32 %v2470_v31, %v2463_v36 }
 0x2db   :  { %v2448_v40 = vsel %vm1661_vm0, %v2438_v43, %v2440_v56 }
 0x2dc   :  { %2522 = vst.msk [vmem:[%s4349_s3 + $0x10] sm:$0xff] %vm4316_vm4, %v2807_v37  ;;  %v2464_v14 = vmax.f32 %v2352_v7, %v2448_v40  ;;  %v2491_v44 = vmax.f32 %v2483_v50, 0.0 }
 0x2de   :  { %v2484_v1 = vadd.f32 %v2474_v59, %v2464_v14 }
 0x2e0   :  { %v2492_v46 = vmax.f32 %v2484_v1, 0.0 }
 0x2e2   :  { %v2808_v24 = vpack.c.bf16 %v2492_v46, %v2491_v44 }
 0x2e4   :  { %2526 = vst.msk [vmem:[%s4349_s3 + $0x18] sm:$0x33] %vm2525_vm7, %v2808_v24 }

// kernel: net_forward.4
= control target key start
LH: loop header
LB: loop body
LE: loop exit
PB: predicated region body
PF: predicated region fallthrough
CT: control target
= control target key end

     0   :  { %vm2770_vm0 = vcmask 523264   ;;  %vm4870_vm1 = vmmov 0   ;;  %s4871_s23 = smov 96   ;;  %vm3548_vm2 = vcmask 785408   ;;  %vm3635_vm3 = vcmask 1043456   ;;  %s6283_s1 = inlined_call_operand.vmem [shape: bf16[1344,640], index: 1, kind: input, shape index: {}]   ;;  %s6284_s0 = inlined_call_operand.vmem [shape: bf16[10,1344], index: 0, kind: input, shape index: {}]   ;;  %s6285_s2 = inlined_call_operand.vmem [shape: f32[1,160], index: 2, kind: input, shape index: {}]   ;;  %s6286_s3 = inlined_call_operand.vmem [shape: bf16[10,160], index: 3, kind: output, shape index: {}]  }
   0x1   :  { %v4257_v0 = vld [vmem:[%s6283_s1 + $0x4] ss:$20 sps:$4 sm:$0xff]   ;;  %v4259_v1 = vld [vmem:[%s6283_s1 + $0xc] ss:$20 sps:$4 sm:$0xff]   ;;  %v4262_v3 = vld [vmem:[%s6283_s1 + $0x8] ss:$20 sps:$4 sm:$0xff]  }
   0x2   :  { %2774 = vmatprep.subr.bf16.mxu0 %v4257_v0  ;;  %v4261_v2 = vld [vmem:[%s6283_s1] ss:$20 sps:$4 sm:$0xff]   ;;  %3032 = vmatprep.subr.bf16.mxu1 %v4259_v1  ;;  %v4267_v6 = vld [vmem:[%s6283_s1 + $0x28] ss:$20 sps:$4 sm:$0xff]   ;;  %v4268_v7 = vld [vmem:[%s6283_s1 + $0x30] ss:$20 sps:$4 sm:$0xff]  }
   0x3   :  { %v4263_v4 = vld [vmem:[%s6283_s1 + $0x2c] ss:$20 sps:$4 sm:$0xff]   ;;  %2775 = vmatpush1.bf16.msra.mxu0 %v4261_v2  ;;  %3033 = vmatpush1.bf16.msra.mxu1 %v4262_v3  ;;  %v4265_v5 = vld [vmem:[%s6283_s1 + $0x34] ss:$20 sps:$4 sm:$0xff]   ;;  %v4271_v9 = vld [vmem:[%s6283_s1 + $0x5c] ss:$20 sps:$4 sm:$0xff]  }
   0x4   :  { %2776 = vmatprep.subr.bf16.mxu0 %v4263_v4  ;;  %3034 = vmatprep.subr.bf16.mxu1 %v4265_v5  ;;  %v4269_v8 = vld [vmem:[%s6283_s1 + $0x54] ss:$20 sps:$4 sm:$0xff]   ;;  %v4273_v10 = vld [vmem:[%s6283_s1 + $0x50] ss:$20 sps:$4 sm:$0xff]   ;;  %v4274_v11 = vld [vmem:[%s6283_s1 + $0x58] ss:$20 sps:$4 sm:$0xff]  }
   0x5   :  { %v4275_v12 = vld [vmem:[%s6283_s1 + $0x7c] ss:$20 sps:$4 sm:$0xff]   ;;  %v4277_v13 = vld [vmem:[%s6283_s1 + $0x84] ss:$20 sps:$4 sm:$0xff]   ;;  %v4280_v15 = vld [vmem:[%s6283_s1 + $0x80] ss:$20 sps:$4 sm:$0xff]  }
   0x6   :  { %v4279_v14 = vld [vmem:[%s6283_s1 + $0x78] ss:$20 sps:$4 sm:$0xff]   ;;  %v4285_v18 = vld [vmem:[%s6283_s1 + $0xa0] ss:$20 sps:$4 sm:$0xff]   ;;  %v4286_v19 = vld [vmem:[%s6283_s1 + $0xa8] ss:$20 sps:$4 sm:$0xff]  }
   0x7   :  { %2777 = vmatpush1.bf16.msra.mxu0 %v4267_v6  ;;  %3035 = vmatpush1.bf16.msra.mxu1 %v4268_v7  ;;  %v4281_v16 = vld [vmem:[%s6283_s1 + $0xa4] ss:$20 sps:$4 sm:$0xff]   ;;  %v4283_v17 = vld [vmem:[%s6283_s1 + $0xac] ss:$20 sps:$4 sm:$0xff]   ;;  %v4289_v21 = vld [vmem:[%s6283_s1 + $0xd4] ss:$20 sps:$4 sm:$0xff]  }
   0x8   :  { %2778 = vmatprep.subr.bf16.mxu0 %v4269_v8  ;;  %3036 = vmatprep.subr.bf16.mxu1 %v4271_v9  ;;  %v4287_v20 = vld [vmem:[%s6283_s1 + $0xcc] ss:$20 sps:$4 sm:$0xff]   ;;  %v4291_v22 = vld [vmem:[%s6283_s1 + $0xc8] ss:$20 sps:$4 sm:$0xff]   ;;  %v4292_v23 = vld [vmem:[%s6283_s1 + $0xd0] ss:$20 sps:$4 sm:$0xff]  }
   0x9   :  { %v4293_v24 = vld [vmem:[%s6283_s1 + $0xf4] ss:$20 sps:$4 sm:$0xff]   ;;  %v4295_v25 = vld [vmem:[%s6283_s1 + $0xfc] ss:$20 sps:$4 sm:$0xff]   ;;  %v4298_v27 = vld [vmem:[%s6283_s1 + $0xf8] ss:$20 sps:$4 sm:$0xff]  }
   0xa   :  { %v4297_v26 = vld [vmem:[%s6283_s1 + $0xf0] ss:$20 sps:$4 sm:$0xff]   ;;  %v4303_v30 = vld [vmem:[%s6283_s1 + $0x118] ss:$20 sps:$4 sm:$0xff]   ;;  %v4304_v31 = vld [vmem:[%s6283_s1 + $0x120] ss:$20 sps:$4 sm:$0xff]  }
   0xb   :  { %2779 = vmatpush1.bf16.msra.mxu0 %v4273_v10  ;;  %3037 = vmatpush1.bf16.msra.mxu1 %v4274_v11  ;;  %v4299_v28 = vld [vmem:[%s6283_s1 + $0x11c] ss:$20 sps:$4 sm:$0xff]   ;;  %v4301_v29 = vld [vmem:[%s6283_s1 + $0x124] ss:$20 sps:$4 sm:$0xff]   ;;  %v4307_v33 = vld [vmem:[%s6283_s1 + $0x14c] ss:$20 sps:$4 sm:$0xff]  }
   0xc   :  { %2780 = vmatprep.subr.bf16.mxu0 %v4275_v12  ;;  %3038 = vmatprep.subr.bf16.mxu1 %v4277_v13  ;;  %v4305_v32 = vld [vmem:[%s6283_s1 + $0x144] ss:$20 sps:$4 sm:$0xff]   ;;  %v4309_v34 = vld [vmem:[%s6283_s1 + $0x140] ss:$20 sps:$4 sm:$0xff]   ;;  %v4310_v35 = vld [vmem:[%s6283_s1 + $0x148] ss:$20 sps:$4 sm:$0xff]  }
   0xd   :  { %v4311_v36 = vld [vmem:[%s6283_s1 + $0x16c] ss:$20 sps:$4 sm:$0xff]   ;;  %v4313_v37 = vld [vmem:[%s6283_s1 + $0x174] ss:$20 sps:$4 sm:$0xff]   ;;  %v4316_v39 = vld [vmem:[%s6283_s1 + $0x170] ss:$20 sps:$4 sm:$0xff]  }
   0xe   :  { %v4315_v38 = vld [vmem:[%s6283_s1 + $0x168] ss:$20 sps:$4 sm:$0xff]   ;;  %v4321_v42 = vld [vmem:[%s6283_s1 + $0x190] ss:$20 sps:$4 sm:$0xff]   ;;  %v4322_v43 = vld [vmem:[%s6283_s1 + $0x198] ss:$20 sps:$4 sm:$0xff]  }
   0xf   :  { %2781 = vmatpush1.bf16.msra.mxu0 %v4279_v14  ;;  %3039 = vmatpush1.bf16.msra.mxu1 %v4280_v15  ;;  %v4317_v40 = vld [vmem:[%s6283_s1 + $0x194] ss:$20 sps:$4 sm:$0xff]   ;;  %v4319_v41 = vld [vmem:[%s6283_s1 + $0x19c] ss:$20 sps:$4 sm:$0xff]   ;;  %v4325_v45 = vld [vmem:[%s6283_s1 + $0x1c4] ss:$20 sps:$4 sm:$0xff]  }
  0x10   :  { %2782 = vmatprep.subr.bf16.mxu0 %v4281_v16  ;;  %3040 = vmatprep.subr.bf16.mxu1 %v4283_v17  ;;  %v4323_v44 = vld [vmem:[%s6283_s1 + $0x1bc] ss:$20 sps:$4 sm:$0xff]   ;;  %v4327_v46 = vld [vmem:[%s6283_s1 + $0x1b8] ss:$20 sps:$4 sm:$0xff]   ;;  %v4328_v48 = vld [vmem:[%s6283_s1 + $0x1c0] ss:$20 sps:$4 sm:$0xff]  }
  0x11   :  { %v4353_v47 = vld [vmem:[%s6284_s0 + $0x4] ss:$44 sps:$4 sm:$0x1f]   ;;  %v4331_v50 = vld [vmem:[%s6283_s1 + $0x1ec] ss:$20 sps:$4 sm:$0xff]   ;;  %vm3636_vm4 = vcmask 261124  }
  0x12   :  { %v4329_v49 = vld [vmem:[%s6283_s1 + $0x1e4] ss:$20 sps:$4 sm:$0xff]   ;;  %2806 = vmatprep.mubr.bf16.mxu0 %v4353_v47  ;;  %3064 = vmatprep.mubr.bf16.mxu1 %v4353_v47  ;;  %v4333_v51 = vld [vmem:[%s6283_s1 + $0x1e0] ss:$20 sps:$4 sm:$0xff]   ;;  %v4334_v52 = vld [vmem:[%s6283_s1 + $0x1e8] ss:$20 sps:$4 sm:$0xff]  }
  0x13   :  { %2783 = vmatpush1.bf16.msra.mxu0 %v4285_v18  ;;  %3041 = vmatpush1.bf16.msra.mxu1 %v4286_v19  ;;  %v4335_v53 = vld [vmem:[%s6283_s1 + $0x20c] ss:$20 sps:$4 sm:$0xff]   ;;  %v4337_v54 = vld [vmem:[%s6283_s1 + $0x214] ss:$20 sps:$4 sm:$0xff]   ;;  %v4340_v56 = vld [vmem:[%s6283_s1 + $0x210] ss:$20 sps:$4 sm:$0xff]  }
  0x14   :  { %2784 = vmatprep.subr.bf16.mxu0 %v4287_v20  ;;  %3042 = vmatprep.subr.bf16.mxu1 %v4289_v21  ;;  %v4339_v55 = vld [vmem:[%s6283_s1 + $0x208] ss:$20 sps:$4 sm:$0xff]   ;;  %v4345_v59 = vld [vmem:[%s6283_s1 + $0x230] ss:$20 sps:$4 sm:$0xff]   ;;  %v4346_v60 = vld [vmem:[%s6283_s1 + $0x238] ss:$20 sps:$4 sm:$0xff]  }
  0x15   :  { %v4341_v57 = vld [vmem:[%s6283_s1 + $0x234] ss:$20 sps:$4 sm:$0xff]   ;;  %v4343_v58 = vld [vmem:[%s6283_s1 + $0x23c] ss:$20 sps:$4 sm:$0xff]   ;;  %v4349_v62 = vld [vmem:[%s6283_s1 + $0x264] ss:$20 sps:$4 sm:$0xff]  }
  0x16   :  { %v4347_v61 = vld [vmem:[%s6283_s1 + $0x25c] ss:$20 sps:$4 sm:$0xff]   ;;  %v4351_v63 = vld [vmem:[%s6283_s1 + $0x258] ss:$20 sps:$4 sm:$0xff]   ;;  %v4352_v0 = vld [vmem:[%s6283_s1 + $0x260] ss:$20 sps:$4 sm:$0xff]  }
  0x17   :  { %2785 = vmatpush1.bf16.msra.mxu0 %v4291_v22  ;;  %3043 = vmatpush1.bf16.msra.mxu1 %v4292_v23  ;;  %v4357_v1 = vld [vmem:[%s6283_s1 + $0x284] ss:$20 sps:$4 sm:$0xff]   ;;  %v4360_v2 = vld [vmem:[%s6283_s1 + $0x28c] ss:$20 sps:$4 sm:$0xff]   ;;  %v4358_v4 = vld [vmem:[%s6283_s1 + $0x288] ss:$20 sps:$4 sm:$0xff]  }
  0x18   :  { %2786 = vmatprep.subr.bf16.mxu0 %v4293_v24  ;;  %3044 = vmatprep.subr.bf16.mxu1 %v4295_v25  ;;  %v4355_v3 = vld [vmem:[%s6283_s1 + $0x280] ss:$20 sps:$4 sm:$0xff]   ;;  %v4362_v8 = vld [vmem:[%s6283_s1 + $0x2a8] ss:$20 sps:$4 sm:$0xff]   ;;  %v4365_v9 = vld [vmem:[%s6283_s1 + $0x2b0] ss:$20 sps:$4 sm:$0xff]  }
  0x19   :  { %v4361_v5 = vld [vmem:[%s6284_s0] ss:$44 sps:$4 sm:$0x1f]   ;;  %v4367_v7 = vld [vmem:[%s6283_s1 + $0x2b4] ss:$20 sps:$4 sm:$0xff]   ;;  %vm3637_vm5 = vmor %vm3636_vm4, %vm3635_vm3  ;;  %vm3639_vm6 = vcmask 1040384  }
  0x1a   :  { %v4364_v6 = vld [vmem:[%s6283_s1 + $0x2ac] ss:$20 sps:$4 sm:$0xff]   ;;  %v4370_v10 = vld [vmem:[%s6283_s1 + $0x2d4] ss:$20 sps:$4 sm:$0xff]   ;;  %v4373_v11 = vld [vmem:[%s6283_s1 + $0x2dc] ss:$20 sps:$4 sm:$0xff]  }
  0x1b   :  { %2787 = vmatpush1.bf16.msra.mxu0 %v4297_v26  ;;  %3045 = vmatpush1.bf16.msra.mxu1 %v4298_v27  ;;  %v4368_v12 = vld [vmem:[%s6283_s1 + $0x2d0] ss:$20 sps:$4 sm:$0xff]   ;;  %v4371_v13 = vld [vmem:[%s6283_s1 + $0x2d8] ss:$20 sps:$4 sm:$0xff]   ;;  %v4377_v17 = vld [vmem:[%s6283_s1 + $0x300] ss:$20 sps:$4 sm:$0xff]  }
  0x1c   :  { %2788 = vmatprep.subr.bf16.mxu0 %v4299_v28  ;;  %3046 = vmatprep.subr.bf16.mxu1 %v4301_v29  ;;  %v4376_v14 = vld [vmem:[%s6283_s1 + $0x2fc] ss:$20 sps:$4 sm:$0xff]   ;;  %v4379_v15 = vld [vmem:[%s6283_s1 + $0x304] ss:$20 sps:$4 sm:$0xff]   ;;  %v4385_v19 = vld [vmem:[%s6283_s1 + $0x32c] ss:$20 sps:$4 sm:$0xff]  }
  0x1d   :  { %v4374_v16 = vld [vmem:[%s6283_s1 + $0x2f8] ss:$20 sps:$4 sm:$0xff]   ;;  %v4380_v20 = vld [vmem:[%s6283_s1 + $0x320] ss:$20 sps:$4 sm:$0xff]   ;;  %v4383_v21 = vld [vmem:[%s6283_s1 + $0x328] ss:$20 sps:$4 sm:$0xff]  }
  0x1e   :  { %v4382_v18 = vld [vmem:[%s6283_s1 + $0x324] ss:$20 sps:$4 sm:$0xff]   ;;  %v4388_v22 = vld [vmem:[%s6283_s1 + $0x34c] ss:$20 sps:$4 sm:$0xff]   ;;  %v4391_v23 = vld [vmem:[%s6283_s1 + $0x354] ss:$20 sps:$4 sm:$0xff]  }
  0x1f   :  { %2789 = vmatpush1.bf16.msra.mxu0 %v4303_v30  ;;  %3047 = vmatpush1.bf16.msra.mxu1 %v4304_v31  ;;  %v4386_v24 = vld [vmem:[%s6283_s1 + $0x348] ss:$20 sps:$4 sm:$0xff]   ;;  %v4389_v25 = vld [vmem:[%s6283_s1 + $0x350] ss:$20 sps:$4 sm:$0xff]   ;;  %v4395_v29 = vld [vmem:[%s6283_s1 + $0x378] ss:$20 sps:$4 sm:$0xff]  }
  0x20   :  { %2790 = vmatprep.subr.bf16.mxu0 %v4305_v32  ;;  %3048 = vmatprep.subr.bf16.mxu1 %v4307_v33  ;;  %v4394_v26 = vld [vmem:[%s6283_s1 + $0x374] ss:$20 sps:$4 sm:$0xff]   ;;  %v4397_v27 = vld [vmem:[%s6283_s1 + $0x37c] ss:$20 sps:$4 sm:$0xff]   ;;  %v4403_v32 = vld [vmem:[%s6283_s1 + $0x3a4] ss:$20 sps:$4 sm:$0xff]  }
  0x21   :  { %v4392_v28 = vld [vmem:[%s6283_s1 + $0x370] ss:$20 sps:$4 sm:$0xff]   ;;  %v4454_v31 = vld [vmem:[%s6284_s0 + $0xc] ss:$44 sps:$4 sm:$0x1f]   ;;  %vm3640_vm7 = vcmask 258052  }
  0x22   :  { %v4400_v30 = vld [vmem:[%s6283_s1 + $0x39c] ss:$20 sps:$4 sm:$0xff]   ;;  %v4398_v33 = vld [vmem:[%s6283_s1 + $0x398] ss:$20 sps:$4 sm:$0xff]   ;;  %vm3641_vm8 = vmor %vm3640_vm7, %vm3639_vm6 }
  0x23   :  { %2791 = vmatpush1.bf16.msra.mxu0 %v4309_v34  ;;  %3049 = vmatpush1.bf16.msra.mxu1 %v4310_v35  ;;  %v4401_v34 = vld [vmem:[%s6283_s1 + $0x3a0] ss:$20 sps:$4 sm:$0xff]   ;;  %v4406_v35 = vld [vmem:[%s6283_s1 + $0x3c4] ss:$20 sps:$4 sm:$0xff]   ;;  %v4424_v47 = vld [vmem:[%s6283_s1 + $0x43c] ss:$20 sps:$4 sm:$0xff]  }
  0x24   :  { %2792 = vmatprep.subr.bf16.mxu0 %v4311_v36  ;;  %3050 = vmatprep.subr.bf16.mxu1 %v4313_v37  ;;  %v4409_v36 = vld [vmem:[%s6283_s1 + $0x3cc] ss:$20 sps:$4 sm:$0xff]  }
  0x25   :  { %v4404_v37 = vld [vmem:[%s6283_s1 + $0x3c0] ss:$20 sps:$4 sm:$0xff]  }
  0x27   :  { %2793 = vmatpush1.bf16.msra.mxu0 %v4315_v38  ;;  %3051 = vmatpush1.bf16.msra.mxu1 %v4316_v39  ;;  %v4407_v38 = vld [vmem:[%s6283_s1 + $0x3c8] ss:$20 sps:$4 sm:$0xff]   ;;  %v4412_v39 = vld [vmem:[%s6283_s1 + $0x3ec] ss:$20 sps:$4 sm:$0xff]  }
  0x28   :  { %2794 = vmatprep.subr.bf16.mxu0 %v4317_v40  ;;  %3052 = vmatprep.subr.bf16.mxu1 %v4319_v41  ;;  %v4415_v40 = vld [vmem:[%s6283_s1 + $0x3f4] ss:$20 sps:$4 sm:$0xff]  }
  0x29   :  { %v4410_v41 = vld [vmem:[%s6283_s1 + $0x3e8] ss:$20 sps:$4 sm:$0xff]  }
  0x2b   :  { %2795 = vmatpush1.bf16.msra.mxu0 %v4321_v42  ;;  %3053 = vmatpush1.bf16.msra.mxu1 %v4322_v43  ;;  %v4413_v42 = vld [vmem:[%s6283_s1 + $0x3f0] ss:$20 sps:$4 sm:$0xff]   ;;  %v4418_v43 = vld [vmem:[%s6283_s1 + $0x414] ss:$20 sps:$4 sm:$0xff]  }
  0x2c   :  { %2796 = vmatprep.subr.bf16.mxu0 %v4323_v44  ;;  %3054 = vmatprep.subr.bf16.mxu1 %v4325_v45  ;;  %v4421_v44 = vld [vmem:[%s6283_s1 + $0x41c] ss:$20 sps:$4 sm:$0xff]  }
  0x2d   :  { %v4416_v45 = vld [vmem:[%s6283_s1 + $0x410] ss:$20 sps:$4 sm:$0xff]  }
  0x2f   :  { %2797 = vmatpush1.bf16.msra.mxu0 %v4327_v46  ;;  %3055 = vmatpush1.bf16.msra.mxu1 %v4328_v48  ;;  %v4419_v46 = vld [vmem:[%s6283_s1 + $0x418] ss:$20 sps:$4 sm:$0xff]  }
  0x30   :  { %2798 = vmatprep.subr.bf16.mxu0 %v4329_v49  ;;  %3056 = vmatprep.subr.bf16.mxu1 %v4331_v50  ;;  %v4427_v48 = vld [vmem:[%s6283_s1 + $0x444] ss:$20 sps:$4 sm:$0xff]   ;;  %v4425_v50 = vld [vmem:[%s6283_s1 + $0x440] ss:$20 sps:$4 sm:$0xff]  }
  0x31   :  { %v4422_v49 = vld [vmem:[%s6283_s1 + $0x438] ss:$20 sps:$4 sm:$0xff]  }
  0x33   :  { %2799 = vmatpush1.bf16.msra.mxu0 %v4333_v51  ;;  %3057 = vmatpush1.bf16.msra.mxu1 %v4334_v52  ;;  %v4430_v51 = vld [vmem:[%s6283_s1 + $0x464] ss:$20 sps:$4 sm:$0xff]   ;;  %v4433_v52 = vld [vmem:[%s6283_s1 + $0x46c] ss:$20 sps:$4 sm:$0xff]  }
  0x34   :  { %2800 = vmatprep.subr.bf16.mxu0 %v4335_v53  ;;  %3058 = vmatprep.subr.bf16.mxu1 %v4337_v54  ;;  %v4428_v53 = vld [vmem:[%s6283_s1 + $0x460] ss:$20 sps:$4 sm:$0xff]   ;;  %v4431_v54 = vld [vmem:[%s6283_s1 + $0x468] ss:$20 sps:$4 sm:$0xff]  }
  0x37   :  { %2801 = vmatpush1.bf16.msra.mxu0 %v4339_v55  ;;  %3059 = vmatpush1.bf16.msra.mxu1 %v4340_v56  ;;  %v4436_v55 = vld [vmem:[%s6283_s1 + $0x48c] ss:$20 sps:$4 sm:$0xff]   ;;  %v4439_v56 = vld [vmem:[%s6283_s1 + $0x494] ss:$20 sps:$4 sm:$0xff]  }
  0x38   :  { %2802 = vmatprep.subr.bf16.mxu0 %v4341_v57  ;;  %3060 = vmatprep.subr.bf16.mxu1 %v4343_v58  ;;  %v4434_v57 = vld [vmem:[%s6283_s1 + $0x488] ss:$20 sps:$4 sm:$0xff]   ;;  %v4437_v58 = vld [vmem:[%s6283_s1 + $0x490] ss:$20 sps:$4 sm:$0xff]  }
  0x3b   :  { %2803 = vmatpush1.bf16.msra.mxu0 %v4345_v59  ;;  %3061 = vmatpush1.bf16.msra.mxu1 %v4346_v60  ;;  %v4442_v59 = vld [vmem:[%s6283_s1 + $0x4b4] ss:$20 sps:$4 sm:$0xff]   ;;  %v4445_v60 = vld [vmem:[%s6283_s1 + $0x4bc] ss:$20 sps:$4 sm:$0xff]  }
  0x3c   :  { %2804 = vmatprep.subr.bf16.mxu0 %v4347_v61  ;;  %3062 = vmatprep.subr.bf16.mxu1 %v4349_v62  ;;  %v4440_v61 = vld [vmem:[%s6283_s1 + $0x4b0] ss:$20 sps:$4 sm:$0xff]   ;;  %v4443_v62 = vld [vmem:[%s6283_s1 + $0x4b8] ss:$20 sps:$4 sm:$0xff]  }
  0x3f   :  { %2805 = vmatpush1.bf16.msra.mxu0 %v4351_v63  ;;  %3063 = vmatpush1.bf16.msra.mxu1 %v4352_v0  ;;  %v4448_v63 = vld [vmem:[%s6283_s1 + $0x4dc] ss:$20 sps:$4 sm:$0xff]   ;;  %v4451_v0 = vld [vmem:[%s6283_s1 + $0x4e4] ss:$20 sps:$4 sm:$0xff]  }
  0x40   :  { %2817 = vmatprep.subr.bf16.mxu0 %v4357_v1  ;;  %3075 = vmatprep.subr.bf16.mxu1 %v4360_v2  ;;  %v4446_v1 = vld [vmem:[%s6283_s1 + $0x4d8] ss:$20 sps:$4 sm:$0xff]   ;;  %v4449_v2 = vld [vmem:[%s6283_s1 + $0x4e0] ss:$20 sps:$4 sm:$0xff]  }
  0x42   :  { %2807 = vmatmul.mubr.bf16.vlgmr.msra.gmra.mrb[0].mxu0 %v4361_v5  ;;  %3065 = vmatmul.mubr.bf16.vlgmr.msra.gmra.mrb[0].mxu1 %v4361_v5  ;;  %v4452_v5 = vld [vmem:[%s6284_s0 + $0x8] ss:$44 sps:$4 sm:$0x1f]  }
  0x43   :  { %2818 = vmatpush1.bf16.msra.mxu0 %v4355_v3  ;;  %3076 = vmatpush1.bf16.msra.mxu1 %v4358_v4  ;;  %v4457_v3 = vld [vmem:[%s6283_s1 + $0x504] ss:$20 sps:$4 sm:$0xff]   ;;  %v4460_v4 = vld [vmem:[%s6283_s1 + $0x50c] ss:$20 sps:$4 sm:$0xff]  }
  0x44   :  { %2819 = vmatprep.subr.bf16.mxu0 %v4364_v6  ;;  %3077 = vmatprep.subr.bf16.mxu1 %v4367_v7  ;;  %v4455_v6 = vld [vmem:[%s6283_s1 + $0x500] ss:$20 sps:$4 sm:$0xff]   ;;  %v4458_v7 = vld [vmem:[%s6283_s1 + $0x508] ss:$20 sps:$4 sm:$0xff]  }
  0x45   :  { %2849 = vmatprep.mubr.bf16.mxu0 %v4454_v31  ;;  %3107 = vmatprep.mubr.bf16.mxu1 %v4454_v31  ;;  %v4491_v31 = vld [vmem:[%s6283_s1 + $0x5f0] ss:$20 sps:$4 sm:$0xff]  }
  0x47   :  { %2820 = vmatpush1.bf16.msra.mxu0 %v4362_v8  ;;  %3078 = vmatpush1.bf16.msra.mxu1 %v4365_v9  ;;  %v4463_v8 = vld [vmem:[%s6283_s1 + $0x52c] ss:$20 sps:$4 sm:$0xff]   ;;  %v4466_v9 = vld [vmem:[%s6283_s1 + $0x534] ss:$20 sps:$4 sm:$0xff]  }
  0x48   :  { %2821 = vmatprep.subr.bf16.mxu0 %v4370_v10  ;;  %3079 = vmatprep.subr.bf16.mxu1 %v4373_v11  ;;  %v4461_v10 = vld [vmem:[%s6283_s1 + $0x528] ss:$20 sps:$4 sm:$0xff]   ;;  %v4464_v11 = vld [vmem:[%s6283_s1 + $0x530] ss:$20 sps:$4 sm:$0xff]  }
  0x4b   :  { %2822 = vmatpush1.bf16.msra.mxu0 %v4368_v12  ;;  %3080 = vmatpush1.bf16.msra.mxu1 %v4371_v13  ;;  %v4469_v12 = vld [vmem:[%s6283_s1 + $0x554] ss:$20 sps:$4 sm:$0xff]  }
  0x4c   :  { %2823 = vmatprep.subr.bf16.mxu0 %v4376_v14  ;;  %3081 = vmatprep.subr.bf16.mxu1 %v4379_v15  ;;  %v4553_v13 = vld [vmem:[%s6284_s0 + $0x14] ss:$44 sps:$4 sm:$0x1f]   ;;  %v4472_v14 = vld [vmem:[%s6283_s1 + $0x55c] ss:$20 sps:$4 sm:$0xff]  }
  0x4d   :  { %v4467_v15 = vld [vmem:[%s6283_s1 + $0x550] ss:$20 sps:$4 sm:$0xff]  }
  0x4f   :  { %2824 = vmatpush1.bf16.msra.mxu0 %v4374_v16  ;;  %3082 = vmatpush1.bf16.msra.mxu1 %v4377_v17  ;;  %v4470_v16 = vld [vmem:[%s6283_s1 + $0x558] ss:$20 sps:$4 sm:$0xff]   ;;  %v4475_v17 = vld [vmem:[%s6283_s1 + $0x57c] ss:$20 sps:$4 sm:$0xff]  }
  0x50   :  { %2825 = vmatprep.subr.bf16.mxu0 %v4382_v18  ;;  %3083 = vmatprep.subr.bf16.mxu1 %v4385_v19  ;;  %v4478_v18 = vld [vmem:[%s6283_s1 + $0x584] ss:$20 sps:$4 sm:$0xff]  }
  0x51   :  { %v4473_v19 = vld [vmem:[%s6283_s1 + $0x578] ss:$20 sps:$4 sm:$0xff]  }
  0x53   :  { %2826 = vmatpush1.bf16.msra.mxu0 %v4380_v20  ;;  %3084 = vmatpush1.bf16.msra.mxu1 %v4383_v21  ;;  %v4476_v20 = vld [vmem:[%s6283_s1 + $0x580] ss:$20 sps:$4 sm:$0xff]   ;;  %v4481_v21 = vld [vmem:[%s6283_s1 + $0x5a4] ss:$20 sps:$4 sm:$0xff]  }
  0x54   :  { %2827 = vmatprep.subr.bf16.mxu0 %v4388_v22  ;;  %3085 = vmatprep.subr.bf16.mxu1 %v4391_v23  ;;  %v4484_v22 = vld [vmem:[%s6283_s1 + $0x5ac] ss:$20 sps:$4 sm:$0xff]  }
  0x55   :  { %v4479_v23 = vld [vmem:[%s6283_s1 + $0x5a0] ss:$20 sps:$4 sm:$0xff]  }
  0x57   :  { %2828 = vmatpush1.bf16.msra.mxu0 %v4386_v24  ;;  %3086 = vmatpush1.bf16.msra.mxu1 %v4389_v25  ;;  %v4482_v24 = vld [vmem:[%s6283_s1 + $0x5a8] ss:$20 sps:$4 sm:$0xff]   ;;  %v4487_v25 = vld [vmem:[%s6283_s1 + $0x5cc] ss:$20 sps:$4 sm:$0xff]  }
  0x58   :  { %2829 = vmatprep.subr.bf16.mxu0 %v4394_v26  ;;  %3087 = vmatprep.subr.bf16.mxu1 %v4397_v27  ;;  %v4490_v26 = vld [vmem:[%s6283_s1 + $0x5d4] ss:$20 sps:$4 sm:$0xff]  }
  0x59   :  { %v4485_v27 = vld [vmem:[%s6283_s1 + $0x5c8] ss:$20 sps:$4 sm:$0xff]  }
  0x5b   :  { %2830 = vmatpush1.bf16.msra.mxu0 %v4392_v28  ;;  %3088 = vmatpush1.bf16.msra.mxu1 %v4395_v29  ;;  %v4488_v28 = vld [vmem:[%s6283_s1 + $0x5d0] ss:$20 sps:$4 sm:$0xff]   ;;  %v4493_v29 = vld [vmem:[%s6283_s1 + $0x5f4] ss:$20 sps:$4 sm:$0xff]  }
  0x5c   :  { %2831 = vmatprep.subr.bf16.mxu0 %v4400_v30  ;;  %3089 = vmatprep.subr.bf16.mxu1 %v4403_v32  ;;  %v4496_v30 = vld [vmem:[%s6283_s1 + $0x5fc] ss:$20 sps:$4 sm:$0xff]   ;;  %v4494_v32 = vld [vmem:[%s6283_s1 + $0x5f8] ss:$20 sps:$4 sm:$0xff]  }
  0x5f   :  { %2832 = vmatpush1.bf16.msra.mxu0 %v4398_v33  ;;  %3090 = vmatpush1.bf16.msra.mxu1 %v4401_v34  ;;  %v4499_v33 = vld [vmem:[%s6283_s1 + $0x61c] ss:$20 sps:$4 sm:$0xff]   ;;  %v4502_v34 = vld [vmem:[%s6283_s1 + $0x624] ss:$20 sps:$4 sm:$0xff]  }
  0x60   :  { %2833 = vmatprep.subr.bf16.mxu0 %v4406_v35  ;;  %3091 = vmatprep.subr.bf16.mxu1 %v4409_v36  ;;  %v4497_v35 = vld [vmem:[%s6283_s1 + $0x618] ss:$20 sps:$4 sm:$0xff]   ;;  %v4500_v36 = vld [vmem:[%s6283_s1 + $0x620] ss:$20 sps:$4 sm:$0xff]  }
  0x63   :  { %2834 = vmatpush1.bf16.msra.mxu0 %v4404_v37  ;;  %3092 = vmatpush1.bf16.msra.mxu1 %v4407_v38  ;;  %v4505_v37 = vld [vmem:[%s6283_s1 + $0x644] ss:$20 sps:$4 sm:$0xff]   ;;  %v4508_v38 = vld [vmem:[%s6283_s1 + $0x64c] ss:$20 sps:$4 sm:$0xff]  }
  0x64   :  { %2835 = vmatprep.subr.bf16.mxu0 %v4412_v39  ;;  %3093 = vmatprep.subr.bf16.mxu1 %v4415_v40  ;;  %v4503_v39 = vld [vmem:[%s6283_s1 + $0x640] ss:$20 sps:$4 sm:$0xff]   ;;  %v4506_v40 = vld [vmem:[%s6283_s1 + $0x648] ss:$20 sps:$4 sm:$0xff]  }
  0x67   :  { %2836 = vmatpush1.bf16.msra.mxu0 %v4410_v41  ;;  %3094 = vmatpush1.bf16.msra.mxu1 %v4413_v42  ;;  %v4511_v41 = vld [vmem:[%s6283_s1 + $0x66c] ss:$20 sps:$4 sm:$0xff]   ;;  %v4514_v42 = vld [vmem:[%s6283_s1 + $0x674] ss:$20 sps:$4 sm:$0xff]  }
  0x68   :  { %2837 = vmatprep.subr.bf16.mxu0 %v4418_v43  ;;  %3095 = vmatprep.subr.bf16.mxu1 %v4421_v44  ;;  %v4509_v43 = vld [vmem:[%s6283_s1 + $0x668] ss:$20 sps:$4 sm:$0xff]   ;;  %v4512_v44 = vld [vmem:[%s6283_s1 + $0x670] ss:$20 sps:$4 sm:$0xff]  }
  0x6b   :  { %2838 = vmatpush1.bf16.msra.mxu0 %v4416_v45  ;;  %3096 = vmatpush1.bf16.msra.mxu1 %v4419_v46  ;;  %v4517_v45 = vld [vmem:[%s6283_s1 + $0x694] ss:$20 sps:$4 sm:$0xff]   ;;  %v4520_v46 = vld [vmem:[%s6283_s1 + $0x69c] ss:$20 sps:$4 sm:$0xff]  }
  0x6c   :  { %2839 = vmatprep.subr.bf16.mxu0 %v4424_v47  ;;  %3097 = vmatprep.subr.bf16.mxu1 %v4427_v48  ;;  %v4515_v47 = vld [vmem:[%s6283_s1 + $0x690] ss:$20 sps:$4 sm:$0xff]   ;;  %v4518_v48 = vld [vmem:[%s6283_s1 + $0x698] ss:$20 sps:$4 sm:$0xff]  }
  0x6f   :  { %2840 = vmatpush1.bf16.msra.mxu0 %v4422_v49  ;;  %3098 = vmatpush1.bf16.msra.mxu1 %v4425_v50  ;;  %v4523_v49 = vld [vmem:[%s6283_s1 + $0x6bc] ss:$20 sps:$4 sm:$0xff]   ;;  %v4526_v50 = vld [vmem:[%s6283_s1 + $0x6c4] ss:$20 sps:$4 sm:$0xff]  }
  0x70   :  { %2841 = vmatprep.subr.bf16.mxu0 %v4430_v51  ;;  %3099 = vmatprep.subr.bf16.mxu1 %v4433_v52  ;;  %v4521_v51 = vld [vmem:[%s6283_s1 + $0x6b8] ss:$20 sps:$4 sm:$0xff]   ;;  %v4524_v52 = vld [vmem:[%s6283_s1 + $0x6c0] ss:$20 sps:$4 sm:$0xff]  }
  0x73   :  { %2842 = vmatpush1.bf16.msra.mxu0 %v4428_v53  ;;  %3100 = vmatpush1.bf16.msra.mxu1 %v4431_v54  ;;  %v4529_v53 = vld [vmem:[%s6283_s1 + $0x6e4] ss:$20 sps:$4 sm:$0xff]   ;;  %v4532_v54 = vld [vmem:[%s6283_s1 + $0x6ec] ss:$20 sps:$4 sm:$0xff]  }
  0x74   :  { %2843 = vmatprep.subr.bf16.mxu0 %v4436_v55  ;;  %3101 = vmatprep.subr.bf16.mxu1 %v4439_v56  ;;  %v4527_v55 = vld [vmem:[%s6283_s1 + $0x6e0] ss:$20 sps:$4 sm:$0xff]   ;;  %v4530_v56 = vld [vmem:[%s6283_s1 + $0x6e8] ss:$20 sps:$4 sm:$0xff]  }
  0x77   :  { %2844 = vmatpush1.bf16.msra.mxu0 %v4434_v57  ;;  %3102 = vmatpush1.bf16.msra.mxu1 %v4437_v58  ;;  %v4535_v57 = vld [vmem:[%s6283_s1 + $0x70c] ss:$20 sps:$4 sm:$0xff]   ;;  %v4538_v58 = vld [vmem:[%s6283_s1 + $0x714] ss:$20 sps:$4 sm:$0xff]  }
  0x78   :  { %2845 = vmatprep.subr.bf16.mxu0 %v4442_v59  ;;  %3103 = vmatprep.subr.bf16.mxu1 %v4445_v60  ;;  %v4533_v59 = vld [vmem:[%s6283_s1 + $0x708] ss:$20 sps:$4 sm:$0xff]   ;;  %v4536_v60 = vld [vmem:[%s6283_s1 + $0x710] ss:$20 sps:$4 sm:$0xff]  }
  0x7b   :  { %2846 = vmatpush1.bf16.msra.mxu0 %v4440_v61  ;;  %3104 = vmatpush1.bf16.msra.mxu1 %v4443_v62  ;;  %v4541_v61 = vld [vmem:[%s6283_s1 + $0x734] ss:$20 sps:$4 sm:$0xff]   ;;  %v4544_v62 = vld [vmem:[%s6283_s1 + $0x73c] ss:$20 sps:$4 sm:$0xff]  }
  0x7c   :  { %2847 = vmatprep.subr.bf16.mxu0 %v4448_v63  ;;  %3105 = vmatprep.subr.bf16.mxu1 %v4451_v0  ;;  %v4539_v63 = vld [vmem:[%s6283_s1 + $0x730] ss:$20 sps:$4 sm:$0xff]   ;;  %v4542_v0 = vld [vmem:[%s6283_s1 + $0x738] ss:$20 sps:$4 sm:$0xff]  }
  0x7f   :  { %2848 = vmatpush1.bf16.msra.mxu0 %v4446_v1  ;;  %3106 = vmatpush1.bf16.msra.mxu1 %v4449_v2  ;;  %v4547_v1 = vld [vmem:[%s6283_s1 + $0x75c] ss:$20 sps:$4 sm:$0xff]   ;;  %v4550_v2 = vld [vmem:[%s6283_s1 + $0x764] ss:$20 sps:$4 sm:$0xff]  }
  0x80   :  { %2860 = vmatprep.subr.bf16.mxu0 %v4457_v3  ;;  %3118 = vmatprep.subr.bf16.mxu1 %v4460_v4  ;;  %v4545_v3 = vld [vmem:[%s6283_s1 + $0x758] ss:$20 sps:$4 sm:$0xff]   ;;  %v4548_v4 = vld [vmem:[%s6283_s1 + $0x760] ss:$20 sps:$4 sm:$0xff]  }
  0x82   :  { %2850 = vmatmul.mubr.bf16.vlgmr.msra.gmra.mrb[0].mxu0 %v4452_v5  ;;  %3108 = vmatmul.mubr.bf16.vlgmr.msra.gmra.mrb[0].mxu1 %v4452_v5  ;;  %v4556_v5 = vld [vmem:[%s6283_s1 + $0x784] ss:$20 sps:$4 sm:$0xff]  }
  0x83   :  { %2861 = vmatpush1.bf16.msra.mxu0 %v4455_v6  ;;  %3119 = vmatpush1.bf16.msra.mxu1 %v4458_v7  ;;  %v4559_v6 = vld [vmem:[%s6283_s1 + $0x78c] ss:$20 sps:$4 sm:$0xff]   ;;  %v4551_v7 = vld [vmem:[%s6284_s0 + $0x10] ss:$44 sps:$4 sm:$0x1f]  }
  0x84   :  { %2862 = vmatprep.subr.bf16.mxu0 %v4463_v8  ;;  %3120 = vmatprep.subr.bf16.mxu1 %v4466_v9  ;;  %v4554_v8 = vld [vmem:[%s6283_s1 + $0x780] ss:$20 sps:$4 sm:$0xff]   ;;  %v4557_v9 = vld [vmem:[%s6283_s1 + $0x788] ss:$20 sps:$4 sm:$0xff]  }
  0x85   :  { %2892 = vmatprep.mubr.bf16.mxu0 %v4553_v13  ;;  %3150 = vmatprep.mubr.bf16.mxu1 %v4553_v13  ;;  %v4560_v13 = vld [vmem:[%s6283_s1 + $0x7a8] ss:$20 sps:$4 sm:$0xff]  }
  0x87   :  { %2863 = vmatpush1.bf16.msra.mxu0 %v4461_v10  ;;  %3121 = vmatpush1.bf16.msra.mxu1 %v4464_v11  ;;  %v4562_v10 = vld [vmem:[%s6283_s1 + $0x7ac] ss:$20 sps:$4 sm:$0xff]   ;;  %v4565_v11 = vld [vmem:[%s6283_s1 + $0x7b4] ss:$20 sps:$4 sm:$0xff]  }
  0x88   :  { %2864 = vmatprep.subr.bf16.mxu0 %v4469_v12  ;;  %3122 = vmatprep.subr.bf16.mxu1 %v4472_v14  ;;  %v4652_v12 = vld [vmem:[%s6284_s0 + $0x1c] ss:$44 sps:$4 sm:$0x1f]   ;;  %v4563_v14 = vld [vmem:[%s6283_s1 + $0x7b0] ss:$20 sps:$4 sm:$0xff]  }
  0x8b   :  { %2865 = vmatpush1.bf16.msra.mxu0 %v4467_v15  ;;  %3123 = vmatpush1.bf16.msra.mxu1 %v4470_v16  ;;  %v4568_v15 = vld [vmem:[%s6283_s1 + $0x7d4] ss:$20 sps:$4 sm:$0xff]   ;;  %v4571_v16 = vld [vmem:[%s6283_s1 + $0x7dc] ss:$20 sps:$4 sm:$0xff]  }
  0x8c   :  { %2866 = vmatprep.subr.bf16.mxu0 %v4475_v17  ;;  %3124 = vmatprep.subr.bf16.mxu1 %v4478_v18  ;;  %v4566_v17 = vld [vmem:[%s6283_s1 + $0x7d0] ss:$20 sps:$4 sm:$0xff]   ;;  %v4569_v18 = vld [vmem:[%s6283_s1 + $0x7d8] ss:$20 sps:$4 sm:$0xff]  }
  0x8f   :  { %2867 = vmatpush1.bf16.msra.mxu0 %v4473_v19  ;;  %3125 = vmatpush1.bf16.msra.mxu1 %v4476_v20  ;;  %v4574_v19 = vld [vmem:[%s6283_s1 + $0x7fc] ss:$20 sps:$4 sm:$0xff]   ;;  %v4577_v20 = vld [vmem:[%s6283_s1 + $0x804] ss:$20 sps:$4 sm:$0xff]  }
  0x90   :  { %2868 = vmatprep.subr.bf16.mxu0 %v4481_v21  ;;  %3126 = vmatprep.subr.bf16.mxu1 %v4484_v22  ;;  %v4572_v21 = vld [vmem:[%s6283_s1 + $0x7f8] ss:$20 sps:$4 sm:$0xff]   ;;  %v4575_v22 = vld [vmem:[%s6283_s1 + $0x800] ss:$20 sps:$4 sm:$0xff]  }
  0x93   :  { %2869 = vmatpush1.bf16.msra.mxu0 %v4479_v23  ;;  %3127 = vmatpush1.bf16.msra.mxu1 %v4482_v24  ;;  %v4580_v23 = vld [vmem:[%s6283_s1 + $0x824] ss:$20 sps:$4 sm:$0xff]   ;;  %v4583_v24 = vld [vmem:[%s6283_s1 + $0x82c] ss:$20 sps:$4 sm:$0xff]  }
  0x94   :  { %2870 = vmatprep.subr.bf16.mxu0 %v4487_v25  ;;  %3128 = vmatprep.subr.bf16.mxu1 %v4490_v26  ;;  %v4578_v25 = vld [vmem:[%s6283_s1 + $0x820] ss:$20 sps:$4 sm:$0xff]   ;;  %v4581_v26 = vld [vmem:[%s6283_s1 + $0x828] ss:$20 sps:$4 sm:$0xff]  }
  0x97   :  { %2871 = vmatpush1.bf16.msra.mxu0 %v4485_v27  ;;  %3129 = vmatpush1.bf16.msra.mxu1 %v4488_v28  ;;  %v4586_v27 = vld [vmem:[%s6283_s1 + $0x84c] ss:$20 sps:$4 sm:$0xff]   ;;  %v4589_v28 = vld [vmem:[%s6283_s1 + $0x854] ss:$20 sps:$4 sm:$0xff]  }
  0x98   :  { %2872 = vmatprep.subr.bf16.mxu0 %v4493_v29  ;;  %3130 = vmatprep.subr.bf16.mxu1 %v4496_v30  ;;  %v4584_v29 = vld [vmem:[%s6283_s1 + $0x848] ss:$20 sps:$4 sm:$0xff]   ;;  %v4587_v30 = vld [vmem:[%s6283_s1 + $0x850] ss:$20 sps:$4 sm:$0xff]  }
  0x9b   :  { %2873 = vmatpush1.bf16.msra.mxu0 %v4491_v31  ;;  %3131 = vmatpush1.bf16.msra.mxu1 %v4494_v32  ;;  %v4592_v31 = vld [vmem:[%s6283_s1 + $0x874] ss:$20 sps:$4 sm:$0xff]   ;;  %v4595_v32 = vld [vmem:[%s6283_s1 + $0x87c] ss:$20 sps:$4 sm:$0xff]  }
  0x9c   :  { %2874 = vmatprep.subr.bf16.mxu0 %v4499_v33  ;;  %3132 = vmatprep.subr.bf16.mxu1 %v4502_v34  ;;  %v4590_v33 = vld [vmem:[%s6283_s1 + $0x870] ss:$20 sps:$4 sm:$0xff]   ;;  %v4593_v34 = vld [vmem:[%s6283_s1 + $0x878] ss:$20 sps:$4 sm:$0xff]  }
  0x9f   :  { %2875 = vmatpush1.bf16.msra.mxu0 %v4497_v35  ;;  %3133 = vmatpush1.bf16.msra.mxu1 %v4500_v36  ;;  %v4598_v35 = vld [vmem:[%s6283_s1 + $0x89c] ss:$20 sps:$4 sm:$0xff]   ;;  %v4601_v36 = vld [vmem:[%s6283_s1 + $0x8a4] ss:$20 sps:$4 sm:$0xff]  }
  0xa0   :  { %2876 = vmatprep.subr.bf16.mxu0 %v4505_v37  ;;  %3134 = vmatprep.subr.bf16.mxu1 %v4508_v38  ;;  %v4596_v37 = vld [vmem:[%s6283_s1 + $0x898] ss:$20 sps:$4 sm:$0xff]   ;;  %v4599_v38 = vld [vmem:[%s6283_s1 + $0x8a0] ss:$20 sps:$4 sm:$0xff]  }
  0xa3   :  { %2877 = vmatpush1.bf16.msra.mxu0 %v4503_v39  ;;  %3135 = vmatpush1.bf16.msra.mxu1 %v4506_v40  ;;  %v4604_v39 = vld [vmem:[%s6283_s1 + $0x8c4] ss:$20 sps:$4 sm:$0xff]   ;;  %v4607_v40 = vld [vmem:[%s6283_s1 + $0x8cc] ss:$20 sps:$4 sm:$0xff]  }
  0xa4   :  { %2878 = vmatprep.subr.bf16.mxu0 %v4511_v41  ;;  %3136 = vmatprep.subr.bf16.mxu1 %v4514_v42  ;;  %v4602_v41 = vld [vmem:[%s6283_s1 + $0x8c0] ss:$20 sps:$4 sm:$0xff]   ;;  %v4605_v42 = vld [vmem:[%s6283_s1 + $0x8c8] ss:$20 sps:$4 sm:$0xff]  }
  0xa7   :  { %2879 = vmatpush1.bf16.msra.mxu0 %v4509_v43  ;;  %3137 = vmatpush1.bf16.msra.mxu1 %v4512_v44  ;;  %v4610_v43 = vld [vmem:[%s6283_s1 + $0x8ec] ss:$20 sps:$4 sm:$0xff]   ;;  %v4613_v44 = vld [vmem:[%s6283_s1 + $0x8f4] ss:$20 sps:$4 sm:$0xff]  }
  0xa8   :  { %2880 = vmatprep.subr.bf16.mxu0 %v4517_v45  ;;  %3138 = vmatprep.subr.bf16.mxu1 %v4520_v46  ;;  %v4608_v45 = vld [vmem:[%s6283_s1 + $0x8e8] ss:$20 sps:$4 sm:$0xff]   ;;  %v4611_v46 = vld [vmem:[%s6283_s1 + $0x8f0] ss:$20 sps:$4 sm:$0xff]  }
  0xab   :  { %2881 = vmatpush1.bf16.msra.mxu0 %v4515_v47  ;;  %3139 = vmatpush1.bf16.msra.mxu1 %v4518_v48  ;;  %v4616_v47 = vld [vmem:[%s6283_s1 + $0x914] ss:$20 sps:$4 sm:$0xff]   ;;  %v4619_v48 = vld [vmem:[%s6283_s1 + $0x91c] ss:$20 sps:$4 sm:$0xff]  }
  0xac   :  { %2882 = vmatprep.subr.bf16.mxu0 %v4523_v49  ;;  %3140 = vmatprep.subr.bf16.mxu1 %v4526_v50  ;;  %v4614_v49 = vld [vmem:[%s6283_s1 + $0x910] ss:$20 sps:$4 sm:$0xff]   ;;  %v4617_v50 = vld [vmem:[%s6283_s1 + $0x918] ss:$20 sps:$4 sm:$0xff]  }
  0xaf   :  { %2883 = vmatpush1.bf16.msra.mxu0 %v4521_v51  ;;  %3141 = vmatpush1.bf16.msra.mxu1 %v4524_v52  ;;  %v4622_v51 = vld [vmem:[%s6283_s1 + $0x93c] ss:$20 sps:$4 sm:$0xff]   ;;  %v4625_v52 = vld [vmem:[%s6283_s1 + $0x944] ss:$20 sps:$4 sm:$0xff]  }
  0xb0   :  { %2884 = vmatprep.subr.bf16.mxu0 %v4529_v53  ;;  %3142 = vmatprep.subr.bf16.mxu1 %v4532_v54  ;;  %v4620_v53 = vld [vmem:[%s6283_s1 + $0x938] ss:$20 sps:$4 sm:$0xff]   ;;  %v4623_v54 = vld [vmem:[%s6283_s1 + $0x940] ss:$20 sps:$4 sm:$0xff]  }
  0xb3   :  { %2885 = vmatpush1.bf16.msra.mxu0 %v4527_v55  ;;  %3143 = vmatpush1.bf16.msra.mxu1 %v4530_v56  ;;  %v4628_v55 = vld [vmem:[%s6283_s1 + $0x964] ss:$20 sps:$4 sm:$0xff]   ;;  %v4631_v56 = vld [vmem:[%s6283_s1 + $0x96c] ss:$20 sps:$4 sm:$0xff]  }
  0xb4   :  { %2886 = vmatprep.subr.bf16.mxu0 %v4535_v57  ;;  %3144 = vmatprep.subr.bf16.mxu1 %v4538_v58  ;;  %v4626_v57 = vld [vmem:[%s6283_s1 + $0x960] ss:$20 sps:$4 sm:$0xff]   ;;  %v4629_v58 = vld [vmem:[%s6283_s1 + $0x968] ss:$20 sps:$4 sm:$0xff]  }
  0xb7   :  { %2887 = vmatpush1.bf16.msra.mxu0 %v4533_v59  ;;  %3145 = vmatpush1.bf16.msra.mxu1 %v4536_v60  ;;  %v4634_v59 = vld [vmem:[%s6283_s1 + $0x98c] ss:$20 sps:$4 sm:$0xff]   ;;  %v4637_v60 = vld [vmem:[%s6283_s1 + $0x994] ss:$20 sps:$4 sm:$0xff]  }
  0xb8   :  { %2888 = vmatprep.subr.bf16.mxu0 %v4541_v61  ;;  %3146 = vmatprep.subr.bf16.mxu1 %v4544_v62  ;;  %v4632_v61 = vld [vmem:[%s6283_s1 + $0x988] ss:$20 sps:$4 sm:$0xff]   ;;  %v4635_v62 = vld [vmem:[%s6283_s1 + $0x990] ss:$20 sps:$4 sm:$0xff]  }
  0xbb   :  { %2889 = vmatpush1.bf16.msra.mxu0 %v4539_v63  ;;  %3147 = vmatpush1.bf16.msra.mxu1 %v4542_v0  ;;  %v4640_v63 = vld [vmem:[%s6283_s1 + $0x9b4] ss:$20 sps:$4 sm:$0xff]   ;;  %v4643_v0 = vld [vmem:[%s6283_s1 + $0x9bc] ss:$20 sps:$4 sm:$0xff]  }
  0xbc   :  { %2890 = vmatprep.subr.bf16.mxu0 %v4547_v1  ;;  %3148 = vmatprep.subr.bf16.mxu1 %v4550_v2  ;;  %v4638_v1 = vld [vmem:[%s6283_s1 + $0x9b0] ss:$20 sps:$4 sm:$0xff]   ;;  %v4641_v2 = vld [vmem:[%s6283_s1 + $0x9b8] ss:$20 sps:$4 sm:$0xff]  }
  0xbf   :  { %2891 = vmatpush1.bf16.msra.mxu0 %v4545_v3  ;;  %3149 = vmatpush1.bf16.msra.mxu1 %v4548_v4  ;;  %v4646_v3 = vld [vmem:[%s6283_s1 + $0x9dc] ss:$20 sps:$4 sm:$0xff]   ;;  %v4649_v4 = vld [vmem:[%s6283_s1 + $0x9e4] ss:$20 sps:$4 sm:$0xff]  }
  0xc0   :  { %2903 = vmatprep.subr.bf16.mxu0 %v4556_v5  ;;  %3161 = vmatprep.subr.bf16.mxu1 %v4559_v6  ;;  %v4644_v5 = vld [vmem:[%s6283_s1 + $0x9d8] ss:$20 sps:$4 sm:$0xff]   ;;  %v4647_v6 = vld [vmem:[%s6283_s1 + $0x9e0] ss:$20 sps:$4 sm:$0xff]  }
  0xc2   :  { %2893 = vmatmul.mubr.bf16.vlgmr.msra.gmra.mrb[0].mxu0 %v4551_v7  ;;  %3151 = vmatmul.mubr.bf16.vlgmr.msra.gmra.mrb[0].mxu1 %v4551_v7  ;;  %v4655_v7 = vld [vmem:[%s6283_s1 + $0xa04] ss:$20 sps:$4 sm:$0xff]  }
  0xc3   :  { %2904 = vmatpush1.bf16.msra.mxu0 %v4554_v8  ;;  %3162 = vmatpush1.bf16.msra.mxu1 %v4557_v9  ;;  %v5688_v8 = vld [vmem:[%s6284_s0 + $0x18] ss:$44 sps:$4 sm:$0x1f]   ;;  %v4658_v9 = vld [vmem:[%s6283_s1 + $0xa0c] ss:$20 sps:$4 sm:$0xff]  }
  0xc4   :  { %2905 = vmatprep.subr.bf16.mxu0 %v4562_v10  ;;  %3163 = vmatprep.subr.bf16.mxu1 %v4565_v11  ;;  %v4653_v10 = vld [vmem:[%s6283_s1 + $0xa00] ss:$20 sps:$4 sm:$0xff]   ;;  %v4656_v11 = vld [vmem:[%s6283_s1 + $0xa08] ss:$20 sps:$4 sm:$0xff]  }
  0xc5   :  { %2935 = vmatprep.mubr.bf16.mxu0 %v4652_v12  ;;  %3193 = vmatprep.mubr.bf16.mxu1 %v4652_v12  ;;  %v4661_v12 = vld [vmem:[%s6283_s1 + $0xa2c] ss:$20 sps:$4 sm:$0xff]  }
  0xc7   :  { %2906 = vmatpush1.bf16.msra.mxu0 %v4560_v13  ;;  %3164 = vmatpush1.bf16.msra.mxu1 %v4563_v14  ;;  %v5705_v13 = vld [vmem:[%s6284_s0 + $0x24] ss:$44 sps:$4 sm:$0x1f]   ;;  %v4664_v14 = vld [vmem:[%s6283_s1 + $0xa34] ss:$20 sps:$4 sm:$0xff]  }
  0xc8   :  { %2907 = vmatprep.subr.bf16.mxu0 %v4568_v15  ;;  %3165 = vmatprep.subr.bf16.mxu1 %v4571_v16  ;;  %v4659_v15 = vld [vmem:[%s6283_s1 + $0xa28] ss:$20 sps:$4 sm:$0xff]   ;;  %v4662_v16 = vld [vmem:[%s6283_s1 + $0xa30] ss:$20 sps:$4 sm:$0xff]  }
  0xcb   :  { %2908 = vmatpush1.bf16.msra.mxu0 %v4566_v17  ;;  %3166 = vmatpush1.bf16.msra.mxu1 %v4569_v18  ;;  %v4667_v17 = vld [vmem:[%s6283_s1 + $0xa54] ss:$20 sps:$4 sm:$0xff]   ;;  %v4670_v18 = vld [vmem:[%s6283_s1 + $0xa5c] ss:$20 sps:$4 sm:$0xff]  }
  0xcc   :  { %2909 = vmatprep.subr.bf16.mxu0 %v4574_v19  ;;  %3167 = vmatprep.subr.bf16.mxu1 %v4577_v20  ;;  %v4665_v19 = vld [vmem:[%s6283_s1 + $0xa50] ss:$20 sps:$4 sm:$0xff]   ;;  %v4668_v20 = vld [vmem:[%s6283_s1 + $0xa58] ss:$20 sps:$4 sm:$0xff]  }
  0xcf   :  { %2910 = vmatpush1.bf16.msra.mxu0 %v4572_v21  ;;  %3168 = vmatpush1.bf16.msra.mxu1 %v4575_v22  ;;  %v4673_v21 = vld [vmem:[%s6283_s1 + $0xa7c] ss:$20 sps:$4 sm:$0xff]   ;;  %v4676_v22 = vld [vmem:[%s6283_s1 + $0xa84] ss:$20 sps:$4 sm:$0xff]  }
  0xd0   :  { %2911 = vmatprep.subr.bf16.mxu0 %v4580_v23  ;;  %3169 = vmatprep.subr.bf16.mxu1 %v4583_v24  ;;  %v4671_v23 = vld [vmem:[%s6283_s1 + $0xa78] ss:$20 sps:$4 sm:$0xff]   ;;  %v4674_v24 = vld [vmem:[%s6283_s1 + $0xa80] ss:$20 sps:$4 sm:$0xff]  }
  0xd3   :  { %2912 = vmatpush1.bf16.msra.mxu0 %v4578_v25  ;;  %3170 = vmatpush1.bf16.msra.mxu1 %v4581_v26  ;;  %v4679_v25 = vld [vmem:[%s6283_s1 + $0xaa4] ss:$20 sps:$4 sm:$0xff]   ;;  %v4682_v26 = vld [vmem:[%s6283_s1 + $0xaac] ss:$20 sps:$4 sm:$0xff]  }
  0xd4   :  { %2913 = vmatprep.subr.bf16.mxu0 %v4586_v27  ;;  %3171 = vmatprep.subr.bf16.mxu1 %v4589_v28  ;;  %v4677_v27 = vld [vmem:[%s6283_s1 + $0xaa0] ss:$20 sps:$4 sm:$0xff]   ;;  %v4680_v28 = vld [vmem:[%s6283_s1 + $0xaa8] ss:$20 sps:$4 sm:$0xff]  }
  0xd7   :  { %2914 = vmatpush1.bf16.msra.mxu0 %v4584_v29  ;;  %3172 = vmatpush1.bf16.msra.mxu1 %v4587_v30  ;;  %v4685_v29 = vld [vmem:[%s6283_s1 + $0xacc] ss:$20 sps:$4 sm:$0xff]   ;;  %v4688_v30 = vld [vmem:[%s6283_s1 + $0xad4] ss:$20 sps:$4 sm:$0xff]  }
  0xd8   :  { %2915 = vmatprep.subr.bf16.mxu0 %v4592_v31  ;;  %3173 = vmatprep.subr.bf16.mxu1 %v4595_v32  ;;  %v4683_v31 = vld [vmem:[%s6283_s1 + $0xac8] ss:$20 sps:$4 sm:$0xff]   ;;  %v4686_v32 = vld [vmem:[%s6283_s1 + $0xad0] ss:$20 sps:$4 sm:$0xff]  }
  0xdb   :  { %2916 = vmatpush1.bf16.msra.mxu0 %v4590_v33  ;;  %3174 = vmatpush1.bf16.msra.mxu1 %v4593_v34  ;;  %v4691_v33 = vld [vmem:[%s6283_s1 + $0xaf4] ss:$20 sps:$4 sm:$0xff]   ;;  %v4694_v34 = vld [vmem:[%s6283_s1 + $0xafc] ss:$20 sps:$4 sm:$0xff]  }
  0xdc   :  { %2917 = vmatprep.subr.bf16.mxu0 %v4598_v35  ;;  %3175 = vmatprep.subr.bf16.mxu1 %v4601_v36  ;;  %v4689_v35 = vld [vmem:[%s6283_s1 + $0xaf0] ss:$20 sps:$4 sm:$0xff]   ;;  %v4692_v36 = vld [vmem:[%s6283_s1 + $0xaf8] ss:$20 sps:$4 sm:$0xff]  }
  0xdf   :  { %2918 = vmatpush1.bf16.msra.mxu0 %v4596_v37  ;;  %3176 = vmatpush1.bf16.msra.mxu1 %v4599_v38  ;;  %v4697_v37 = vld [vmem:[%s6283_s1 + $0xb1c] ss:$20 sps:$4 sm:$0xff]   ;;  %v4700_v38 = vld [vmem:[%s6283_s1 + $0xb24] ss:$20 sps:$4 sm:$0xff]  }
  0xe0   :  { %2919 = vmatprep.subr.bf16.mxu0 %v4604_v39  ;;  %3177 = vmatprep.subr.bf16.mxu1 %v4607_v40  ;;  %v4695_v39 = vld [vmem:[%s6283_s1 + $0xb18] ss:$20 sps:$4 sm:$0xff]   ;;  %v4698_v40 = vld [vmem:[%s6283_s1 + $0xb20] ss:$20 sps:$4 sm:$0xff]  }
  0xe3   :  { %2920 = vmatpush1.bf16.msra.mxu0 %v4602_v41  ;;  %3178 = vmatpush1.bf16.msra.mxu1 %v4605_v42  ;;  %v4703_v41 = vld [vmem:[%s6283_s1 + $0xb44] ss:$20 sps:$4 sm:$0xff]   ;;  %v4706_v42 = vld [vmem:[%s6283_s1 + $0xb4c] ss:$20 sps:$4 sm:$0xff]  }
  0xe4   :  { %2921 = vmatprep.subr.bf16.mxu0 %v4610_v43  ;;  %3179 = vmatprep.subr.bf16.mxu1 %v4613_v44  ;;  %v4701_v43 = vld [vmem:[%s6283_s1 + $0xb40] ss:$20 sps:$4 sm:$0xff]   ;;  %v4704_v44 = vld [vmem:[%s6283_s1 + $0xb48] ss:$20 sps:$4 sm:$0xff]  }
  0xe7   :  { %2922 = vmatpush1.bf16.msra.mxu0 %v4608_v45  ;;  %3180 = vmatpush1.bf16.msra.mxu1 %v4611_v46  ;;  %v4709_v45 = vld [vmem:[%s6283_s1 + $0xb6c] ss:$20 sps:$4 sm:$0xff]   ;;  %v4712_v46 = vld [vmem:[%s6283_s1 + $0xb74] ss:$20 sps:$4 sm:$0xff]  }
  0xe8   :  { %2923 = vmatprep.subr.bf16.mxu0 %v4616_v47  ;;  %3181 = vmatprep.subr.bf16.mxu1 %v4619_v48  ;;  %v4707_v47 = vld [vmem:[%s6283_s1 + $0xb68] ss:$20 sps:$4 sm:$0xff]   ;;  %v4710_v48 = vld [vmem:[%s6283_s1 + $0xb70] ss:$20 sps:$4 sm:$0xff]  }
  0xeb   :  { %2924 = vmatpush1.bf16.msra.mxu0 %v4614_v49  ;;  %3182 = vmatpush1.bf16.msra.mxu1 %v4617_v50  ;;  %v4715_v49 = vld [vmem:[%s6283_s1 + $0xb94] ss:$20 sps:$4 sm:$0xff]   ;;  %v4718_v50 = vld [vmem:[%s6283_s1 + $0xb9c] ss:$20 sps:$4 sm:$0xff]  }
  0xec   :  { %2925 = vmatprep.subr.bf16.mxu0 %v4622_v51  ;;  %3183 = vmatprep.subr.bf16.mxu1 %v4625_v52  ;;  %v4713_v51 = vld [vmem:[%s6283_s1 + $0xb90] ss:$20 sps:$4 sm:$0xff]   ;;  %v4716_v52 = vld [vmem:[%s6283_s1 + $0xb98] ss:$20 sps:$4 sm:$0xff]  }
  0xef   :  { %2926 = vmatpush1.bf16.msra.mxu0 %v4620_v53  ;;  %3184 = vmatpush1.bf16.msra.mxu1 %v4623_v54  ;;  %v4721_v53 = vld [vmem:[%s6283_s1 + $0xbbc] ss:$20 sps:$4 sm:$0xff]   ;;  %v4724_v54 = vld [vmem:[%s6283_s1 + $0xbc4] ss:$20 sps:$4 sm:$0xff]  }
  0xf0   :  { %2927 = vmatprep.subr.bf16.mxu0 %v4628_v55  ;;  %3185 = vmatprep.subr.bf16.mxu1 %v4631_v56  ;;  %v4719_v55 = vld [vmem:[%s6283_s1 + $0xbb8] ss:$20 sps:$4 sm:$0xff]   ;;  %v4722_v56 = vld [vmem:[%s6283_s1 + $0xbc0] ss:$20 sps:$4 sm:$0xff]  }
  0xf3   :  { %2928 = vmatpush1.bf16.msra.mxu0 %v4626_v57  ;;  %3186 = vmatpush1.bf16.msra.mxu1 %v4629_v58  ;;  %v4727_v57 = vld [vmem:[%s6283_s1 + $0xbe4] ss:$20 sps:$4 sm:$0xff]   ;;  %v4730_v58 = vld [vmem:[%s6283_s1 + $0xbec] ss:$20 sps:$4 sm:$0xff]  }
  0xf4   :  { %2929 = vmatprep.subr.bf16.mxu0 %v4634_v59  ;;  %3187 = vmatprep.subr.bf16.mxu1 %v4637_v60  ;;  %v4725_v59 = vld [vmem:[%s6283_s1 + $0xbe0] ss:$20 sps:$4 sm:$0xff]   ;;  %v4728_v60 = vld [vmem:[%s6283_s1 + $0xbe8] ss:$20 sps:$4 sm:$0xff]  }
  0xf7   :  { %2930 = vmatpush1.bf16.msra.mxu0 %v4632_v61  ;;  %3188 = vmatpush1.bf16.msra.mxu1 %v4635_v62  ;;  %v4733_v61 = vld [vmem:[%s6283_s1 + $0xc0c] ss:$20 sps:$4 sm:$0xff]   ;;  %v4736_v62 = vld [vmem:[%s6283_s1 + $0xc14] ss:$20 sps:$4 sm:$0xff]  }
  0xf8   :  { %2931 = vmatprep.subr.bf16.mxu0 %v4640_v63  ;;  %3189 = vmatprep.subr.bf16.mxu1 %v4643_v0  ;;  %v4731_v63 = vld [vmem:[%s6283_s1 + $0xc08] ss:$20 sps:$4 sm:$0xff]   ;;  %v4734_v0 = vld [vmem:[%s6283_s1 + $0xc10] ss:$20 sps:$4 sm:$0xff]  }
  0xfb   :  { %2932 = vmatpush1.bf16.msra.mxu0 %v4638_v1  ;;  %3190 = vmatpush1.bf16.msra.mxu1 %v4641_v2  ;;  %v4739_v1 = vld [vmem:[%s6283_s1 + $0xc34] ss:$20 sps:$4 sm:$0xff]   ;;  %v4742_v2 = vld [vmem:[%s6283_s1 + $0xc3c] ss:$20 sps:$4 sm:$0xff]  }
  0xfc   :  { %2933 = vmatprep.subr.bf16.mxu0 %v4646_v3  ;;  %3191 = vmatprep.subr.bf16.mxu1 %v4649_v4  ;;  %v4737_v3 = vld [vmem:[%s6283_s1 + $0xc30] ss:$20 sps:$4 sm:$0xff]   ;;  %v4740_v4 = vld [vmem:[%s6283_s1 + $0xc38] ss:$20 sps:$4 sm:$0xff]  }
  0xff   :  { %2934 = vmatpush1.bf16.msra.mxu0 %v4644_v5  ;;  %3192 = vmatpush1.bf16.msra.mxu1 %v4647_v6  ;;  %v4745_v5 = vld [vmem:[%s6283_s1 + $0xc5c] ss:$20 sps:$4 sm:$0xff]   ;;  %v4748_v6 = vld [vmem:[%s6283_s1 + $0xc64] ss:$20 sps:$4 sm:$0xff]  }
 0x100   :  { %2946 = vmatprep.subr.bf16.mxu0 %v4655_v7  ;;  %3204 = vmatprep.subr.bf16.mxu1 %v4658_v9  ;;  %v4743_v7 = vld [vmem:[%s6283_s1 + $0xc58] ss:$20 sps:$4 sm:$0xff]   ;;  %v4746_v9 = vld [vmem:[%s6283_s1 + $0xc60] ss:$20 sps:$4 sm:$0xff]  }
 0x102   :  { %2936 = vmatmul.mubr.bf16.vlgmr.msra.gmra.mrb[0].mxu0 %v5688_v8  ;;  %3194 = vmatmul.mubr.bf16.vlgmr.msra.gmra.mrb[0].mxu1 %v5688_v8 }
 0x103   :  { %2947 = vmatpush1.bf16.msra.mxu0 %v4653_v10  ;;  %3205 = vmatpush1.bf16.msra.mxu1 %v4656_v11  ;;  %v4754_v10 = vld [vmem:[%s6283_s1 + $0xc84] ss:$20 sps:$4 sm:$0xff]   ;;  %v4757_v11 = vld [vmem:[%s6283_s1 + $0xc8c] ss:$20 sps:$4 sm:$0xff]  }
 0x104   :  { %2948 = vmatprep.subr.bf16.mxu0 %v4661_v12  ;;  %3206 = vmatprep.subr.bf16.mxu1 %v4664_v14  ;;  %v5897_v12 = vld [vmem:[%s6284_s0 + $0x20] ss:$44 sps:$4 sm:$0x1f]  }
 0x105   :  { %2978 = vmatprep.mubr.bf16.mxu0 %v5705_v13  ;;  %3236 = vmatprep.mubr.bf16.mxu1 %v5705_v13  ;;  %v4752_v14 = vld [vmem:[%s6283_s1 + $0xc80] ss:$20 sps:$4 sm:$0xff]  }
 0x107   :  { %2949 = vmatpush1.bf16.msra.mxu0 %v4659_v15  ;;  %3207 = vmatpush1.bf16.msra.mxu1 %v4662_v16  ;;  %v4755_v15 = vld [vmem:[%s6283_s1 + $0xc88] ss:$20 sps:$4 sm:$0xff]   ;;  %v4760_v16 = vld [vmem:[%s6283_s1 + $0xcac] ss:$20 sps:$4 sm:$0xff]  }
 0x108   :  { %2950 = vmatprep.subr.bf16.mxu0 %v4667_v17  ;;  %3208 = vmatprep.subr.bf16.mxu1 %v4670_v18  ;;  %v4763_v17 = vld [vmem:[%s6283_s1 + $0xcb4] ss:$20 sps:$4 sm:$0xff]  }
 0x109   :  { %v4758_v18 = vld [vmem:[%s6283_s1 + $0xca8] ss:$20 sps:$4 sm:$0xff]  }
 0x10b   :  { %2951 = vmatpush1.bf16.msra.mxu0 %v4665_v19  ;;  %3209 = vmatpush1.bf16.msra.mxu1 %v4668_v20  ;;  %v4761_v19 = vld [vmem:[%s6283_s1 + $0xcb0] ss:$20 sps:$4 sm:$0xff]   ;;  %v4766_v20 = vld [vmem:[%s6283_s1 + $0xcd4] ss:$20 sps:$4 sm:$0xff]  }
 0x10c   :  { %2952 = vmatprep.subr.bf16.mxu0 %v4673_v21  ;;  %3210 = vmatprep.subr.bf16.mxu1 %v4676_v22  ;;  %v4769_v21 = vld [vmem:[%s6283_s1 + $0xcdc] ss:$20 sps:$4 sm:$0xff]   ;;  %v4868_v22 = vmov 0  }
 0x10f   :  { %2953 = vmatpush1.bf16.msra.mxu0 %v4671_v23  ;;  %3211 = vmatpush1.bf16.msra.mxu1 %v4674_v24  ;;  %v4764_v23 = vld [vmem:[%s6283_s1 + $0xcd0] ss:$20 sps:$4 sm:$0xff]   ;;  %v4767_v24 = vld [vmem:[%s6283_s1 + $0xcd8] ss:$20 sps:$4 sm:$0xff]  }
 0x110   :  { %2954 = vmatprep.subr.bf16.mxu0 %v4679_v25  ;;  %3212 = vmatprep.subr.bf16.mxu1 %v4682_v26  ;;  %v4772_v25 = vld [vmem:[%s6283_s1 + $0xcfc] ss:$20 sps:$4 sm:$0xff]   ;;  %v4775_v26 = vld [vmem:[%s6283_s1 + $0xd04] ss:$20 sps:$4 sm:$0xff]  }
 0x113   :  { %2955 = vmatpush1.bf16.msra.mxu0 %v4677_v27  ;;  %3213 = vmatpush1.bf16.msra.mxu1 %v4680_v28  ;;  %v4770_v27 = vld [vmem:[%s6283_s1 + $0xcf8] ss:$20 sps:$4 sm:$0xff]   ;;  %v4773_v28 = vld [vmem:[%s6283_s1 + $0xd00] ss:$20 sps:$4 sm:$0xff]  }
 0x114   :  { %2956 = vmatprep.subr.bf16.mxu0 %v4685_v29  ;;  %3214 = vmatprep.subr.bf16.mxu1 %v4688_v30  ;;  %v4777_v29 = vld [vmem:[%s6283_s1 + $0x150] ss:$20 sps:$4 sm:$0xff]  }
 0x115   :  { %v4778_v30 = vld [vmem:[%s6283_s1 + $0x3d0] ss:$20 sps:$4 sm:$0xff]  }
 0x117   :  { %2957 = vmatpush1.bf16.msra.mxu0 %v4683_v31  ;;  %3215 = vmatpush1.bf16.msra.mxu1 %v4686_v32  ;;  %v5952_v31 = vld [vmem:[%s6284_s0 + $0x28] ss:$44 sps:$4 sm:$0x1f]   ;;  %v4779_v32 = vld [vmem:[%s6283_s1 + $0x10] ss:$20 sps:$4 sm:$0xff]  }
 0x118   :  { %2958 = vmatprep.subr.bf16.mxu0 %v4691_v33  ;;  %3216 = vmatprep.subr.bf16.mxu1 %v4694_v34  ;;  %v4780_v33 = vld [vmem:[%s6283_s1 + $0x290] ss:$20 sps:$4 sm:$0xff]   ;;  %v4781_v34 = vld [vmem:[%s6283_s1 + $0x178] ss:$20 sps:$4 sm:$0xff]  }
 0x11b   :  { %2959 = vmatpush1.bf16.msra.mxu0 %v4689_v35  ;;  %3217 = vmatpush1.bf16.msra.mxu1 %v4692_v36  ;;  %v4782_v35 = vld [vmem:[%s6283_s1 + $0x3f8] ss:$20 sps:$4 sm:$0xff]  }
 0x11c   :  { %2960 = vmatprep.subr.bf16.mxu0 %v4697_v37  ;;  %3218 = vmatprep.subr.bf16.mxu1 %v4700_v38  ;;  %v4783_v36 = vld [vmem:[%s6283_s1 + $0x38] ss:$20 sps:$4 sm:$0xff]   ;;  %v4785_v38 = vld [vmem:[%s6283_s1 + $0x1a0] ss:$20 sps:$4 sm:$0xff]  }
 0x11d   :  { %v4784_v37 = vld [vmem:[%s6283_s1 + $0x2b8] ss:$20 sps:$4 sm:$0xff]  }
 0x11f   :  { %2961 = vmatpush1.bf16.msra.mxu0 %v4695_v39  ;;  %3219 = vmatpush1.bf16.msra.mxu1 %v4698_v40  ;;  %v4786_v39 = vld [vmem:[%s6283_s1 + $0x420] ss:$20 sps:$4 sm:$0xff]   ;;  %v4861_v40 = vld [vmem:[%s6284_s0 + $0x4] ss:$44 sps:$4 sm:$0x1f]  }
 0x120   :  { %2962 = vmatprep.subr.bf16.mxu0 %v4703_v41  ;;  %3220 = vmatprep.subr.bf16.mxu1 %v4706_v42  ;;  %v4862_v41 = vld [vmem:[%s6284_s0 + $0xc] ss:$44 sps:$4 sm:$0x1f]   ;;  %v4787_v42 = vld [vmem:[%s6283_s1 + $0x60] ss:$20 sps:$4 sm:$0xff]  }
 0x123   :  { %2963 = vmatpush1.bf16.msra.mxu0 %v4701_v43  ;;  %3221 = vmatpush1.bf16.msra.mxu1 %v4704_v44  ;;  %v4788_v43 = vld [vmem:[%s6283_s1 + $0x2e0] ss:$20 sps:$4 sm:$0xff]   ;;  %v4789_v44 = vld [vmem:[%s6283_s1 + $0x1c8] ss:$20 sps:$4 sm:$0xff]  }
 0x124   :  { %2964 = vmatprep.subr.bf16.mxu0 %v4709_v45  ;;  %3222 = vmatprep.subr.bf16.mxu1 %v4712_v46  ;;  %v4790_v45 = vld [vmem:[%s6283_s1 + $0x448] ss:$20 sps:$4 sm:$0xff]  }
 0x125   :  { %v4791_v46 = vld [vmem:[%s6283_s1 + $0x88] ss:$20 sps:$4 sm:$0xff]  }
 0x127   :  { %2965 = vmatpush1.bf16.msra.mxu0 %v4707_v47  ;;  %3223 = vmatpush1.bf16.msra.mxu1 %v4710_v48  ;;  %v4792_v47 = vld [vmem:[%s6283_s1 + $0x308] ss:$20 sps:$4 sm:$0xff]   ;;  %v4793_v48 = vld [vmem:[%s6283_s1 + $0x1f0] ss:$20 sps:$4 sm:$0xff]  }
 0x128   :  { %2966 = vmatprep.subr.bf16.mxu0 %v4715_v49  ;;  %3224 = vmatprep.subr.bf16.mxu1 %v4718_v50  ;;  %v4794_v49 = vld [vmem:[%s6283_s1 + $0x470] ss:$20 sps:$4 sm:$0xff]  }
 0x129   :  { %v4795_v50 = vld [vmem:[%s6283_s1 + $0xb0] ss:$20 sps:$4 sm:$0xff]  }
 0x12b   :  { %2967 = vmatpush1.bf16.msra.mxu0 %v4713_v51  ;;  %3225 = vmatpush1.bf16.msra.mxu1 %v4716_v52  ;;  %v4796_v51 = vld [vmem:[%s6283_s1 + $0x330] ss:$20 sps:$4 sm:$0xff]   ;;  %v4797_v52 = vld [vmem:[%s6283_s1 + $0x218] ss:$20 sps:$4 sm:$0xff]  }
 0x12c   :  { %2968 = vmatprep.subr.bf16.mxu0 %v4721_v53  ;;  %3226 = vmatprep.subr.bf16.mxu1 %v4724_v54  ;;  %v4798_v53 = vld [vmem:[%s6283_s1 + $0x498] ss:$20 sps:$4 sm:$0xff]  }
 0x12d   :  { %v4799_v54 = vld [vmem:[%s6283_s1 + $0xd8] ss:$20 sps:$4 sm:$0xff]  }
 0x12f   :  { %2969 = vmatpush1.bf16.msra.mxu0 %v4719_v55  ;;  %3227 = vmatpush1.bf16.msra.mxu1 %v4722_v56  ;;  %v4800_v55 = vld [vmem:[%s6283_s1 + $0x358] ss:$20 sps:$4 sm:$0xff]   ;;  %v4801_v56 = vld [vmem:[%s6283_s1 + $0x240] ss:$20 sps:$4 sm:$0xff]  }
 0x130   :  { %2970 = vmatprep.subr.bf16.mxu0 %v4727_v57  ;;  %3228 = vmatprep.subr.bf16.mxu1 %v4730_v58  ;;  %v4802_v57 = vld [vmem:[%s6283_s1 + $0x4c0] ss:$20 sps:$4 sm:$0xff]  }
 0x131   :  { %v4803_v58 = vld [vmem:[%s6283_s1 + $0x100] ss:$20 sps:$4 sm:$0xff]  }
 0x133   :  { %2971 = vmatpush1.bf16.msra.mxu0 %v4725_v59  ;;  %3229 = vmatpush1.bf16.msra.mxu1 %v4728_v60  ;;  %v4804_v59 = vld [vmem:[%s6283_s1 + $0x380] ss:$20 sps:$4 sm:$0xff]   ;;  %v4805_v60 = vld [vmem:[%s6283_s1 + $0x268] ss:$20 sps:$4 sm:$0xff]  }
 0x134   :  { %2972 = vmatprep.subr.bf16.mxu0 %v4733_v61  ;;  %3230 = vmatprep.subr.bf16.mxu1 %v4736_v62  ;;  %v4806_v61 = vld [vmem:[%s6283_s1 + $0x4e8] ss:$20 sps:$4 sm:$0xff]  }
 0x135   :  { %v4807_v62 = vld [vmem:[%s6283_s1 + $0x128] ss:$20 sps:$4 sm:$0xff]  }
 0x137   :  { %2973 = vmatpush1.bf16.msra.mxu0 %v4731_v63  ;;  %3231 = vmatpush1.bf16.msra.mxu1 %v4734_v0  ;;  %v4808_v63 = vld [vmem:[%s6283_s1 + $0x3a8] ss:$20 sps:$4 sm:$0xff]   ;;  %v4809_v0 = vld [vmem:[%s6283_s1 + $0x650] ss:$20 sps:$4 sm:$0xff]  }
 0x138   :  { %2974 = vmatprep.subr.bf16.mxu0 %v4739_v1  ;;  %3232 = vmatprep.subr.bf16.mxu1 %v4742_v2  ;;  %v4811_v1 = vld [vmem:[%s6283_s1 + $0x8d0] ss:$20 sps:$4 sm:$0xff]  }
 0x139   :  { %v4810_v2 = vld [vmem:[%s6283_s1 + $0x510] ss:$20 sps:$4 sm:$0xff]  }
 0x13b   :  { %2975 = vmatpush1.bf16.msra.mxu0 %v4737_v3  ;;  %3233 = vmatpush1.bf16.msra.mxu1 %v4740_v4  ;;  %v4812_v3 = vld [vmem:[%s6283_s1 + $0x790] ss:$20 sps:$4 sm:$0xff]   ;;  %v4813_v4 = vld [vmem:[%s6283_s1 + $0x678] ss:$20 sps:$4 sm:$0xff]  }
 0x13c   :  { %2976 = vmatprep.subr.bf16.mxu0 %v4745_v5  ;;  %3234 = vmatprep.subr.bf16.mxu1 %v4748_v6  ;;  %v4815_v5 = vld [vmem:[%s6283_s1 + $0x8f8] ss:$20 sps:$4 sm:$0xff]  }
 0x13d   :  { %v4863_v6 = vld [vmem:[%s6284_s0] ss:$44 sps:$4 sm:$0x1f]  }
 0x13f   :  { %2977 = vmatpush1.bf16.msra.mxu0 %v4743_v7  ;;  %3235 = vmatpush1.bf16.msra.mxu1 %v4746_v9  ;;  %v4864_v7 = vld [vmem:[%s6284_s0 + $0x8] ss:$44 sps:$4 sm:$0x1f]   ;;  %v4814_v9 = vld [vmem:[%s6283_s1 + $0x538] ss:$20 sps:$4 sm:$0xff]  }
 0x140   :  { %2989 = vmatprep.subr.bf16.mxu0 %v4754_v10  ;;  %3247 = vmatprep.subr.bf16.mxu1 %v4757_v11  ;;  %v4816_v10 = vld [vmem:[%s6283_s1 + $0x7b8] ss:$20 sps:$4 sm:$0xff]   ;;  %v4817_v11 = vld [vmem:[%s6283_s1 + $0x6a0] ss:$20 sps:$4 sm:$0xff]  }
 0x142   :  { %2979 = vmatmul.mubr.bf16.vlgmr.msra.gmra.mrb[0].mxu0 %v5897_v12  ;;  %3237 = vmatmul.mubr.bf16.vlgmr.msra.gmra.mrb[0].mxu1 %v5897_v12 }
 0x143   :  { %2990 = vmatpush1.bf16.msra.mxu0 %v4752_v14  ;;  %3248 = vmatpush1.bf16.msra.mxu1 %v4755_v15  ;;  %v4819_v14 = vld [vmem:[%s6283_s1 + $0x920] ss:$20 sps:$4 sm:$0xff]  }
 0x144   :  { %2991 = vmatprep.subr.bf16.mxu0 %v4760_v16  ;;  %3249 = vmatprep.subr.bf16.mxu1 %v4763_v17  ;;  %v4865_v15 = vld [vmem:[%s6284_s0 + $0x14] ss:$44 sps:$4 sm:$0x1f]   ;;  %v4866_v16 = vld [vmem:[%s6284_s0 + $0x1c] ss:$44 sps:$4 sm:$0x1f]  }
 0x145   :  { %3021 = vmatprep.mubr.bf16.mxu0 %v4868_v22  ;;  %3279 = vmatprep.mubr.bf16.mxu1 %v4868_v22  ;;  %v4818_v17 = vld [vmem:[%s6283_s1 + $0x560] ss:$20 sps:$4 sm:$0xff]   ;;  %v4824_v22 = vld [vmem:[%s6283_s1 + $0x808] ss:$20 sps:$4 sm:$0xff]  }
 0x147   :  { %2992 = vmatpush1.bf16.msra.mxu0 %v4758_v18  ;;  %3250 = vmatpush1.bf16.msra.mxu1 %v4761_v19  ;;  %v4820_v18 = vld [vmem:[%s6283_s1 + $0x7e0] ss:$20 sps:$4 sm:$0xff]   ;;  %v4821_v19 = vld [vmem:[%s6283_s1 + $0x6c8] ss:$20 sps:$4 sm:$0xff]  }
 0x148   :  { %2993 = vmatprep.subr.bf16.mxu0 %v4766_v20  ;;  %3251 = vmatprep.subr.bf16.mxu1 %v4769_v21  ;;  %v4823_v20 = vld [vmem:[%s6283_s1 + $0x948] ss:$20 sps:$4 sm:$0xff]  }
 0x149   :  { %v4822_v21 = vld [vmem:[%s6283_s1 + $0x588] ss:$20 sps:$4 sm:$0xff]  }
 0x14b   :  { %2994 = vmatpush1.bf16.msra.mxu0 %v4764_v23  ;;  %3252 = vmatpush1.bf16.msra.mxu1 %v4767_v24  ;;  %v4825_v23 = vld [vmem:[%s6283_s1 + $0x6f0] ss:$20 sps:$4 sm:$0xff]  }
 0x14c   :  { %2995 = vmatprep.subr.bf16.mxu0 %v4772_v25  ;;  %3253 = vmatprep.subr.bf16.mxu1 %v4775_v26  ;;  %v4827_v24 = vld [vmem:[%s6283_s1 + $0x970] ss:$20 sps:$4 sm:$0xff]  }
 0x14d   :  { %v4826_v25 = vld [vmem:[%s6283_s1 + $0x5b0] ss:$20 sps:$4 sm:$0xff]  }
 0x14e   :  { %v4828_v26 = vld [vmem:[%s6283_s1 + $0x830] ss:$20 sps:$4 sm:$0xff]  }
 0x14f   :  { %2996 = vmatpush1.bf16.msra.mxu0 %v4770_v27  ;;  %3254 = vmatpush1.bf16.msra.mxu1 %v4773_v28  ;;  %v4829_v27 = vld [vmem:[%s6283_s1 + $0x718] ss:$20 sps:$4 sm:$0xff]  }
 0x150   :  { %4085 = vmatprep.subr.bf16.mxu0 %v4777_v29  ;;  %4107 = vmatprep.subr.bf16.mxu1 %v4778_v30  ;;  %v4831_v28 = vld [vmem:[%s6283_s1 + $0x998] ss:$20 sps:$4 sm:$0xff]  }
 0x151   :  { %v4830_v29 = vld [vmem:[%s6283_s1 + $0x5d8] ss:$20 sps:$4 sm:$0xff]  }
 0x152   :  { %4078 = vmatmul.mubr.msk.bf16.vlgmr.msra.gmra.mrb[0].mxu0 %vm2770_vm0, %v5952_v31  ;;  %4079 = vmatmul.mubr.msk.bf16.vlgmr.msra.gmra.mrb[0].mxu1 %vm2770_vm0, %v5952_v31  ;;  %v4832_v30 = vld [vmem:[%s6283_s1 + $0x858] ss:$20 sps:$4 sm:$0xff]  }
 0x153   :  { %4086 = vmatpush3.bf16.msra.mxu0 %v4779_v32  ;;  %4108 = vmatpush3.bf16.msra.mxu1 %v4780_v33  ;;  %v4833_v32 = vld [vmem:[%s6283_s1 + $0x740] ss:$20 sps:$4 sm:$0xff]  }
 0x154   :  { %4087 = vmatprep.subr.bf16.mxu0 %v4781_v34  ;;  %4109 = vmatprep.subr.bf16.mxu1 %v4782_v35  ;;  %v4835_v33 = vld [vmem:[%s6283_s1 + $0x9c0] ss:$20 sps:$4 sm:$0xff]  }
 0x155   :  { %3322 = vmatprep.mubr.bf16.mxu0 %v4861_v40  ;;  %3363 = vmatprep.mubr.bf16.mxu1 %v4862_v41  ;;  %v4834_v34 = vld [vmem:[%s6283_s1 + $0x600] ss:$20 sps:$4 sm:$0xff]   ;;  %v4841_v40 = vld [vmem:[%s6283_s1 + $0xb50] ss:$20 sps:$4 sm:$0xff]  }
 0x156   :  { %v4836_v35 = vld [vmem:[%s6283_s1 + $0x880] ss:$20 sps:$4 sm:$0xff]   ;;  %v4842_v41 = vld [vmem:[%s6283_s1 + $0xa10] ss:$20 sps:$4 sm:$0xff]  }
 0x157   :  { %4088 = vmatpush3.bf16.msra.mxu0 %v4783_v36  ;;  %4110 = vmatpush3.bf16.msra.mxu1 %v4784_v37  ;;  %v4837_v36 = vld [vmem:[%s6283_s1 + $0x768] ss:$20 sps:$4 sm:$0xff]  }
 0x158   :  { %4089 = vmatprep.subr.bf16.mxu0 %v4785_v38  ;;  %4111 = vmatprep.subr.bf16.mxu1 %v4786_v39  ;;  %v4839_v37 = vld [vmem:[%s6283_s1 + $0x9e8] ss:$20 sps:$4 sm:$0xff]  }
 0x159   :  { %v4838_v38 = vld [vmem:[%s6283_s1 + $0x628] ss:$20 sps:$4 sm:$0xff]  }
 0x15a   :  { %v4840_v39 = vld [vmem:[%s6283_s1 + $0x8a8] ss:$20 sps:$4 sm:$0xff]  }
 0x15b   :  { %4090 = vmatpush3.bf16.msra.mxu0 %v4787_v42  ;;  %4112 = vmatpush3.bf16.msra.mxu1 %v4788_v43  ;;  %v4851_v42 = vld [vmem:[%s6283_s1 + $0xc90] ss:$20 sps:$4 sm:$0xff]   ;;  %v4843_v43 = vld [vmem:[%s6283_s1 + $0xb78] ss:$20 sps:$4 sm:$0xff]  }
 0x15c   :  { %4091 = vmatprep.subr.bf16.mxu0 %v4789_v44  ;;  %4113 = vmatprep.subr.bf16.mxu1 %v4790_v45  ;;  %v4869_v44 = vmov 0.0   ;;  %v4867_v45 = vld [vmem:[%s6284_s0 + $0x10] ss:$44 sps:$4 sm:$0x1f]  }
 0x15f   :  { %4092 = vmatpush3.bf16.msra.mxu0 %v4791_v46  ;;  %4114 = vmatpush3.bf16.msra.mxu1 %v4792_v47  ;;  %v4844_v46 = vld [vmem:[%s6283_s1 + $0xa38] ss:$20 sps:$4 sm:$0xff]  }
 0x160   :  { %4093 = vmatprep.subr.bf16.mxu0 %v4793_v48  ;;  %4115 = vmatprep.subr.bf16.mxu1 %v4794_v49  ;;  %v4854_v47 = vld [vmem:[%s6283_s1 + $0xcb8] ss:$20 sps:$4 sm:$0xff]   ;;  %v4845_v48 = vld [vmem:[%s6283_s1 + $0xba0] ss:$20 sps:$4 sm:$0xff]  }
 0x161   :  { %v4857_v49 = vld [vmem:[%s6283_s1 + $0xce0] ss:$20 sps:$4 sm:$0xff]  }
 0x163   :  { %4094 = vmatpush3.bf16.msra.mxu0 %v4795_v50  ;;  %4116 = vmatpush3.bf16.msra.mxu1 %v4796_v51  ;;  %v4847_v50 = vld [vmem:[%s6283_s1 + $0xbc8] ss:$20 sps:$4 sm:$0xff]  }
 0x164   :  { %4095 = vmatprep.subr.bf16.mxu0 %v4797_v52  ;;  %4117 = vmatprep.subr.bf16.mxu1 %v4798_v53  ;;  %v4860_v51 = vld [vmem:[%s6283_s1 + $0xd08] ss:$20 sps:$4 sm:$0xff]   ;;  %v4849_v52 = vld [vmem:[%s6283_s1 + $0xbf0] ss:$20 sps:$4 sm:$0xff]  }
 0x165   :  { %v4850_v53 = vld [vmem:[%s6283_s1 + $0xab0] ss:$20 sps:$4 sm:$0xff]  }
 0x167   :  { %4096 = vmatpush3.bf16.msra.mxu0 %v4799_v54  ;;  %4118 = vmatpush3.bf16.msra.mxu1 %v4800_v55  ;;  %v4852_v54 = vld [vmem:[%s6283_s1 + $0xc18] ss:$20 sps:$4 sm:$0xff]  }
 0x168   :  { %4097 = vmatprep.subr.bf16.mxu0 %v4801_v56  ;;  %4119 = vmatprep.subr.bf16.mxu1 %v4802_v57  ;;  %v4853_v55 = vld [vmem:[%s6283_s1 + $0xad8] ss:$20 sps:$4 sm:$0xff]   ;;  %v4855_v56 = vld [vmem:[%s6283_s1 + $0xc40] ss:$20 sps:$4 sm:$0xff]  }
 0x169   :  { %v4856_v57 = vld [vmem:[%s6283_s1 + $0xb00] ss:$20 sps:$4 sm:$0xff]  }
 0x16b   :  { %4098 = vmatpush3.bf16.msra.mxu0 %v4803_v58  ;;  %4120 = vmatpush3.bf16.msra.mxu1 %v4804_v59  ;;  %v4859_v58 = vld [vmem:[%s6283_s1 + $0xb28] ss:$20 sps:$4 sm:$0xff]  }
 0x16c   :  { %4099 = vmatprep.subr.bf16.mxu0 %v4805_v60  ;;  %4121 = vmatprep.subr.bf16.mxu1 %v4806_v61 }
 0x16f   :  { %4100 = vmatpush3.bf16.msra.mxu0 %v4807_v62  ;;  %4122 = vmatpush3.bf16.msra.mxu1 %v4808_v63 }
 0x170   :  { %4129 = vmatprep.subr.bf16.mxu0 %v4809_v0  ;;  %4151 = vmatprep.subr.bf16.mxu1 %v4811_v1 }
 0x172   :  { %3323 = vmatmul.mubr.bf16.vlgmr.msra.gmra.mrb[4].mxu0 %v4863_v6  ;;  %3364 = vmatmul.mubr.bf16.vlgmr.msra.gmra.mrb[4].mxu1 %v4864_v7 }
 0x173   :  { %4130 = vmatpush3.bf16.msra.mxu0 %v4810_v2  ;;  %4152 = vmatpush3.bf16.msra.mxu1 %v4812_v3 }
 0x174   :  { %4131 = vmatprep.subr.bf16.mxu0 %v4813_v4  ;;  %4153 = vmatprep.subr.bf16.mxu1 %v4815_v5 }
 0x175   :  { %3404 = vmatprep.mubr.bf16.mxu0 %v4865_v15  ;;  %3445 = vmatprep.mubr.bf16.mxu1 %v4866_v16 }
 0x177   :  { %4132 = vmatpush3.bf16.msra.mxu0 %v4814_v9  ;;  %4154 = vmatpush3.bf16.msra.mxu1 %v4816_v10 }
 0x178   :  { %4133 = vmatprep.subr.bf16.mxu0 %v4817_v11  ;;  %4155 = vmatprep.subr.bf16.mxu1 %v4819_v14 }
 0x17b   :  { %4134 = vmatpush3.bf16.msra.mxu0 %v4818_v17  ;;  %4156 = vmatpush3.bf16.msra.mxu1 %v4820_v18 }
 0x17c   :  { %4135 = vmatprep.subr.bf16.mxu0 %v4821_v19  ;;  %4157 = vmatprep.subr.bf16.mxu1 %v4823_v20 }
 0x17f   :  { %4136 = vmatpush3.bf16.msra.mxu0 %v4822_v21  ;;  %4158 = vmatpush3.bf16.msra.mxu1 %v4824_v22 }
 0x180   :  { %4137 = vmatprep.subr.bf16.mxu0 %v4825_v23  ;;  %4159 = vmatprep.subr.bf16.mxu1 %v4827_v24 }
 0x183   :  { %4138 = vmatpush3.bf16.msra.mxu0 %v4826_v25  ;;  %4160 = vmatpush3.bf16.msra.mxu1 %v4828_v26 }
 0x184   :  { %4139 = vmatprep.subr.bf16.mxu0 %v4829_v27  ;;  %4161 = vmatprep.subr.bf16.mxu1 %v4831_v28 }
 0x187   :  { %4140 = vmatpush3.bf16.msra.mxu0 %v4830_v29  ;;  %4162 = vmatpush3.bf16.msra.mxu1 %v4832_v30 }
 0x188   :  { %4141 = vmatprep.subr.bf16.mxu0 %v4833_v32  ;;  %4163 = vmatprep.subr.bf16.mxu1 %v4835_v33 }
 0x18b   :  { %4142 = vmatpush3.bf16.msra.mxu0 %v4834_v34  ;;  %4164 = vmatpush3.bf16.msra.mxu1 %v4836_v35 }
 0x18c   :  { %4143 = vmatprep.subr.bf16.mxu0 %v4837_v36  ;;  %4165 = vmatprep.subr.bf16.mxu1 %v4839_v37 }
 0x18f   :  { %4144 = vmatpush3.bf16.msra.mxu0 %v4838_v38  ;;  %4166 = vmatpush3.bf16.msra.mxu1 %v4840_v39 }
 0x190   :  { %4173 = vmatprep.subr.bf16.mxu0 %v4841_v40  ;;  %4200 = vmatprep.subr.bf16.mxu1 %v4869_v44 }
 0x192   :  { %3405 = vmatmul.mubr.bf16.vlgmr.msra.gmra.mrb[8].mxu0 %v4867_v45  ;;  %3446 = vmatmul.mubr.bf16.vlgmr.msra.gmra.mrb[8].mxu1 %v5688_v8  ;;  %v4846_v8 = vld [vmem:[%s6283_s1 + $0xa60] ss:$20 sps:$4 sm:$0xff]  }
 0x193   :  { %4174 = vmatpush3.bf16.msra.mxu0 %v4842_v41  ;;  %4201 = vmatpush3.bf16.msra.mxu1 %v4851_v42 }
 0x194   :  { %4175 = vmatprep.subr.bf16.mxu0 %v4843_v43  ;;  %4202 = vmatprep.subr.bf16.mxu1 %v4869_v44 }
 0x195   :  { %3486 = vmatprep.mubr.bf16.mxu0 %v5705_v13  ;;  %4208 = vmatprep.mubr.msk.bf16.mxu1 %vm4870_vm1, %v4869_v44  ;;  %v4848_v13 = vld [vmem:[%s6283_s1 + $0xa88] ss:$20 sps:$4 sm:$0xff]  }
 0x197   :  { %4176 = vmatpush3.bf16.msra.mxu0 %v4844_v46  ;;  %4203 = vmatpush3.bf16.msra.mxu1 %v4854_v47 }
 0x198   :  { %4177 = vmatprep.subr.bf16.mxu0 %v4845_v48  ;;  %4204 = vmatprep.subr.bf16.mxu1 %v4869_v44 }
 0x19b   :  { %4178 = vmatpush3.bf16.msra.mxu0 %v4846_v8  ;;  %4205 = vmatpush3.bf16.msra.mxu1 %v4857_v49 }
 0x19c   :  { %4179 = vmatprep.subr.bf16.mxu0 %v4847_v50  ;;  %4206 = vmatprep.subr.bf16.mxu1 %v4869_v44 }
 0x19f   :  { %4180 = vmatpush3.bf16.msra.mxu0 %v4848_v13  ;;  %4207 = vmatpush3.bf16.msra.mxu1 %v4860_v51 }
 0x1a0   :  { %4181 = vmatprep.subr.bf16.mxu0 %v4849_v52 }
 0x1a2   :  { %4209 = vmatmul.mubr.msk.bf16.vlgmr.msra.gmra.mrb[12].mxu1 %vm2770_vm0, %v5952_v31  ;;  %v4858_v31 = vld [vmem:[%s6283_s1 + $0xc68] ss:$20 sps:$4 sm:$0xff]   ;;  %s4872_s1 = smov 64  }
 0x1a3   :  { %4182 = vmatpush3.bf16.msra.mxu0 %v4850_v53 }
 0x1a4   :  { %4183 = vmatprep.subr.bf16.mxu0 %v4852_v54 }
 0x1a7   :  { %4184 = vmatpush3.bf16.msra.mxu0 %v4853_v55 }
 0x1a8   :  { %4185 = vmatprep.subr.bf16.mxu0 %v4855_v56 }
 0x1ab   :  { %4186 = vmatpush3.bf16.msra.mxu0 %v4856_v57 }
 0x1ac   :  { %4187 = vmatprep.subr.bf16.mxu0 %v4858_v31 }
 0x1af   :  { %4188 = vmatpush3.bf16.msra.mxu0 %v4859_v58 }
 0x1b2   :  { %3487 = vmatmul.mubr.bf16.vlgmr.msra.gmra.mrb[12].mxu0 %v5897_v12 }
 0x225   :  { %v6230_v59 = vpop.f32.mrb[0].mxu0  ;;  %v6232_v60 = vpop.f32.mrb[0].mxu1 }
 0x226   :  { %v6234_v61 = vpop.f32.mrb[1].mxu0  ;;  %v6236_v62 = vpop.f32.mrb[1].mxu1 }
 0x227   :  { %3563 = vrot.lane.b32.xlu0 %v6236_v62, %s4871_s23  ;;  %v6240_v63 = vpop.f32.mrb[2].mxu0  ;;  %v6242_v0 = vpop.f32.mrb[2].mxu1 }
 0x228   :  { %v6244_v1 = vpop.f32.mrb[3].mxu0  ;;  %v6246_v2 = vpop.f32.mrb[3].mxu1 }
 0x229   :  { %3567 = vrot.lane.b32.xlu1 %v6246_v2, %s4871_s23 }
 0x245   :  { %v4101_v12 = vpop.f32.mrb[4].mxu0  ;;  %v4123_v3 = vpop.f32.mrb[4].mxu1 }
 0x246   :  { %v4102_v4 = vpop.f32.mrb[5].mxu0  ;;  %v4124_v5 = vpop.f32.mrb[5].mxu1 }
 0x247   :  { %v4103_v6 = vadd.f32 %v4102_v4, %v4101_v12  ;;  %v4125_v7 = vadd.f32 %v4124_v5, %v4123_v3  ;;  %v4104_v9 = vpop.f32.mrb[6].mxu0  ;;  %v4126_v10 = vpop.f32.mrb[6].mxu1 }
 0x248   :  { %v4105_v11 = vpop.f32.mrb[7].mxu0  ;;  %v4127_v14 = vpop.f32.mrb[7].mxu1 }
 0x249   :  { %v3366_v15 = vadd.f32 %v4125_v7, %v4103_v6  ;;  %v4106_v16 = vadd.f32 %v4105_v11, %v4104_v9  ;;  %v4128_v17 = vadd.f32 %v4127_v14, %v4126_v10  ;;  %v3605_v6 = vlaneseq }
 0x24b   :  { %v3369_v18 = vadd.f32 %v4128_v17, %v4106_v16  ;;  %v3606_v7 = vshrl.u32 %v3605_v6, 7 }
 0x24d   :  { %v3611_v9 = vsub.s32 1, %v3606_v7 }
 0x265   :  { %v4145_v19 = vpop.f32.mrb[8].mxu0  ;;  %v4167_v20 = vpop.f32.mrb[8].mxu1 }
 0x266   :  { %v4146_v21 = vpop.f32.mrb[9].mxu0  ;;  %v4168_v22 = vpop.f32.mrb[9].mxu1 }
 0x267   :  { %v4147_v23 = vadd.f32 %v4146_v21, %v4145_v19  ;;  %v4148_v24 = vpop.f32.mrb[10].mxu0  ;;  %v4169_v25 = vadd.f32 %v4168_v22, %v4167_v20  ;;  %v4170_v26 = vpop.f32.mrb[10].mxu1 }
 0x268   :  { %v4149_v27 = vpop.f32.mrb[11].mxu0  ;;  %v4171_v28 = vpop.f32.mrb[11].mxu1 }
 0x269   :  { %v3407_v29 = vadd.f32 %v4147_v23, %v3366_v15  ;;  %v4150_v30 = vadd.f32 %v4149_v27, %v4148_v24  ;;  %v4172_v32 = vadd.f32 %v4171_v28, %v4170_v26 }
 0x26b   :  { %v3410_v33 = vadd.f32 %v4150_v30, %v3369_v18  ;;  %v3448_v34 = vadd.f32 %v4169_v25, %v3407_v29 }
 0x26d   :  { %v3451_v35 = vadd.f32 %v4172_v32, %v3410_v33 }
 0x275   :  { %v3529_v36 = vpop.f32.mrb[12].mxu1 }
 0x276   :  { %v4210_v37 = vpop.f32.mrb[13].mxu1 }
 0x277   :  { %v3532_v38 = vpop.f32.mrb[14].mxu1 }
 0x278   :  { %v4211_v39 = vpop.f32.mrb[15].mxu1 }
 0x285   :  { %v4189_v40 = vpop.f32.mrb[12].mxu0 }
 0x286   :  { %v4190_v41 = vpop.f32.mrb[13].mxu0 }
 0x287   :  { %v4191_v42 = vadd.f32 %v4190_v41, %v4189_v40  ;;  %v4192_v43 = vpop.f32.mrb[14].mxu0 }
 0x288   :  { %v4193_v44 = vpop.f32.mrb[15].mxu0 }
 0x289   :  { %v3489_v45 = vadd.f32 %v4191_v42, %v3448_v34  ;;  %v4194_v46 = vadd.f32 %v4193_v44, %v4192_v43 }
 0x28b   :  { %v3530_v47 = vadd.f32 %v3529_v36, %v3489_v45  ;;  %v3492_v48 = vadd.f32 %v4194_v46, %v3451_v35 }
 0x28d   :  { %v3533_v8 = vadd.f32 %v3532_v38, %v3492_v48  ;;  %3565 = vrot.lane.b32.xlu0 %v3530_v47, %s4871_s23 }
 0x28f   :  { %3569 = vrot.lane.b32.xlu1 %v3533_v8, %s4871_s23 }
 0x291   :  { %3540 = vrot.lane.b32.xlu0 %v6234_v61, %s4871_s23 }
 0x293   :  { %3542 = vrot.lane.b32.xlu1 %v6232_v60, %s4871_s23 }
 0x295   :  { %3544 = vrot.lane.b32.xlu0 %v6244_v1, %s4871_s23 }
 0x297   :  { %3546 = vrot.lane.b32.xlu1 %v6242_v0, %s4871_s23 }
 0x299   :  { %v3564_v49 = vpop.permute.xlu0 %3563 }
 0x29b   :  { %v3568_v50 = vpop.permute.xlu1 %3567 }
 0x2ff   :  { %v3566_v13 = vpop.permute.xlu0 %3565 }
 0x300   :  { %v3571_v51 = vsel %vm3548_vm2, %v3564_v49, %v3566_v13  ;;  %v3578_v52 = vmax.f32 %v6236_v62, %v3566_v13 }
 0x301   :  { %v3577_v53 = vmax.f32 %v6232_v60, %v3571_v51  ;;  %v3570_v54 = vpop.permute.xlu1 %3569 }
 0x302   :  { %v3572_v55 = vsel %vm3548_vm2, %v3568_v50, %v3570_v54  ;;  %3587 = vrot.lane.b32.xlu1 %v3578_v52, %s4872_s1  ;;  %v3580_v57 = vmax.f32 %v6246_v2, %v3570_v54  ;;  %v3607_v2 = vsub.s32 0, %v3606_v7 }
 0x303   :  { %3585 = vrot.lane.b32.xlu0 %v3577_v53, %s4872_s1  ;;  %v3541_v56 = vpop.permute.xlu0 %3540  ;;  %v3579_v31 = vmax.f32 %v6242_v0, %v3572_v55  ;;  %v3603_v0 = vld [vmem:[%s6285_s2] sm:$0x3] }
 0x304   :  { %v3612_v11 = vrot.slane %v3603_v0, %v3611_v9  ;;  %v3608_v15 = vrot.slane %v3603_v0, %v3607_v2 }
 0x305   :  { %v3543_v58 = vpop.permute.xlu1 %3542 }
 0x306   :  { %v3549_v12 = vsel %vm3548_vm2, %v3541_v56, %v3543_v58  ;;  %3591 = vrot.lane.b32.xlu1 %v3580_v57, %s4872_s1  ;;  %v3556_v10 = vmax.f32 %v6234_v61, %v3543_v58 }
 0x307   :  { %v3555_v3 = vmax.f32 %v6230_v59, %v3549_v12  ;;  %3589 = vrot.lane.b32.xlu0 %v3579_v31, %s4872_s1  ;;  %v3545_v62 = vpop.permute.xlu0 %3544 }
 0x309   :  { %v3547_v60 = vpop.permute.xlu1 %3546 }
 0x30a   :  { %v3550_v4 = vsel %vm3548_vm2, %v3545_v62, %v3547_v60  ;;  %v3558_v18 = vmax.f32 %v6244_v1, %v3547_v60 }
 0x30b   :  { %v3557_v5 = vmax.f32 %v6240_v63, %v3550_v4 }
 0x374   :  { %v3588_v14 = vpop.permute.xlu1 %3587 }
 0x375   :  { %v3600_v59 = vmax.f32 %v3556_v10, %v3588_v14  ;;  %v3586_v16 = vpop.permute.xlu0 %3585 }
 0x376   :  { %v3593_v17 = vsel %vm2770_vm0, %v3586_v16, %v3588_v14 }
 0x377   :  { %v3616_v63 = vadd.f32 %v3612_v11, %v3600_v59  ;;  %v3599_v19 = vmax.f32 %v3555_v3, %v3593_v17 }
 0x378   :  { %v3592_v20 = vpop.permute.xlu1 %3591 }
 0x379   :  { %v3615_v21 = vadd.f32 %v3608_v15, %v3599_v19  ;;  %v3602_v22 = vmax.f32 %v3558_v18, %v3592_v20  ;;  %v3590_v23 = vpop.permute.xlu0 %3589  ;;  %v3620_v61 = vmax.f32 %v3616_v63, 0.0 }
 0x37a   :  { %v3594_v24 = vsel %vm2770_vm0, %v3590_v23, %v3592_v20 }
 0x37b   :  { %v3619_v25 = vmax.f32 %v3615_v21, 0.0  ;;  %v3618_v26 = vadd.f32 %v3612_v11, %v3602_v22  ;;  %v3601_v27 = vmax.f32 %v3557_v5, %v3594_v24 }
 0x37d   :  { %v4083_v28 = vpack.c.bf16 %v3620_v61, %v3619_v25  ;;  %v3617_v29 = vadd.f32 %v3608_v15, %v3601_v27  ;;  %v3622_v1 = vmax.f32 %v3618_v26, 0.0 }
 0x37f   :  { %3638 = vst.msk [vmem:[%s6286_s3] sm:$0xff] %vm3637_vm5, %v4083_v28  ;;  %v3621_v30 = vmax.f32 %v3617_v29, 0.0 }
 0x381   :  { %v4084_v32 = vpack.c.bf16 %v3622_v1, %v3621_v30 }
 0x383   :  { %3642 = vst.msk [vmem:[%s6286_s3 + $0x8] sm:$0x11] %vm3641_vm8, %v4084_v32 }

</bundles_post_ra>
